<compile_context>
chip_gen: v5e
topology: v5e:2x2
jax: 0.10.0
libtpu: 0.0.40
codegen_flags: <defaults>
</compile_context>

<pallas_src>
import functools

import jax
import jax.numpy as jnp
from jax import lax
from jax.experimental import pallas as pl
from jax.experimental.pallas import tpu as pltpu

HIGHWAY_BIAS = -2.0  # args.bias, added to the SRU forget-gate bias


def _vmem_spec():
    return pl.BlockSpec(memory_space=pltpu.MemorySpace.VMEM)


# ---------------------------------------------------------------------------
# Fused forward kernel: embedding -> SRU stack -> adaptive-softmax NLL
# ---------------------------------------------------------------------------
def _fused_forward_kernel(x_ref, y_ref, m_ref, w_ref, v_ref, b_ref, h0_ref,
                          loss_ref, hT_ref, *, L, B, D):
    """
    x_ref  : (N, 1) int32           tokens (batch-padded), N = L*B, row n = t*B + b
    y_ref  : (1, N) int32           targets (lane-major)
    m_ref  : (V, D) bf16            tied M = E @ P
    w_ref  : (depth, D, 3D) bf16    SRU gate weights (single fused matmul per layer)
    v_ref  : (depth, 2, D) f32      SRU weight_c (vf, vr)
    b_ref  : (depth, 2, D) f32      SRU bias (bf includes highway bias, br)
    h0_ref : (depth, B, D) f32      initial cell states
    loss_ref: (1, N) f32            per-token NLL (lane-dense, N multiple of 128)
    hT_ref : (depth*B, D) f32       final cell states (single concatenated store)
    """
    N = L * B
    V = m_ref.shape[0]
    depth = w_ref.shape[0]

    m = m_ref[...]                                                    # (V, D) bf16

    # ---- AdaptiveEmbedding (head cluster, tied): one-hot gather on the MXU.
    # TODO(synk): transformer-xl AdaptiveEmbedding may scale the output by
    # sqrt(d_proj); no scale applied here (matches previous reference behaviour).
    cols = lax.broadcasted_iota(jnp.int32, (N, V), 1)
    onehot_x = (cols == x_ref[...]).astype(jnp.bfloat16)              # (N, V)
    out2d = jnp.dot(onehot_x, m, preferred_element_type=jnp.float32)  # (N, D) f32
    # dropout p=0.0 -> identity

    # ---- SRU stack ----
    #   f_t = sigmoid(U1_t + vf * c_{t-1} + bf)
    #   c_t = u0_t + f_t * (c_{t-1} - u0_t)
    #   r_t = sigmoid(U2_t + vr * c_t + br)
    #   h_t = x_t + r_t * (c_t - x_t)           (highway connection)
    hT_rows = []
    for l in range(depth):
        # One fused gate matmul per layer (bf16 operands, f32 accumulation).
        u = jnp.dot(out2d.astype(jnp.bfloat16), w_ref[l],
                    preferred_element_type=jnp.float32)               # (N, 3D)
        u0 = u[:, 0:D]
        # Bulk bias adds over the full (N, D) -> off the serial recurrence path.
        u1b = u[:, D:2 * D] + b_ref[l, 0:1, :]
        u2b = u[:, 2 * D:3 * D] + b_ref[l, 1:2, :]
        # Pre-broadcast (1, D) -> (B, D) once per layer (JAX doesn't CSE broadcasts).
        vf = jnp.broadcast_to(v_ref[l, 0:1, :], (B, D))
        vr = jnp.broadcast_to(v_ref[l, 1:2, :], (B, D))

        c = h0_ref[l]                                                 # (B, D)
        hs = []
        for t in range(L):                                            # fully unrolled
            r0, r1 = t * B, (t + 1) * B                               # sublane-aligned (B % 8 == 0)
            xt = out2d[r0:r1]
            u0t = u0[r0:r1]
            f = jax.nn.sigmoid(u1b[r0:r1] + vf * c)
            c = u0t + f * (c - u0t)
            r = jax.nn.sigmoid(u2b[r0:r1] + vr * c)
            hs.append(xt + r * (c - xt))
        hT_rows.append(c)
        out2d = jnp.concatenate(hs, axis=0)                           # (N, D), stays resident
    # dropout p=0.0 -> identity

    # Single concatenated store of all final cell states.
    # TODO(synk): a fully lane-dense (depth, B*D) write needs an in-kernel
    # sublane->lane reshape; the sublane-concatenated layout is kept for safe lowering.
    hT_ref[...] = jnp.concatenate(hT_rows, axis=0)                    # (depth*B, D)

    # ---- AdaptiveLogSoftmax head (tied): loss = logsumexp(logits) - logits[target]
    # Transposed logits (V, N) so reductions land lane-dense as (1, N).
    # TODO(synk): only the head cluster of AdaptiveLogSoftmax is implemented; tail
    # clusters are never reached because vocab < cutoffs[0].
    logits_t = lax.dot_general(m, out2d.astype(jnp.bfloat16),
                               (((1,), (1,)), ((), ())),
                               preferred_element_type=jnp.float32)    # (V, N)
    mx = jnp.max(logits_t, axis=0, keepdims=True)                     # (1, N)
    lse = mx + jnp.log(jnp.sum(jnp.exp(logits_t - mx), axis=0, keepdims=True))
    rows = lax.broadcasted_iota(jnp.int32, (V, N), 0)
    onehot_y = (rows == y_ref[...]).astype(jnp.float32)               # (V, N)
    tgt = jnp.sum(logits_t * onehot_y, axis=0, keepdims=True)         # (1, N)
    loss_ref[...] = lse - tgt


# ---------------------------------------------------------------------------
# Parameter init (deterministic, mirrors init_weights(init_range=0.03))
# ---------------------------------------------------------------------------
def init_params(key, vocab, n_e, n_d, depth, init_range=0.03):
    ks = jax.random.split(key, 2 + depth)
    emb = jax.random.uniform(ks[0], (vocab, n_e), jnp.float32,
                             -init_range, init_range)        # tied E
    proj = jax.random.uniform(ks[1], (n_e, n_d), jnp.float32,
                              -init_range, init_range)        # tied P
    layers = []
    for l in range(depth):
        kw, kv = jax.random.split(ks[2 + l])
        w = jax.random.uniform(kw, (n_d, 3 * n_d), jnp.float32,
                               -init_range, init_range)       # CustomLinear weight
        vc = jax.random.uniform(kv, (2, n_d), jnp.float32,
                                -init_range, init_range)      # SRU weight_c
        b = jnp.zeros((2, n_d), jnp.float32).at[0].add(HIGHWAY_BIAS)
        layers.append((w, vc, b))
    return emb, proj, layers


# ---------------------------------------------------------------------------
# Model.forward equivalent: returns (loss (L, B), new_hidden (depth, B, n_d))
# ---------------------------------------------------------------------------
def model_forward(params, x, y, hidden):
    emb_table, proj, layers = params
    L, B = x.shape
    n_d = proj.shape[1]
    depth = len(layers)

    # Pad batch to a multiple of 8 sublanes; bump further (bounded) so that
    # N = L*Bp is a multiple of 128 -> lane-dense, unmasked loss stores and
    # tile-aligned per-timestep slices. Padded rows are sliced away afterwards.
    Bp = ((B + 7) // 8) * 8
    while (L * Bp) % 128 != 0 and Bp < 128:
        Bp += 8
    N = L * Bp

    # Weight tying exploited algebraically: M = E @ P, computed once per step.
    # bf16 MXU operands, f32 accumulation inside the kernel.
    m = jnp.dot(emb_table, proj,
                preferred_element_type=jnp.float32).astype(jnp.bfloat16)   # (V, n_d)

    w_all = jnp.stack([w for (w, _, _) in layers], axis=0).astype(jnp.bfloat16)  # (depth, D, 3D)
    v_all = jnp.stack([vc for (_, vc, _) in layers], axis=0)                      # (depth, 2, D)
    b_all = jnp.stack([b for (_, _, b) in layers], axis=0)                        # (depth, 2, D)

    # Batch-pad tokens / targets / hidden.
    x_p = jnp.zeros((L, Bp), jnp.int32).at[:, :B].set(x.astype(jnp.int32))
    y_p = jnp.zeros((L, Bp), jnp.int32).at[:, :B].set(y.astype(jnp.int32))
    h0_p = jnp.zeros((depth, Bp, n_d), jnp.float32).at[:, :B, :].set(hidden)

    x_col = x_p.reshape(N, 1)
    y_row = y_p.reshape(1, N)

    kernel = functools.partial(_fused_forward_kernel, L=L, B=Bp, D=n_d)
    loss_row, hT_flat = pl.pallas_call(
        kernel,
        out_shape=(jax.ShapeDtypeStruct((1, N), jnp.float32),
                   jax.ShapeDtypeStruct((depth * Bp, n_d), jnp.float32)),
        in_specs=[_vmem_spec()] * 7,
        out_specs=(_vmem_spec(), _vmem_spec()),
    )(x_col, y_row, m, w_all, v_all, b_all, h0_p)

    loss = loss_row.reshape(L, Bp)[:, :B]                        # loss.view(y.size(0), -1)
    new_hidden = hT_flat.reshape(depth, Bp, n_d)[:, :B, :]
    return loss, new_hidden


if __name__ == "__main__":
    vocab, n_e, n_d, depth = 64, 16, 32, 2
    L, B = 8, 2

    key = jax.random.PRNGKey(0)
    kp, kx, ky = jax.random.split(key, 3)
    params = init_params(kp, vocab, n_e, n_d, depth)
    x = jax.random.randint(kx, (L, B), 0, vocab, dtype=jnp.int32)
    y = jax.random.randint(ky, (L, B), 0, vocab, dtype=jnp.int32)
    hidden = jnp.zeros((depth, B, n_d), jnp.float32)            # init_hidden

    fwd = jax.jit(model_forward)
    loss, new_hidden = fwd(params, x, y, hidden)
    jax.block_until_ready((loss, new_hidden))
    assert loss.shape == (L, B)
    assert new_hidden.shape == (depth, B, n_d)
    assert bool(jnp.all(jnp.isfinite(loss)))
    assert bool(jnp.all(jnp.isfinite(new_hidden)))
    print("KERNEL_OK")
</pallas_src>

<mosaic_0001>
module attributes {stable_mosaic.version = 11 : i64} {
  func.func @_fused_forward_kernel(%arg0: memref<128x1xi32, #tpu.memory_space<vmem>>, %arg1: memref<1x128xi32, #tpu.memory_space<vmem>>, %arg2: memref<64x32xbf16, #tpu.memory_space<vmem>>, %arg3: memref<2x32x96xbf16, #tpu.memory_space<vmem>>, %arg4: memref<2x2x32xf32, #tpu.memory_space<vmem>>, %arg5: memref<2x2x32xf32, #tpu.memory_space<vmem>>, %arg6: memref<2x16x32xf32, #tpu.memory_space<vmem>>, %arg7: memref<1x128xf32, #tpu.memory_space<vmem>>, %arg8: memref<32x32xf32, #tpu.memory_space<vmem>>) attributes {dimension_semantics = [], scalar_prefetch = 0 : i64, scratch_operands = 0 : i64, tpu.core_type = #tpu.core_type<tc>} {
    %c0 = arith.constant 0 : index
    %c0_0 = arith.constant 0 : index
    %0 = vector.load %arg2[%c0, %c0_0] : memref<64x32xbf16, #tpu.memory_space<vmem>>, vector<64x32xbf16>
    %1 = tpu.iota {dimensions = array<i32: 1>} : vector<128x64xi32>
    %c0_1 = arith.constant 0 : index
    %c0_2 = arith.constant 0 : index
    %2 = vector.load %arg0[%c0_1, %c0_2] : memref<128x1xi32, #tpu.memory_space<vmem>>, vector<128x1xi32>
    %3 = vector.broadcast %2 : vector<128x1xi32> to vector<128x64xi32>
    %4 = arith.cmpi eq, %1, %3 : vector<128x64xi32>
    %5 = arith.extui %4 : vector<128x64xi1> to vector<128x64xi32>
    %6 = arith.sitofp %5 : vector<128x64xi32> to vector<128x64xf32>
    %7 = arith.truncf %6 : vector<128x64xf32> to vector<128x64xbf16>
    %cst = arith.constant dense<0.000000e+00> : vector<128x32xf32>
    %8 = tpu.matmul %7, %0, %cst {dimension_numbers = #tpu.dot_dimension_numbers<[1], [0], [0], [1], [0, 0, 1, 1], [], []>} : vector<128x64xbf16>, vector<64x32xbf16>, vector<128x32xf32> -> vector<128x32xf32>
    %9 = arith.truncf %8 : vector<128x32xf32> to vector<128x32xbf16>
    %c0_3 = arith.constant 0 : index
    %c0_4 = arith.constant 0 : index
    %c0_5 = arith.constant 0 : index
    %10 = vector.load %arg3[%c0_3, %c0_4, %c0_5] : memref<2x32x96xbf16, #tpu.memory_space<vmem>>, vector<1x32x96xbf16>
    %11 = vector.shape_cast %10 : vector<1x32x96xbf16> to vector<32x96xbf16>
    %cst_6 = arith.constant dense<0.000000e+00> : vector<128x96xf32>
    %12 = tpu.matmul %9, %11, %cst_6 {dimension_numbers = #tpu.dot_dimension_numbers<[1], [0], [0], [1], [0, 0, 1, 1], [], []>} : vector<128x32xbf16>, vector<32x96xbf16>, vector<128x96xf32> -> vector<128x96xf32>
    %13 = vector.extract_strided_slice %12 {offsets = [0, 0], sizes = [128, 32], strides = [1, 1]} : vector<128x96xf32> to vector<128x32xf32>
    %14 = vector.extract_strided_slice %12 {offsets = [0, 32], sizes = [128, 32], strides = [1, 1]} : vector<128x96xf32> to vector<128x32xf32>
    %c0_7 = arith.constant 0 : index
    %c0_8 = arith.constant 0 : index
    %c0_9 = arith.constant 0 : index
    %15 = vector.load %arg5[%c0_7, %c0_8, %c0_9] : memref<2x2x32xf32, #tpu.memory_space<vmem>>, vector<1x1x32xf32>
    %16 = vector.shape_cast %15 : vector<1x1x32xf32> to vector<1x32xf32>
    %17 = vector.broadcast %16 : vector<1x32xf32> to vector<128x32xf32>
    %18 = arith.addf %14, %17 : vector<128x32xf32>
    %19 = vector.extract_strided_slice %12 {offsets = [0, 64], sizes = [128, 32], strides = [1, 1]} : vector<128x96xf32> to vector<128x32xf32>
    %c0_10 = arith.constant 0 : index
    %c1 = arith.constant 1 : index
    %c0_11 = arith.constant 0 : index
    %20 = vector.load %arg5[%c0_10, %c1, %c0_11] : memref<2x2x32xf32, #tpu.memory_space<vmem>>, vector<1x1x32xf32>
    %21 = vector.shape_cast %20 : vector<1x1x32xf32> to vector<1x32xf32>
    %22 = vector.broadcast %21 : vector<1x32xf32> to vector<128x32xf32>
    %23 = arith.addf %19, %22 : vector<128x32xf32>
    %c0_12 = arith.constant 0 : index
    %c0_13 = arith.constant 0 : index
    %c0_14 = arith.constant 0 : index
    %24 = vector.load %arg4[%c0_12, %c0_13, %c0_14] : memref<2x2x32xf32, #tpu.memory_space<vmem>>, vector<1x1x32xf32>
    %25 = vector.shape_cast %24 : vector<1x1x32xf32> to vector<1x32xf32>
    %26 = vector.shape_cast %25 : vector<1x32xf32> to vector<1x32xf32>
    %27 = vector.broadcast %26 : vector<1x32xf32> to vector<16x32xf32>
    %c0_15 = arith.constant 0 : index
    %c1_16 = arith.constant 1 : index
    %c0_17 = arith.constant 0 : index
    %28 = vector.load %arg4[%c0_15, %c1_16, %c0_17] : memref<2x2x32xf32, #tpu.memory_space<vmem>>, vector<1x1x32xf32>
    %29 = vector.shape_cast %28 : vector<1x1x32xf32> to vector<1x32xf32>
    %30 = vector.shape_cast %29 : vector<1x32xf32> to vector<1x32xf32>
    %31 = vector.broadcast %30 : vector<1x32xf32> to vector<16x32xf32>
    %c0_18 = arith.constant 0 : index
    %c0_19 = arith.constant 0 : index
    %c0_20 = arith.constant 0 : index
    %32 = vector.load %arg6[%c0_18, %c0_19, %c0_20] : memref<2x16x32xf32, #tpu.memory_space<vmem>>, vector<1x16x32xf32>
    %33 = vector.shape_cast %32 : vector<1x16x32xf32> to vector<16x32xf32>
    %34 = vector.extract_strided_slice %8 {offsets = [0, 0], sizes = [16, 32], strides = [1, 1]} : vector<128x32xf32> to vector<16x32xf32>
    %35 = vector.extract_strided_slice %13 {offsets = [0, 0], sizes = [16, 32], strides = [1, 1]} : vector<128x32xf32> to vector<16x32xf32>
    %36 = vector.extract_strided_slice %18 {offsets = [0, 0], sizes = [16, 32], strides = [1, 1]} : vector<128x32xf32> to vector<16x32xf32>
    %37 = arith.mulf %27, %33 : vector<16x32xf32>
    %38 = arith.addf %36, %37 : vector<16x32xf32>
    %39 = arith.negf %38 : vector<16x32xf32>
    %40 = math.exp %39 : vector<16x32xf32>
    %cst_21 = arith.constant 1.000000e+00 : f32
    %41 = vector.broadcast %cst_21 : f32 to vector<16x32xf32>
    %42 = arith.addf %41, %40 : vector<16x32xf32>
    %43 = arith.divf %41, %42 : vector<16x32xf32>
    %44 = arith.subf %33, %35 : vector<16x32xf32>
    %45 = arith.mulf %43, %44 : vector<16x32xf32>
    %46 = arith.addf %35, %45 : vector<16x32xf32>
    %47 = vector.extract_strided_slice %23 {offsets = [0, 0], sizes = [16, 32], strides = [1, 1]} : vector<128x32xf32> to vector<16x32xf32>
    %48 = arith.mulf %31, %46 : vector<16x32xf32>
    %49 = arith.addf %47, %48 : vector<16x32xf32>
    %50 = arith.negf %49 : vector<16x32xf32>
    %51 = math.exp %50 : vector<16x32xf32>
    %cst_22 = arith.constant 1.000000e+00 : f32
    %52 = vector.broadcast %cst_22 : f32 to vector<16x32xf32>
    %53 = arith.addf %52, %51 : vector<16x32xf32>
    %54 = arith.divf %52, %53 : vector<16x32xf32>
    %55 = arith.subf %46, %34 : vector<16x32xf32>
    %56 = arith.mulf %54, %55 : vector<16x32xf32>
    %57 = arith.addf %34, %56 : vector<16x32xf32>
    %58 = vector.extract_strided_slice %8 {offsets = [16, 0], sizes = [16, 32], strides = [1, 1]} : vector<128x32xf32> to vector<16x32xf32>
    %59 = vector.extract_strided_slice %13 {offsets = [16, 0], sizes = [16, 32], strides = [1, 1]} : vector<128x32xf32> to vector<16x32xf32>
    %60 = vector.extract_strided_slice %18 {offsets = [16, 0], sizes = [16, 32], strides = [1, 1]} : vector<128x32xf32> to vector<16x32xf32>
    %61 = arith.mulf %27, %46 : vector<16x32xf32>
    %62 = arith.addf %60, %61 : vector<16x32xf32>
    %63 = arith.negf %62 : vector<16x32xf32>
    %64 = math.exp %63 : vector<16x32xf32>
    %cst_23 = arith.constant 1.000000e+00 : f32
    %65 = vector.broadcast %cst_23 : f32 to vector<16x32xf32>
    %66 = arith.addf %65, %64 : vector<16x32xf32>
    %67 = arith.divf %65, %66 : vector<16x32xf32>
    %68 = arith.subf %46, %59 : vector<16x32xf32>
    %69 = arith.mulf %67, %68 : vector<16x32xf32>
    %70 = arith.addf %59, %69 : vector<16x32xf32>
    %71 = vector.extract_strided_slice %23 {offsets = [16, 0], sizes = [16, 32], strides = [1, 1]} : vector<128x32xf32> to vector<16x32xf32>
    %72 = arith.mulf %31, %70 : vector<16x32xf32>
    %73 = arith.addf %71, %72 : vector<16x32xf32>
    %74 = arith.negf %73 : vector<16x32xf32>
    %75 = math.exp %74 : vector<16x32xf32>
    %cst_24 = arith.constant 1.000000e+00 : f32
    %76 = vector.broadcast %cst_24 : f32 to vector<16x32xf32>
    %77 = arith.addf %76, %75 : vector<16x32xf32>
    %78 = arith.divf %76, %77 : vector<16x32xf32>
    %79 = arith.subf %70, %58 : vector<16x32xf32>
    %80 = arith.mulf %78, %79 : vector<16x32xf32>
    %81 = arith.addf %58, %80 : vector<16x32xf32>
    %82 = vector.extract_strided_slice %8 {offsets = [32, 0], sizes = [16, 32], strides = [1, 1]} : vector<128x32xf32> to vector<16x32xf32>
    %83 = vector.extract_strided_slice %13 {offsets = [32, 0], sizes = [16, 32], strides = [1, 1]} : vector<128x32xf32> to vector<16x32xf32>
    %84 = vector.extract_strided_slice %18 {offsets = [32, 0], sizes = [16, 32], strides = [1, 1]} : vector<128x32xf32> to vector<16x32xf32>
    %85 = arith.mulf %27, %70 : vector<16x32xf32>
    %86 = arith.addf %84, %85 : vector<16x32xf32>
    %87 = arith.negf %86 : vector<16x32xf32>
    %88 = math.exp %87 : vector<16x32xf32>
    %cst_25 = arith.constant 1.000000e+00 : f32
    %89 = vector.broadcast %cst_25 : f32 to vector<16x32xf32>
    %90 = arith.addf %89, %88 : vector<16x32xf32>
    %91 = arith.divf %89, %90 : vector<16x32xf32>
    %92 = arith.subf %70, %83 : vector<16x32xf32>
    %93 = arith.mulf %91, %92 : vector<16x32xf32>
    %94 = arith.addf %83, %93 : vector<16x32xf32>
    %95 = vector.extract_strided_slice %23 {offsets = [32, 0], sizes = [16, 32], strides = [1, 1]} : vector<128x32xf32> to vector<16x32xf32>
    %96 = arith.mulf %31, %94 : vector<16x32xf32>
    %97 = arith.addf %95, %96 : vector<16x32xf32>
    %98 = arith.negf %97 : vector<16x32xf32>
    %99 = math.exp %98 : vector<16x32xf32>
    %cst_26 = arith.constant 1.000000e+00 : f32
    %100 = vector.broadcast %cst_26 : f32 to vector<16x32xf32>
    %101 = arith.addf %100, %99 : vector<16x32xf32>
    %102 = arith.divf %100, %101 : vector<16x32xf32>
    %103 = arith.subf %94, %82 : vector<16x32xf32>
    %104 = arith.mulf %102, %103 : vector<16x32xf32>
    %105 = arith.addf %82, %104 : vector<16x32xf32>
    %106 = vector.extract_strided_slice %8 {offsets = [48, 0], sizes = [16, 32], strides = [1, 1]} : vector<128x32xf32> to vector<16x32xf32>
    %107 = vector.extract_strided_slice %13 {offsets = [48, 0], sizes = [16, 32], strides = [1, 1]} : vector<128x32xf32> to vector<16x32xf32>
    %108 = vector.extract_strided_slice %18 {offsets = [48, 0], sizes = [16, 32], strides = [1, 1]} : vector<128x32xf32> to vector<16x32xf32>
    %109 = arith.mulf %27, %94 : vector<16x32xf32>
    %110 = arith.addf %108, %109 : vector<16x32xf32>
    %111 = arith.negf %110 : vector<16x32xf32>
    %112 = math.exp %111 : vector<16x32xf32>
    %cst_27 = arith.constant 1.000000e+00 : f32
    %113 = vector.broadcast %cst_27 : f32 to vector<16x32xf32>
    %114 = arith.addf %113, %112 : vector<16x32xf32>
    %115 = arith.divf %113, %114 : vector<16x32xf32>
    %116 = arith.subf %94, %107 : vector<16x32xf32>
    %117 = arith.mulf %115, %116 : vector<16x32xf32>
    %118 = arith.addf %107, %117 : vector<16x32xf32>
    %119 = vector.extract_strided_slice %23 {offsets = [48, 0], sizes = [16, 32], strides = [1, 1]} : vector<128x32xf32> to vector<16x32xf32>
    %120 = arith.mulf %31, %118 : vector<16x32xf32>
    %121 = arith.addf %119, %120 : vector<16x32xf32>
    %122 = arith.negf %121 : vector<16x32xf32>
    %123 = math.exp %122 : vector<16x32xf32>
    %cst_28 = arith.constant 1.000000e+00 : f32
    %124 = vector.broadcast %cst_28 : f32 to vector<16x32xf32>
    %125 = arith.addf %124, %123 : vector<16x32xf32>
    %126 = arith.divf %124, %125 : vector<16x32xf32>
    %127 = arith.subf %118, %106 : vector<16x32xf32>
    %128 = arith.mulf %126, %127 : vector<16x32xf32>
    %129 = arith.addf %106, %128 : vector<16x32xf32>
    %130 = vector.extract_strided_slice %8 {offsets = [64, 0], sizes = [16, 32], strides = [1, 1]} : vector<128x32xf32> to vector<16x32xf32>
    %131 = vector.extract_strided_slice %13 {offsets = [64, 0], sizes = [16, 32], strides = [1, 1]} : vector<128x32xf32> to vector<16x32xf32>
    %132 = vector.extract_strided_slice %18 {offsets = [64, 0], sizes = [16, 32], strides = [1, 1]} : vector<128x32xf32> to vector<16x32xf32>
    %133 = arith.mulf %27, %118 : vector<16x32xf32>
    %134 = arith.addf %132, %133 : vector<16x32xf32>
    %135 = arith.negf %134 : vector<16x32xf32>
    %136 = math.exp %135 : vector<16x32xf32>
    %cst_29 = arith.constant 1.000000e+00 : f32
    %137 = vector.broadcast %cst_29 : f32 to vector<16x32xf32>
    %138 = arith.addf %137, %136 : vector<16x32xf32>
    %139 = arith.divf %137, %138 : vector<16x32xf32>
    %140 = arith.subf %118, %131 : vector<16x32xf32>
    %141 = arith.mulf %139, %140 : vector<16x32xf32>
    %142 = arith.addf %131, %141 : vector<16x32xf32>
    %143 = vector.extract_strided_slice %23 {offsets = [64, 0], sizes = [16, 32], strides = [1, 1]} : vector<128x32xf32> to vector<16x32xf32>
    %144 = arith.mulf %31, %142 : vector<16x32xf32>
    %145 = arith.addf %143, %144 : vector<16x32xf32>
    %146 = arith.negf %145 : vector<16x32xf32>
    %147 = math.exp %146 : vector<16x32xf32>
    %cst_30 = arith.constant 1.000000e+00 : f32
    %148 = vector.broadcast %cst_30 : f32 to vector<16x32xf32>
    %149 = arith.addf %148, %147 : vector<16x32xf32>
    %150 = arith.divf %148, %149 : vector<16x32xf32>
    %151 = arith.subf %142, %130 : vector<16x32xf32>
    %152 = arith.mulf %150, %151 : vector<16x32xf32>
    %153 = arith.addf %130, %152 : vector<16x32xf32>
    %154 = vector.extract_strided_slice %8 {offsets = [80, 0], sizes = [16, 32], strides = [1, 1]} : vector<128x32xf32> to vector<16x32xf32>
    %155 = vector.extract_strided_slice %13 {offsets = [80, 0], sizes = [16, 32], strides = [1, 1]} : vector<128x32xf32> to vector<16x32xf32>
    %156 = vector.extract_strided_slice %18 {offsets = [80, 0], sizes = [16, 32], strides = [1, 1]} : vector<128x32xf32> to vector<16x32xf32>
    %157 = arith.mulf %27, %142 : vector<16x32xf32>
    %158 = arith.addf %156, %157 : vector<16x32xf32>
    %159 = arith.negf %158 : vector<16x32xf32>
    %160 = math.exp %159 : vector<16x32xf32>
    %cst_31 = arith.constant 1.000000e+00 : f32
    %161 = vector.broadcast %cst_31 : f32 to vector<16x32xf32>
    %162 = arith.addf %161, %160 : vector<16x32xf32>
    %163 = arith.divf %161, %162 : vector<16x32xf32>
    %164 = arith.subf %142, %155 : vector<16x32xf32>
    %165 = arith.mulf %163, %164 : vector<16x32xf32>
    %166 = arith.addf %155, %165 : vector<16x32xf32>
    %167 = vector.extract_strided_slice %23 {offsets = [80, 0], sizes = [16, 32], strides = [1, 1]} : vector<128x32xf32> to vector<16x32xf32>
    %168 = arith.mulf %31, %166 : vector<16x32xf32>
    %169 = arith.addf %167, %168 : vector<16x32xf32>
    %170 = arith.negf %169 : vector<16x32xf32>
    %171 = math.exp %170 : vector<16x32xf32>
    %cst_32 = arith.constant 1.000000e+00 : f32
    %172 = vector.broadcast %cst_32 : f32 to vector<16x32xf32>
    %173 = arith.addf %172, %171 : vector<16x32xf32>
    %174 = arith.divf %172, %173 : vector<16x32xf32>
    %175 = arith.subf %166, %154 : vector<16x32xf32>
    %176 = arith.mulf %174, %175 : vector<16x32xf32>
    %177 = arith.addf %154, %176 : vector<16x32xf32>
    %178 = vector.extract_strided_slice %8 {offsets = [96, 0], sizes = [16, 32], strides = [1, 1]} : vector<128x32xf32> to vector<16x32xf32>
    %179 = vector.extract_strided_slice %13 {offsets = [96, 0], sizes = [16, 32], strides = [1, 1]} : vector<128x32xf32> to vector<16x32xf32>
    %180 = vector.extract_strided_slice %18 {offsets = [96, 0], sizes = [16, 32], strides = [1, 1]} : vector<128x32xf32> to vector<16x32xf32>
    %181 = arith.mulf %27, %166 : vector<16x32xf32>
    %182 = arith.addf %180, %181 : vector<16x32xf32>
    %183 = arith.negf %182 : vector<16x32xf32>
    %184 = math.exp %183 : vector<16x32xf32>
    %cst_33 = arith.constant 1.000000e+00 : f32
    %185 = vector.broadcast %cst_33 : f32 to vector<16x32xf32>
    %186 = arith.addf %185, %184 : vector<16x32xf32>
    %187 = arith.divf %185, %186 : vector<16x32xf32>
    %188 = arith.subf %166, %179 : vector<16x32xf32>
    %189 = arith.mulf %187, %188 : vector<16x32xf32>
    %190 = arith.addf %179, %189 : vector<16x32xf32>
    %191 = vector.extract_strided_slice %23 {offsets = [96, 0], sizes = [16, 32], strides = [1, 1]} : vector<128x32xf32> to vector<16x32xf32>
    %192 = arith.mulf %31, %190 : vector<16x32xf32>
    %193 = arith.addf %191, %192 : vector<16x32xf32>
    %194 = arith.negf %193 : vector<16x32xf32>
    %195 = math.exp %194 : vector<16x32xf32>
    %cst_34 = arith.constant 1.000000e+00 : f32
    %196 = vector.broadcast %cst_34 : f32 to vector<16x32xf32>
    %197 = arith.addf %196, %195 : vector<16x32xf32>
    %198 = arith.divf %196, %197 : vector<16x32xf32>
    %199 = arith.subf %190, %178 : vector<16x32xf32>
    %200 = arith.mulf %198, %199 : vector<16x32xf32>
    %201 = arith.addf %178, %200 : vector<16x32xf32>
    %202 = vector.extract_strided_slice %8 {offsets = [112, 0], sizes = [16, 32], strides = [1, 1]} : vector<128x32xf32> to vector<16x32xf32>
    %203 = vector.extract_strided_slice %13 {offsets = [112, 0], sizes = [16, 32], strides = [1, 1]} : vector<128x32xf32> to vector<16x32xf32>
    %204 = vector.extract_strided_slice %18 {offsets = [112, 0], sizes = [16, 32], strides = [1, 1]} : vector<128x32xf32> to vector<16x32xf32>
    %205 = arith.mulf %27, %190 : vector<16x32xf32>
    %206 = arith.addf %204, %205 : vector<16x32xf32>
    %207 = arith.negf %206 : vector<16x32xf32>
    %208 = math.exp %207 : vector<16x32xf32>
    %cst_35 = arith.constant 1.000000e+00 : f32
    %209 = vector.broadcast %cst_35 : f32 to vector<16x32xf32>
    %210 = arith.addf %209, %208 : vector<16x32xf32>
    %211 = arith.divf %209, %210 : vector<16x32xf32>
    %212 = arith.subf %190, %203 : vector<16x32xf32>
    %213 = arith.mulf %211, %212 : vector<16x32xf32>
    %214 = arith.addf %203, %213 : vector<16x32xf32>
    %215 = vector.extract_strided_slice %23 {offsets = [112, 0], sizes = [16, 32], strides = [1, 1]} : vector<128x32xf32> to vector<16x32xf32>
    %216 = arith.mulf %31, %214 : vector<16x32xf32>
    %217 = arith.addf %215, %216 : vector<16x32xf32>
    %218 = arith.negf %217 : vector<16x32xf32>
    %219 = math.exp %218 : vector<16x32xf32>
    %cst_36 = arith.constant 1.000000e+00 : f32
    %220 = vector.broadcast %cst_36 : f32 to vector<16x32xf32>
    %221 = arith.addf %220, %219 : vector<16x32xf32>
    %222 = arith.divf %220, %221 : vector<16x32xf32>
    %223 = arith.subf %214, %202 : vector<16x32xf32>
    %224 = arith.mulf %222, %223 : vector<16x32xf32>
    %225 = arith.addf %202, %224 : vector<16x32xf32>
    %226 = tpu.concatenate %57, %81, %105, %129, %153, %177, %201, %225 in 0 : vector<16x32xf32>, vector<16x32xf32>, vector<16x32xf32>, vector<16x32xf32>, vector<16x32xf32>, vector<16x32xf32>, vector<16x32xf32>, vector<16x32xf32> -> vector<128x32xf32>
    %227 = arith.truncf %226 : vector<128x32xf32> to vector<128x32xbf16>
    %c1_37 = arith.constant 1 : index
    %c0_38 = arith.constant 0 : index
    %c0_39 = arith.constant 0 : index
    %228 = vector.load %arg3[%c1_37, %c0_38, %c0_39] : memref<2x32x96xbf16, #tpu.memory_space<vmem>>, vector<1x32x96xbf16>
    %229 = vector.shape_cast %228 : vector<1x32x96xbf16> to vector<32x96xbf16>
    %cst_40 = arith.constant dense<0.000000e+00> : vector<128x96xf32>
    %230 = tpu.matmul %227, %229, %cst_40 {dimension_numbers = #tpu.dot_dimension_numbers<[1], [0], [0], [1], [0, 0, 1, 1], [], []>} : vector<128x32xbf16>, vector<32x96xbf16>, vector<128x96xf32> -> vector<128x96xf32>
    %231 = vector.extract_strided_slice %230 {offsets = [0, 0], sizes = [128, 32], strides = [1, 1]} : vector<128x96xf32> to vector<128x32xf32>
    %232 = vector.extract_strided_slice %230 {offsets = [0, 32], sizes = [128, 32], strides = [1, 1]} : vector<128x96xf32> to vector<128x32xf32>
    %c1_41 = arith.constant 1 : index
    %c0_42 = arith.constant 0 : index
    %c0_43 = arith.constant 0 : index
    %233 = vector.load %arg5[%c1_41, %c0_42, %c0_43] : memref<2x2x32xf32, #tpu.memory_space<vmem>>, vector<1x1x32xf32>
    %234 = vector.shape_cast %233 : vector<1x1x32xf32> to vector<1x32xf32>
    %235 = vector.broadcast %234 : vector<1x32xf32> to vector<128x32xf32>
    %236 = arith.addf %232, %235 : vector<128x32xf32>
    %237 = vector.extract_strided_slice %230 {offsets = [0, 64], sizes = [128, 32], strides = [1, 1]} : vector<128x96xf32> to vector<128x32xf32>
    %c1_44 = arith.constant 1 : index
    %c1_45 = arith.constant 1 : index
    %c0_46 = arith.constant 0 : index
    %238 = vector.load %arg5[%c1_44, %c1_45, %c0_46] : memref<2x2x32xf32, #tpu.memory_space<vmem>>, vector<1x1x32xf32>
    %239 = vector.shape_cast %238 : vector<1x1x32xf32> to vector<1x32xf32>
    %240 = vector.broadcast %239 : vector<1x32xf32> to vector<128x32xf32>
    %241 = arith.addf %237, %240 : vector<128x32xf32>
    %c1_47 = arith.constant 1 : index
    %c0_48 = arith.constant 0 : index
    %c0_49 = arith.constant 0 : index
    %242 = vector.load %arg4[%c1_47, %c0_48, %c0_49] : memref<2x2x32xf32, #tpu.memory_space<vmem>>, vector<1x1x32xf32>
    %243 = vector.shape_cast %242 : vector<1x1x32xf32> to vector<1x32xf32>
    %244 = vector.shape_cast %243 : vector<1x32xf32> to vector<1x32xf32>
    %245 = vector.broadcast %244 : vector<1x32xf32> to vector<16x32xf32>
    %c1_50 = arith.constant 1 : index
    %c1_51 = arith.constant 1 : index
    %c0_52 = arith.constant 0 : index
    %246 = vector.load %arg4[%c1_50, %c1_51, %c0_52] : memref<2x2x32xf32, #tpu.memory_space<vmem>>, vector<1x1x32xf32>
    %247 = vector.shape_cast %246 : vector<1x1x32xf32> to vector<1x32xf32>
    %248 = vector.shape_cast %247 : vector<1x32xf32> to vector<1x32xf32>
    %249 = vector.broadcast %248 : vector<1x32xf32> to vector<16x32xf32>
    %c1_53 = arith.constant 1 : index
    %c0_54 = arith.constant 0 : index
    %c0_55 = arith.constant 0 : index
    %250 = vector.load %arg6[%c1_53, %c0_54, %c0_55] : memref<2x16x32xf32, #tpu.memory_space<vmem>>, vector<1x16x32xf32>
    %251 = vector.shape_cast %250 : vector<1x16x32xf32> to vector<16x32xf32>
    %252 = vector.extract_strided_slice %226 {offsets = [0, 0], sizes = [16, 32], strides = [1, 1]} : vector<128x32xf32> to vector<16x32xf32>
    %253 = vector.extract_strided_slice %231 {offsets = [0, 0], sizes = [16, 32], strides = [1, 1]} : vector<128x32xf32> to vector<16x32xf32>
    %254 = vector.extract_strided_slice %236 {offsets = [0, 0], sizes = [16, 32], strides = [1, 1]} : vector<128x32xf32> to vector<16x32xf32>
    %255 = arith.mulf %245, %251 : vector<16x32xf32>
    %256 = arith.addf %254, %255 : vector<16x32xf32>
    %257 = arith.negf %256 : vector<16x32xf32>
    %258 = math.exp %257 : vector<16x32xf32>
    %cst_56 = arith.constant 1.000000e+00 : f32
    %259 = vector.broadcast %cst_56 : f32 to vector<16x32xf32>
    %260 = arith.addf %259, %258 : vector<16x32xf32>
    %261 = arith.divf %259, %260 : vector<16x32xf32>
    %262 = arith.subf %251, %253 : vector<16x32xf32>
    %263 = arith.mulf %261, %262 : vector<16x32xf32>
    %264 = arith.addf %253, %263 : vector<16x32xf32>
    %265 = vector.extract_strided_slice %241 {offsets = [0, 0], sizes = [16, 32], strides = [1, 1]} : vector<128x32xf32> to vector<16x32xf32>
    %266 = arith.mulf %249, %264 : vector<16x32xf32>
    %267 = arith.addf %265, %266 : vector<16x32xf32>
    %268 = arith.negf %267 : vector<16x32xf32>
    %269 = math.exp %268 : vector<16x32xf32>
    %cst_57 = arith.constant 1.000000e+00 : f32
    %270 = vector.broadcast %cst_57 : f32 to vector<16x32xf32>
    %271 = arith.addf %270, %269 : vector<16x32xf32>
    %272 = arith.divf %270, %271 : vector<16x32xf32>
    %273 = arith.subf %264, %252 : vector<16x32xf32>
    %274 = arith.mulf %272, %273 : vector<16x32xf32>
    %275 = arith.addf %252, %274 : vector<16x32xf32>
    %276 = vector.extract_strided_slice %226 {offsets = [16, 0], sizes = [16, 32], strides = [1, 1]} : vector<128x32xf32> to vector<16x32xf32>
    %277 = vector.extract_strided_slice %231 {offsets = [16, 0], sizes = [16, 32], strides = [1, 1]} : vector<128x32xf32> to vector<16x32xf32>
    %278 = vector.extract_strided_slice %236 {offsets = [16, 0], sizes = [16, 32], strides = [1, 1]} : vector<128x32xf32> to vector<16x32xf32>
    %279 = arith.mulf %245, %264 : vector<16x32xf32>
    %280 = arith.addf %278, %279 : vector<16x32xf32>
    %281 = arith.negf %280 : vector<16x32xf32>
    %282 = math.exp %281 : vector<16x32xf32>
    %cst_58 = arith.constant 1.000000e+00 : f32
    %283 = vector.broadcast %cst_58 : f32 to vector<16x32xf32>
    %284 = arith.addf %283, %282 : vector<16x32xf32>
    %285 = arith.divf %283, %284 : vector<16x32xf32>
    %286 = arith.subf %264, %277 : vector<16x32xf32>
    %287 = arith.mulf %285, %286 : vector<16x32xf32>
    %288 = arith.addf %277, %287 : vector<16x32xf32>
    %289 = vector.extract_strided_slice %241 {offsets = [16, 0], sizes = [16, 32], strides = [1, 1]} : vector<128x32xf32> to vector<16x32xf32>
    %290 = arith.mulf %249, %288 : vector<16x32xf32>
    %291 = arith.addf %289, %290 : vector<16x32xf32>
    %292 = arith.negf %291 : vector<16x32xf32>
    %293 = math.exp %292 : vector<16x32xf32>
    %cst_59 = arith.constant 1.000000e+00 : f32
    %294 = vector.broadcast %cst_59 : f32 to vector<16x32xf32>
    %295 = arith.addf %294, %293 : vector<16x32xf32>
    %296 = arith.divf %294, %295 : vector<16x32xf32>
    %297 = arith.subf %288, %276 : vector<16x32xf32>
    %298 = arith.mulf %296, %297 : vector<16x32xf32>
    %299 = arith.addf %276, %298 : vector<16x32xf32>
    %300 = vector.extract_strided_slice %226 {offsets = [32, 0], sizes = [16, 32], strides = [1, 1]} : vector<128x32xf32> to vector<16x32xf32>
    %301 = vector.extract_strided_slice %231 {offsets = [32, 0], sizes = [16, 32], strides = [1, 1]} : vector<128x32xf32> to vector<16x32xf32>
    %302 = vector.extract_strided_slice %236 {offsets = [32, 0], sizes = [16, 32], strides = [1, 1]} : vector<128x32xf32> to vector<16x32xf32>
    %303 = arith.mulf %245, %288 : vector<16x32xf32>
    %304 = arith.addf %302, %303 : vector<16x32xf32>
    %305 = arith.negf %304 : vector<16x32xf32>
    %306 = math.exp %305 : vector<16x32xf32>
    %cst_60 = arith.constant 1.000000e+00 : f32
    %307 = vector.broadcast %cst_60 : f32 to vector<16x32xf32>
    %308 = arith.addf %307, %306 : vector<16x32xf32>
    %309 = arith.divf %307, %308 : vector<16x32xf32>
    %310 = arith.subf %288, %301 : vector<16x32xf32>
    %311 = arith.mulf %309, %310 : vector<16x32xf32>
    %312 = arith.addf %301, %311 : vector<16x32xf32>
    %313 = vector.extract_strided_slice %241 {offsets = [32, 0], sizes = [16, 32], strides = [1, 1]} : vector<128x32xf32> to vector<16x32xf32>
    %314 = arith.mulf %249, %312 : vector<16x32xf32>
    %315 = arith.addf %313, %314 : vector<16x32xf32>
    %316 = arith.negf %315 : vector<16x32xf32>
    %317 = math.exp %316 : vector<16x32xf32>
    %cst_61 = arith.constant 1.000000e+00 : f32
    %318 = vector.broadcast %cst_61 : f32 to vector<16x32xf32>
    %319 = arith.addf %318, %317 : vector<16x32xf32>
    %320 = arith.divf %318, %319 : vector<16x32xf32>
    %321 = arith.subf %312, %300 : vector<16x32xf32>
    %322 = arith.mulf %320, %321 : vector<16x32xf32>
    %323 = arith.addf %300, %322 : vector<16x32xf32>
    %324 = vector.extract_strided_slice %226 {offsets = [48, 0], sizes = [16, 32], strides = [1, 1]} : vector<128x32xf32> to vector<16x32xf32>
    %325 = vector.extract_strided_slice %231 {offsets = [48, 0], sizes = [16, 32], strides = [1, 1]} : vector<128x32xf32> to vector<16x32xf32>
    %326 = vector.extract_strided_slice %236 {offsets = [48, 0], sizes = [16, 32], strides = [1, 1]} : vector<128x32xf32> to vector<16x32xf32>
    %327 = arith.mulf %245, %312 : vector<16x32xf32>
    %328 = arith.addf %326, %327 : vector<16x32xf32>
    %329 = arith.negf %328 : vector<16x32xf32>
    %330 = math.exp %329 : vector<16x32xf32>
    %cst_62 = arith.constant 1.000000e+00 : f32
    %331 = vector.broadcast %cst_62 : f32 to vector<16x32xf32>
    %332 = arith.addf %331, %330 : vector<16x32xf32>
    %333 = arith.divf %331, %332 : vector<16x32xf32>
    %334 = arith.subf %312, %325 : vector<16x32xf32>
    %335 = arith.mulf %333, %334 : vector<16x32xf32>
    %336 = arith.addf %325, %335 : vector<16x32xf32>
    %337 = vector.extract_strided_slice %241 {offsets = [48, 0], sizes = [16, 32], strides = [1, 1]} : vector<128x32xf32> to vector<16x32xf32>
    %338 = arith.mulf %249, %336 : vector<16x32xf32>
    %339 = arith.addf %337, %338 : vector<16x32xf32>
    %340 = arith.negf %339 : vector<16x32xf32>
    %341 = math.exp %340 : vector<16x32xf32>
    %cst_63 = arith.constant 1.000000e+00 : f32
    %342 = vector.broadcast %cst_63 : f32 to vector<16x32xf32>
    %343 = arith.addf %342, %341 : vector<16x32xf32>
    %344 = arith.divf %342, %343 : vector<16x32xf32>
    %345 = arith.subf %336, %324 : vector<16x32xf32>
    %346 = arith.mulf %344, %345 : vector<16x32xf32>
    %347 = arith.addf %324, %346 : vector<16x32xf32>
    %348 = vector.extract_strided_slice %226 {offsets = [64, 0], sizes = [16, 32], strides = [1, 1]} : vector<128x32xf32> to vector<16x32xf32>
    %349 = vector.extract_strided_slice %231 {offsets = [64, 0], sizes = [16, 32], strides = [1, 1]} : vector<128x32xf32> to vector<16x32xf32>
    %350 = vector.extract_strided_slice %236 {offsets = [64, 0], sizes = [16, 32], strides = [1, 1]} : vector<128x32xf32> to vector<16x32xf32>
    %351 = arith.mulf %245, %336 : vector<16x32xf32>
    %352 = arith.addf %350, %351 : vector<16x32xf32>
    %353 = arith.negf %352 : vector<16x32xf32>
    %354 = math.exp %353 : vector<16x32xf32>
    %cst_64 = arith.constant 1.000000e+00 : f32
    %355 = vector.broadcast %cst_64 : f32 to vector<16x32xf32>
    %356 = arith.addf %355, %354 : vector<16x32xf32>
    %357 = arith.divf %355, %356 : vector<16x32xf32>
    %358 = arith.subf %336, %349 : vector<16x32xf32>
    %359 = arith.mulf %357, %358 : vector<16x32xf32>
    %360 = arith.addf %349, %359 : vector<16x32xf32>
    %361 = vector.extract_strided_slice %241 {offsets = [64, 0], sizes = [16, 32], strides = [1, 1]} : vector<128x32xf32> to vector<16x32xf32>
    %362 = arith.mulf %249, %360 : vector<16x32xf32>
    %363 = arith.addf %361, %362 : vector<16x32xf32>
    %364 = arith.negf %363 : vector<16x32xf32>
    %365 = math.exp %364 : vector<16x32xf32>
    %cst_65 = arith.constant 1.000000e+00 : f32
    %366 = vector.broadcast %cst_65 : f32 to vector<16x32xf32>
    %367 = arith.addf %366, %365 : vector<16x32xf32>
    %368 = arith.divf %366, %367 : vector<16x32xf32>
    %369 = arith.subf %360, %348 : vector<16x32xf32>
    %370 = arith.mulf %368, %369 : vector<16x32xf32>
    %371 = arith.addf %348, %370 : vector<16x32xf32>
    %372 = vector.extract_strided_slice %226 {offsets = [80, 0], sizes = [16, 32], strides = [1, 1]} : vector<128x32xf32> to vector<16x32xf32>
    %373 = vector.extract_strided_slice %231 {offsets = [80, 0], sizes = [16, 32], strides = [1, 1]} : vector<128x32xf32> to vector<16x32xf32>
    %374 = vector.extract_strided_slice %236 {offsets = [80, 0], sizes = [16, 32], strides = [1, 1]} : vector<128x32xf32> to vector<16x32xf32>
    %375 = arith.mulf %245, %360 : vector<16x32xf32>
    %376 = arith.addf %374, %375 : vector<16x32xf32>
    %377 = arith.negf %376 : vector<16x32xf32>
    %378 = math.exp %377 : vector<16x32xf32>
    %cst_66 = arith.constant 1.000000e+00 : f32
    %379 = vector.broadcast %cst_66 : f32 to vector<16x32xf32>
    %380 = arith.addf %379, %378 : vector<16x32xf32>
    %381 = arith.divf %379, %380 : vector<16x32xf32>
    %382 = arith.subf %360, %373 : vector<16x32xf32>
    %383 = arith.mulf %381, %382 : vector<16x32xf32>
    %384 = arith.addf %373, %383 : vector<16x32xf32>
    %385 = vector.extract_strided_slice %241 {offsets = [80, 0], sizes = [16, 32], strides = [1, 1]} : vector<128x32xf32> to vector<16x32xf32>
    %386 = arith.mulf %249, %384 : vector<16x32xf32>
    %387 = arith.addf %385, %386 : vector<16x32xf32>
    %388 = arith.negf %387 : vector<16x32xf32>
    %389 = math.exp %388 : vector<16x32xf32>
    %cst_67 = arith.constant 1.000000e+00 : f32
    %390 = vector.broadcast %cst_67 : f32 to vector<16x32xf32>
    %391 = arith.addf %390, %389 : vector<16x32xf32>
    %392 = arith.divf %390, %391 : vector<16x32xf32>
    %393 = arith.subf %384, %372 : vector<16x32xf32>
    %394 = arith.mulf %392, %393 : vector<16x32xf32>
    %395 = arith.addf %372, %394 : vector<16x32xf32>
    %396 = vector.extract_strided_slice %226 {offsets = [96, 0], sizes = [16, 32], strides = [1, 1]} : vector<128x32xf32> to vector<16x32xf32>
    %397 = vector.extract_strided_slice %231 {offsets = [96, 0], sizes = [16, 32], strides = [1, 1]} : vector<128x32xf32> to vector<16x32xf32>
    %398 = vector.extract_strided_slice %236 {offsets = [96, 0], sizes = [16, 32], strides = [1, 1]} : vector<128x32xf32> to vector<16x32xf32>
    %399 = arith.mulf %245, %384 : vector<16x32xf32>
    %400 = arith.addf %398, %399 : vector<16x32xf32>
    %401 = arith.negf %400 : vector<16x32xf32>
    %402 = math.exp %401 : vector<16x32xf32>
    %cst_68 = arith.constant 1.000000e+00 : f32
    %403 = vector.broadcast %cst_68 : f32 to vector<16x32xf32>
    %404 = arith.addf %403, %402 : vector<16x32xf32>
    %405 = arith.divf %403, %404 : vector<16x32xf32>
    %406 = arith.subf %384, %397 : vector<16x32xf32>
    %407 = arith.mulf %405, %406 : vector<16x32xf32>
    %408 = arith.addf %397, %407 : vector<16x32xf32>
    %409 = vector.extract_strided_slice %241 {offsets = [96, 0], sizes = [16, 32], strides = [1, 1]} : vector<128x32xf32> to vector<16x32xf32>
    %410 = arith.mulf %249, %408 : vector<16x32xf32>
    %411 = arith.addf %409, %410 : vector<16x32xf32>
    %412 = arith.negf %411 : vector<16x32xf32>
    %413 = math.exp %412 : vector<16x32xf32>
    %cst_69 = arith.constant 1.000000e+00 : f32
    %414 = vector.broadcast %cst_69 : f32 to vector<16x32xf32>
    %415 = arith.addf %414, %413 : vector<16x32xf32>
    %416 = arith.divf %414, %415 : vector<16x32xf32>
    %417 = arith.subf %408, %396 : vector<16x32xf32>
    %418 = arith.mulf %416, %417 : vector<16x32xf32>
    %419 = arith.addf %396, %418 : vector<16x32xf32>
    %420 = vector.extract_strided_slice %226 {offsets = [112, 0], sizes = [16, 32], strides = [1, 1]} : vector<128x32xf32> to vector<16x32xf32>
    %421 = vector.extract_strided_slice %231 {offsets = [112, 0], sizes = [16, 32], strides = [1, 1]} : vector<128x32xf32> to vector<16x32xf32>
    %422 = vector.extract_strided_slice %236 {offsets = [112, 0], sizes = [16, 32], strides = [1, 1]} : vector<128x32xf32> to vector<16x32xf32>
    %423 = arith.mulf %245, %408 : vector<16x32xf32>
    %424 = arith.addf %422, %423 : vector<16x32xf32>
    %425 = arith.negf %424 : vector<16x32xf32>
    %426 = math.exp %425 : vector<16x32xf32>
    %cst_70 = arith.constant 1.000000e+00 : f32
    %427 = vector.broadcast %cst_70 : f32 to vector<16x32xf32>
    %428 = arith.addf %427, %426 : vector<16x32xf32>
    %429 = arith.divf %427, %428 : vector<16x32xf32>
    %430 = arith.subf %408, %421 : vector<16x32xf32>
    %431 = arith.mulf %429, %430 : vector<16x32xf32>
    %432 = arith.addf %421, %431 : vector<16x32xf32>
    %433 = vector.extract_strided_slice %241 {offsets = [112, 0], sizes = [16, 32], strides = [1, 1]} : vector<128x32xf32> to vector<16x32xf32>
    %434 = arith.mulf %249, %432 : vector<16x32xf32>
    %435 = arith.addf %433, %434 : vector<16x32xf32>
    %436 = arith.negf %435 : vector<16x32xf32>
    %437 = math.exp %436 : vector<16x32xf32>
    %cst_71 = arith.constant 1.000000e+00 : f32
    %438 = vector.broadcast %cst_71 : f32 to vector<16x32xf32>
    %439 = arith.addf %438, %437 : vector<16x32xf32>
    %440 = arith.divf %438, %439 : vector<16x32xf32>
    %441 = arith.subf %432, %420 : vector<16x32xf32>
    %442 = arith.mulf %440, %441 : vector<16x32xf32>
    %443 = arith.addf %420, %442 : vector<16x32xf32>
    %444 = tpu.concatenate %275, %299, %323, %347, %371, %395, %419, %443 in 0 : vector<16x32xf32>, vector<16x32xf32>, vector<16x32xf32>, vector<16x32xf32>, vector<16x32xf32>, vector<16x32xf32>, vector<16x32xf32>, vector<16x32xf32> -> vector<128x32xf32>
    %445 = tpu.concatenate %214, %432 in 0 : vector<16x32xf32>, vector<16x32xf32> -> vector<32x32xf32>
    %c0_72 = arith.constant 0 : index
    %c0_73 = arith.constant 0 : index
    %446 = vector.load %arg8[%c0_72, %c0_73] : memref<32x32xf32, #tpu.memory_space<vmem>>, vector<32x32xf32>
    tpu.vector_store %arg8[%c0_72, %c0_73], %445 {strides = array<i32>} : memref<32x32xf32, #tpu.memory_space<vmem>>, vector<32x32xf32>,
    %447 = arith.truncf %444 : vector<128x32xf32> to vector<128x32xbf16>
    %cst_74 = arith.constant dense<0.000000e+00> : vector<64x128xf32>
    %448 = tpu.matmul %0, %447, %cst_74 {dimension_numbers = #tpu.dot_dimension_numbers<[1], [1], [0], [0], [0, 0, 1, 0], [], []>} : vector<64x32xbf16>, vector<128x32xbf16>, vector<64x128xf32> -> vector<64x128xf32>
    %cst_75 = arith.constant dense<0xFF800000> : vector<128xf32>
    %449 = vector.multi_reduction <maximumf>, %448, %cst_75 [0] : vector<64x128xf32> to vector<128xf32>
    %450 = vector.shape_cast %449 : vector<128xf32> to vector<1x128xf32>
    %451 = vector.broadcast %450 : vector<1x128xf32> to vector<64x128xf32>
    %452 = arith.subf %448, %451 : vector<64x128xf32>
    %453 = math.exp %452 : vector<64x128xf32>
    %cst_76 = arith.constant dense<0.000000e+00> : vector<128xf32>
    %454 = vector.multi_reduction <add>, %453, %cst_76 [0] : vector<64x128xf32> to vector<128xf32>
    %455 = vector.shape_cast %454 : vector<128xf32> to vector<1x128xf32>
    %456 = math.log %455 : vector<1x128xf32>
    %457 = arith.addf %450, %456 : vector<1x128xf32>
    %458 = tpu.iota {dimensions = array<i32: 0>} : vector<64x128xi32>
    %c0_77 = arith.constant 0 : index
    %c0_78 = arith.constant 0 : index
    %459 = vector.load %arg1[%c0_77, %c0_78] : memref<1x128xi32, #tpu.memory_space<vmem>>, vector<1x128xi32>
    %460 = vector.broadcast %459 : vector<1x128xi32> to vector<64x128xi32>
    %461 = arith.cmpi eq, %458, %460 : vector<64x128xi32>
    %462 = arith.extui %461 : vector<64x128xi1> to vector<64x128xi32>
    %463 = arith.sitofp %462 : vector<64x128xi32> to vector<64x128xf32>
    %464 = arith.mulf %448, %463 : vector<64x128xf32>
    %cst_79 = arith.constant dense<0.000000e+00> : vector<128xf32>
    %465 = vector.multi_reduction <add>, %464, %cst_79 [0] : vector<64x128xf32> to vector<128xf32>
    %466 = vector.shape_cast %465 : vector<128xf32> to vector<1x128xf32>
    %467 = arith.subf %457, %466 : vector<1x128xf32>
    %c0_80 = arith.constant 0 : index
    %c0_81 = arith.constant 0 : index
    %468 = vector.load %arg7[%c0_80, %c0_81] : memref<1x128xf32, #tpu.memory_space<vmem>>, vector<1x128xf32>
    tpu.vector_store %arg7[%c0_80, %c0_81], %467 {strides = array<i32>} : memref<1x128xf32, #tpu.memory_space<vmem>>, vector<1x128xf32>,
    return
  }
}

</mosaic_0001>

<bundles_post_ra>
// kernel: model_forward.1
= control target key start
LH: loop header
LB: loop body
LE: loop exit
PB: predicated region body
PF: predicated region fallthrough
CT: control target
= control target key end

     0   :  { %v3523_v0 = vmov 0   ;;  %v4920_v11 = vlaneseq  ;;  %v4918_v16 = vmov 0.0   ;;  %vm183_vm2 = vcmask 523264   ;;  %s3525_s15 = smov 32   ;;  %s3526_s22 = smov 64   ;;  %s4909_s0 = inlined_call_operand.vmem [shape: s32[128,1], index: 0, kind: input, shape index: {}]   ;;  %s4910_s2 = inlined_call_operand.vmem [shape: bf16[64,32], index: 2, kind: input, shape index: {}]   ;;  %s4911_s5 = inlined_call_operand.vmem [shape: f32[2,2,32], index: 5, kind: input, shape index: {}]   ;;  %s4912_s4 = inlined_call_operand.vmem [shape: f32[2,2,32], index: 4, kind: input, shape index: {}]   ;;  %s4913_s3 = inlined_call_operand.vmem [shape: bf16[2,32,96], index: 3, kind: input, shape index: {}]   ;;  %s4914_s6 = inlined_call_operand.vmem [shape: f32[2,16,32], index: 6, kind: input, shape index: {}]   ;;  %s4915_s8 = inlined_call_operand.vmem [shape: f32[32,32], index: 8, kind: output, shape index: {1}]   ;;  %s4916_s1 = inlined_call_operand.vmem [shape: s32[1,128], index: 1, kind: input, shape index: {}]   ;;  %s4917_s7 = inlined_call_operand.vmem [shape: f32[1,128], index: 7, kind: output, shape index: {0}]  }
   0x1   :  { %3227 = vset.pattern.permute.xlu0 %v3523_v0  ;;  %v39_v1 = vld [vmem:[%s4909_s0] sm:$0xff]  ;;  %3228 = vset.pattern.permute.xlu1 %v3523_v0  ;;  %v41_v2 = vld [vmem:[%s4909_s0 + $0x10] sm:$0xff]  ;;  %v3217_v4 = vld [vmem:[%s4910_s2 + $0x18] sm:$0xff]  ;;  %vm281_vm7 = vcmask 261120   ;;  %s3527_s23 = smov 96  }
   0x2   :  { %56 = vperm.xlu0 %3227, %v39_v1   ;;  %62 = vperm.xlu1 %3228, %v41_v2   ;;  %v43_v3 = vld [vmem:[%s4909_s0 + $0x20] sm:$0xff]  ;;  %v40_v5 = vld [vmem:[%s4909_s0 + $0x8] sm:$0xff]  ;;  %v42_v6 = vld [vmem:[%s4909_s0 + $0x18] sm:$0xff]  ;;  %v3604_v13 = vand.u32 127, %v4920_v11 }
   0x3   :  { %3229 = vset.pattern.permute.xlu2 %v3523_v0  ;;  %212 = vmatpush.bf16.msra.mxu0 %v3217_v4  ;;  %v44_v7 = vld [vmem:[%s4909_s0 + $0x28] sm:$0xff]  ;;  %v3216_v8 = vld [vmem:[%s4910_s2 + $0x10] sm:$0xff]  ;;  %v3214_v10 = vld [vmem:[%s4910_s2] sm:$0xff] }
   0x4   :  { %68 = vperm.xlu2 %3229, %v43_v3   ;;  %v3215_v9 = vld [vmem:[%s4910_s2 + $0x8] sm:$0xff]  ;;  %v3218_v30 = vld [vmem:[%s4913_s3] sm:$0xff]  ;;  %v45_v46 = vld [vmem:[%s4909_s0 + $0x30] sm:$0xff] }
   0x5   :  { %v3219_v29 = vld [vmem:[%s4913_s3 + $0x8] sm:$0xff]  ;;  %v3230_v31 = vld [vmem:[%s4911_s5] ss:$0 sm:$0xff]  ;;  %v46_v50 = vld [vmem:[%s4909_s0 + $0x38] sm:$0xff] }
   0x6   :  { %312 = vmatpush.bf16.msra.mxu1 %v3219_v29  ;;  %v3633_v32 = vld [vmem:[%s4912_s4] ss:$0 sm:$0xff]  ;;  %v404_v34 = vld [vmem:[%s4914_s6 + $0x8] sm:$0xff]  ;;  %v3232_v52 = vld [vmem:[%s4911_s5 + $0x1] ss:$0 sm:$0xff] }
   0x7   :  { %213 = vmatpush.bf16.msra.mxu0 %v3216_v8  ;;  %v403_v33 = vld [vmem:[%s4914_s6] sm:$0xff]  ;;  %v406_v36 = vmul.f32 %v3633_v32, %v404_v34 }
   0x8   :  { %v405_v35 = vmul.f32 %v3633_v32, %v403_v33 }
   0xa   :  { %59 = vperm.xlu0 %3227, %v40_v5   ;;  %65 = vperm.xlu1 %3228, %v42_v6  }
   0xb   :  { %214 = vmatpush.bf16.msra.mxu0 %v3215_v9  ;;  %313 = vmatpush.bf16.msra.mxu1 %v3218_v30 }
   0xc   :  { %71 = vperm.xlu2 %3229, %v44_v7  }
   0xf   :  { %215 = vmatpush.bf16.msra.mxu0 %v3214_v10 }
  0x12   :  { %358 = vrot.lane.b32.xlu0 %v3230_v31, %s3525_s15  ;;  %409 = vrot.lane.b32.xlu1 %v405_v35, %s3525_s15  ;;  %v3701_v35 = vld [vmem:[%s4912_s4 + $0x1] ss:$0 sm:$0xff] }
  0x14   :  { %411 = vrot.lane.b32.xlu2 %v406_v36, %s3525_s15 }
  0x1c   :  { %74 = vperm.xlu2 %3229, %v45_v46  }
  0x5e   :  { %v69_v23 = vpop.permute.xlu2 %68 }
  0x5f   :  { %vm107_vm5 = vcmp.eq.s32.totalorder %v3604_v13, %v69_v23 }
  0x60   :  { %v3060_v26 = vsel %vm107_vm5, 1.0, %v4918_v16 }
  0x66   :  { %v72_v25 = vpop.permute.xlu2 %71 }
  0x67   :  { %vm108_vm6 = vcmp.eq.s32.totalorder %v3604_v13, %v72_v25 }
  0x68   :  { %v3061_v27 = vsel %vm108_vm6, 1.0, %v4918_v16 }
  0x69   :  { %v153_v28 = vpack.c.bf16 %v3061_v27, %v3060_v26 }
  0x6e   :  { %v412_v59 = vpop.permute.xlu2 %411 }
  0x74   :  { %v57_v12 = vpop.permute.xlu0 %56  ;;  %v63_v14 = vpop.permute.xlu1 %62 }
  0x75   :  { %vm103_vm0 = vcmp.eq.s32.totalorder %v3604_v13, %v57_v12  ;;  %vm105_vm3 = vcmp.eq.s32.totalorder %v3604_v13, %v63_v14 }
  0x76   :  { %v3056_v17 = vsel %vm103_vm0, 1.0, %v4918_v16  ;;  %v3058_v21 = vsel %vm105_vm3, 1.0, %v4918_v16 }
  0x7c   :  { %v60_v15 = vpop.permute.xlu0 %59  ;;  %v66_v20 = vpop.permute.xlu1 %65 }
  0x7d   :  { %vm104_vm1 = vcmp.eq.s32.totalorder %v3604_v13, %v60_v15  ;;  %vm106_vm4 = vcmp.eq.s32.totalorder %v3604_v13, %v66_v20 }
  0x7e   :  { %v3057_v18 = vsel %vm104_vm1, 1.0, %v4918_v16  ;;  %v3059_v22 = vsel %vm106_vm4, 1.0, %v4918_v16 }
  0x7f   :  { %v151_v19 = vpack.c.bf16 %v3057_v18, %v3056_v17  ;;  %v152_v24 = vpack.c.bf16 %v3059_v22, %v3058_v21 }
  0x81   :  { %3088 = vmatmul.msk.bf16.vlgmr.msra.gmra.mxu0 %vm183_vm2, %v151_v19 }
  0x84   :  { %v3685_v53 = vpop.permute.xlu0 %358  ;;  %v410_v55 = vpop.permute.xlu1 %409 }
  0x91   :  { %3089 = vmatmul.msk.bf16.gmra.mxu0 %vm183_vm2, %v152_v24  ;;  %v75_v24 = vpop.permute.xlu2 %74 }
  0x92   :  { %vm109_vm15 = vcmp.eq.s32.totalorder %v3604_v13, %v75_v24 }
  0x93   :  { %v3062_v31 = vsel %vm109_vm15, 1.0, %v4918_v16 }
  0xa1   :  { %3090 = vmatmul.msk.bf16.gmra.mxu0 %vm183_vm2, %v153_v28 }
  0xfe   :  { %v3646_v37 = vpop.f32.mrf.mxu0 }
 0x106   :  { %v3648_v38 = vpop.f32.mrf.mxu0 }
 0x107   :  { %v257_v39 = vpack.c.bf16 %v3648_v38, %v3646_v37 }
 0x109   :  { %3104 = vmatmul.msk.bf16.vlgmr.msra.gmra.mxu1 %vm281_vm7, %v257_v39 }
 0x10e   :  { %v3653_v40 = vpop.f32.mrf.mxu0 }
 0x116   :  { %v3655_v41 = vpop.f32.mrf.mxu0 }
 0x117   :  { %v258_v42 = vpack.c.bf16 %v3655_v41, %v3653_v40 }
 0x119   :  { %3105 = vmatmul.msk.bf16.gmra.mxu1 %vm281_vm7, %v258_v42 }
 0x11e   :  { %v3660_v43 = vpop.f32.mrf.mxu0 }
 0x126   :  { %v3662_v44 = vpop.f32.mrf.mxu0 }
 0x127   :  { %v259_v45 = vpack.c.bf16 %v3662_v44, %v3660_v43 }
 0x129   :  { %3106 = vmatmul.msk.bf16.gmra.mxu1 %vm281_vm7, %v259_v45 }
 0x186   :  { %v3670_v47 = vpop.f32.mrf.mxu1 }
 0x187   :  { %v455_v48 = vsub.f32 %v403_v33, %v3670_v47  ;;  %v361_v54 = vadd.f32 %v3685_v53, %v3670_v47 }
 0x189   :  { %459 = vrot.lane.b32.xlu0 %v455_v48, %s3525_s15  ;;  %v415_v56 = vadd.f32 %v410_v55, %v361_v54 }
 0x18b   :  { %v3112_v57 = vmul.f32 -1.442695, %v415_v56 }
 0x18d   :  { %3239 = vpow2.f32 %v3112_v57 }
 0x18e   :  { %v3674_v49 = vpop.f32.mrf.mxu1 }
 0x18f   :  { %v456_v51 = vsub.f32 %v404_v34, %v3674_v49  ;;  %v362_v58 = vadd.f32 %v3685_v53, %v3674_v49 }
 0x191   :  { %77 = vperm.xlu0 %3227, %v46_v50   ;;  %461 = vrot.lane.b32.xlu1 %v456_v51, %s3525_s15  ;;  %v416_v60 = vadd.f32 %v412_v59, %v362_v58  ;;  %v47_v58 = vld [vmem:[%s4909_s0 + $0x40] sm:$0xff] }
 0x193   :  { %v3113_v61 = vmul.f32 -1.442695, %v416_v60  ;;  %v3240_v62 = vpop.eup %3239 }
 0x194   :  { %v423_v63 = vadd.f32 1.0, %v3240_v62 }
 0x195   :  { %3241 = vpow2.f32 %v3113_v61  ;;  %v48_v61 = vld [vmem:[%s4909_s0 + $0x48] sm:$0xff] }
 0x196   :  { %3243 = vrcp.f32 %v423_v63  ;;  %v436_v10 = vand.u32 2147483648, %v423_v63  ;;  %vm430_vm9 = vweird.f32 %v423_v63  ;;  %v434_v12 = vand.u32 2147483647, %v423_v63  ;;  %v3706_v45 = vpop.f32.mrf.mxu1 }
 0x198   :  { %v437_v17 = vor.u32 1.1754944e-38, %v436_v10  ;;  %vm435_vm11 = vcmp.eq.f32.partialorder %v434_v12, 8.507059e+37  ;;  %v363_v12 = vadd.f32 %v3685_v53, %v3706_v45 }
 0x199   :  { %380 = vrot.lane.b32.xlu0 %v3232_v52, %s3526_s22 }
 0x19b   :  { %v3242_v0 = vpop.eup %3241 }
 0x19c   :  { %v424_v1 = vadd.f32 1.0, %v3242_v0  ;;  %v3244_v2 = vpop.eup %3243 }
 0x19d   :  { %v426_v3 = vmul.f32 %v3244_v2, %v423_v63  ;;  %vm431_vm8 = vweird.f32 %v3244_v2 }
 0x19e   :  { %3245 = vrcp.f32 %v424_v1  ;;  %vm432_vm10 = vmor %vm430_vm9, %vm431_vm8  ;;  %v451_v22 = vand.u32 2147483648, %v424_v1  ;;  %vm445_vm13 = vweird.f32 %v424_v1  ;;  %v449_v23 = vand.u32 2147483647, %v424_v1  ;;  %v3715_v54 = vpop.f32.mrf.mxu1 }
 0x19f   :  { %v427_v4 = vsub.f32 1.0, %v426_v3 }
 0x1a0   :  { %v452_v26 = vor.u32 1.1754944e-38, %v451_v22  ;;  %vm450_vm0 = vcmp.eq.f32.partialorder %v449_v23, 8.507059e+37 }
 0x1a1   :  { %v428_v6 = vmul.f32 %v3244_v2, %v427_v4 }
 0x1a3   :  { %v429_v8 = vadd.f32 %v3244_v2, %v428_v6 }
 0x1a4   :  { %v3246_v5 = vpop.eup %3245 }
 0x1a5   :  { %v441_v7 = vmul.f32 %v3246_v5, %v424_v1  ;;  %v433_v14 = vsel %vm432_vm10, %v3244_v2, %v429_v8  ;;  %vm446_vm12 = vweird.f32 %v3246_v5 }
 0x1a6   :  { %v438_v18 = vsel %vm435_vm11, %v437_v17, %v433_v14  ;;  %vm447_vm14 = vmor %vm445_vm13, %vm446_vm12 }
 0x1a7   :  { %v442_v9 = vsub.f32 1.0, %v441_v7 }
 0x1a9   :  { %v443_v15 = vmul.f32 %v3246_v5, %v442_v9 }
 0x1ab   :  { %v444_v21 = vadd.f32 %v3246_v5, %v443_v15 }
 0x1ad   :  { %v448_v25 = vsel %vm447_vm14, %v3246_v5, %v444_v21 }
 0x1ae   :  { %v453_v28 = vsel %vm450_vm0, %v452_v26, %v448_v25 }
 0x1fb   :  { %v460_v19 = vpop.permute.xlu0 %459 }
 0x1fc   :  { %v465_v20 = vmul.f32 %v460_v19, %v438_v18 }
 0x1fe   :  { %469 = vrot.lane.b32.xlu1 %v465_v20, %s3527_s23 }
 0x203   :  { %v462_v27 = vpop.permute.xlu1 %461  ;;  %v78_v29 = vpop.permute.xlu0 %77 }
 0x204   :  { %v466_v30 = vmul.f32 %v462_v27, %v453_v28  ;;  %vm110_vm1 = vcmp.eq.s32.totalorder %v3604_v13, %v78_v29 }
 0x205   :  { %v3063_v33 = vsel %vm110_vm1, 1.0, %v4918_v16 }
 0x206   :  { %v154_v34 = vpack.c.bf16 %v3063_v33, %v3062_v31  ;;  %471 = vrot.lane.b32.xlu2 %v466_v30, %s3527_s23 }
 0x208   :  { %3091 = vmatmul.msk.bf16.gmra.mxu0 %vm183_vm2, %v154_v34 }
 0x20b   :  { %v3738_v0 = vpop.permute.xlu0 %380 }
 0x20c   :  { %v384_v1 = vadd.f32 %v3738_v0, %v3674_v49  ;;  %v383_v14 = vadd.f32 %v3738_v0, %v3670_v47 }
 0x260   :  { %v472_v36 = vpop.permute.xlu2 %471 }
 0x261   :  { %v476_v39 = vadd.f32 %v472_v36, %v3674_v49 }
 0x263   :  { %v478_v42 = vmul.f32 %v3701_v35, %v476_v39  ;;  %v528_v55 = vsub.f32 %v476_v39, %v3648_v38  ;;  %v600_v56 = vsub.f32 %v476_v39, %v3715_v54  ;;  %v550_v57 = vmul.f32 %v3633_v32, %v476_v39 }
 0x265   :  { %483 = vrot.lane.b32.xlu2 %v478_v42, %s3526_s22  ;;  %v3221_v42 = vld [vmem:[%s4913_s3 + $0x18] sm:$0xff] }
 0x266   :  { %1612 = vmatpush.bf16.msra.mxu2 %v3221_v42 }
 0x270   :  { %v470_v46 = vpop.permute.xlu1 %469 }
 0x271   :  { %v475_v48 = vadd.f32 %v470_v46, %v3670_v47  ;;  %v364_v47 = vadd.f32 %v3685_v53, %v3715_v54 }
 0x273   :  { %v549_v50 = vmul.f32 %v3633_v32, %v475_v48  ;;  %v527_v51 = vsub.f32 %v475_v48, %v3646_v37  ;;  %v477_v52 = vmul.f32 %v3701_v35, %v475_v48  ;;  %v599_v59 = vsub.f32 %v475_v48, %v3706_v45 }
 0x275   :  { %553 = vrot.lane.b32.xlu0 %v549_v50, %s3525_s15  ;;  %531 = vrot.lane.b32.xlu2 %v527_v51, %s3526_s22 }
 0x276   :  { %481 = vrot.lane.b32.xlu1 %v477_v52, %s3526_s22 }
 0x27d   :  { %533 = vrot.lane.b32.xlu0 %v528_v55, %s3526_s22  ;;  %605 = vrot.lane.b32.xlu2 %v600_v56, %s3525_s15 }
 0x27e   :  { %555 = vrot.lane.b32.xlu1 %v550_v57, %s3525_s15 }
 0x285   :  { %80 = vperm.xlu0 %3227, %v47_v58   ;;  %v3727_v60 = vpop.f32.mrf.mxu0 }
 0x286   :  { %603 = vrot.lane.b32.xlu1 %v599_v59, %s3525_s15 }
 0x28d   :  { %v3733_v62 = vpop.f32.mrf.mxu0 }
 0x28e   :  { %83 = vperm.xlu1 %3228, %v48_v61   ;;  %v260_v63 = vpack.c.bf16 %v3733_v62, %v3727_v60 }
 0x290   :  { %3107 = vmatmul.msk.bf16.gmra.mxu1 %vm281_vm7, %v260_v63 }
 0x2bf   :  { %v484_v2 = vpop.permute.xlu2 %483 }
 0x2c0   :  { %v488_v3 = vadd.f32 %v484_v2, %v384_v1 }
 0x2c2   :  { %v3115_v4 = vmul.f32 -1.442695, %v488_v3 }
 0x2c4   :  { %3247 = vpow2.f32 %v3115_v4 }
 0x2ca   :  { %v3248_v5 = vpop.eup %3247 }
 0x2cb   :  { %v496_v6 = vadd.f32 1.0, %v3248_v5 }
 0x2cd   :  { %3249 = vrcp.f32 %v496_v6  ;;  %v523_v20 = vand.u32 2147483648, %v496_v6  ;;  %vm517_vm4 = vweird.f32 %v496_v6  ;;  %v521_v22 = vand.u32 2147483647, %v496_v6 }
 0x2cf   :  { %v524_v25 = vor.u32 1.1754944e-38, %v523_v20  ;;  %vm522_vm6 = vcmp.eq.f32.partialorder %v521_v22, 8.507059e+37 }
 0x2d3   :  { %v3250_v7 = vpop.eup %3249 }
 0x2d4   :  { %v513_v8 = vmul.f32 %v3250_v7, %v496_v6  ;;  %vm518_vm3 = vweird.f32 %v3250_v7 }
 0x2d5   :  { %vm519_vm5 = vmor %vm517_vm4, %vm518_vm3 }
 0x2d6   :  { %v514_v9 = vsub.f32 1.0, %v513_v8 }
 0x2d8   :  { %v515_v10 = vmul.f32 %v3250_v7, %v514_v9 }
 0x2da   :  { %v516_v18 = vadd.f32 %v3250_v7, %v515_v10 }
 0x2dc   :  { %v520_v24 = vsel %vm519_vm5, %v3250_v7, %v516_v18 }
 0x2dd   :  { %v525_v26 = vsel %vm522_vm6, %v524_v25, %v520_v24 }
 0x2e7   :  { %v554_v15 = vpop.permute.xlu0 %553 }
 0x2e8   :  { %v482_v17 = vpop.permute.xlu1 %481  ;;  %v559_v49 = vadd.f32 %v554_v15, %v363_v12 }
 0x2e9   :  { %v487_v19 = vadd.f32 %v482_v17, %v383_v14 }
 0x2ea   :  { %v3116_v21 = vmul.f32 -1.442695, %v559_v49 }
 0x2eb   :  { %v3114_v23 = vmul.f32 -1.442695, %v487_v19  ;;  %v532_v19 = vpop.permute.xlu2 %531 }
 0x2ec   :  { %3251 = vpow2.f32 %v3116_v21 }
 0x2ed   :  { %3253 = vpow2.f32 %v3114_v23 }
 0x2ef   :  { %v534_v27 = vpop.permute.xlu0 %533 }
 0x2f0   :  { %v556_v28 = vpop.permute.xlu1 %555  ;;  %v538_v29 = vmul.f32 %v534_v27, %v525_v26 }
 0x2f1   :  { %v560_v30 = vadd.f32 %v556_v28, %v364_v47 }
 0x2f2   :  { %v3252_v31 = vpop.eup %3251  ;;  %543 = vrot.lane.b32.xlu0 %v538_v29, %s3526_s22 }
 0x2f3   :  { %v3254_v33 = vpop.eup %3253  ;;  %v567_v34 = vadd.f32 1.0, %v3252_v31  ;;  %v3117_v36 = vmul.f32 -1.442695, %v560_v30  ;;  %v606_v30 = vpop.permute.xlu2 %605 }
 0x2f4   :  { %v495_v39 = vadd.f32 1.0, %v3254_v33 }
 0x2f5   :  { %3255 = vrcp.f32 %v567_v34  ;;  %v578_v59 = vand.u32 2147483647, %v567_v34  ;;  %v580_v61 = vand.u32 2147483648, %v567_v34  ;;  %vm574_vm12 = vweird.f32 %v567_v34 }
 0x2f6   :  { %3257 = vrcp.f32 %v495_v39  ;;  %v508_v3 = vand.u32 2147483648, %v495_v39  ;;  %v506_v5 = vand.u32 2147483647, %v495_v39  ;;  %vm502_vm14 = vweird.f32 %v495_v39 }
 0x2f7   :  { %3259 = vpow2.f32 %v3117_v36  ;;  %v81_v52 = vpop.permute.xlu0 %80  ;;  %v581_v9 = vor.u32 1.1754944e-38, %v580_v61  ;;  %vm579_vm15 = vcmp.eq.f32.partialorder %v578_v59, 8.507059e+37 }
 0x2f8   :  { %v604_v46 = vpop.permute.xlu1 %603  ;;  %vm111_vm8 = vcmp.eq.s32.totalorder %v3604_v13, %v81_v52  ;;  %v509_v15 = vor.u32 1.1754944e-38, %v508_v3  ;;  %vm507_vm1 = vcmp.eq.f32.partialorder %v506_v5, 8.507059e+37  ;;  %v49_v5 = vld [vmem:[%s4909_s0 + $0x50] sm:$0xff] }
 0x2f9   :  { %v3064_v7 = vsel %vm111_vm8, 1.0, %v4918_v16 }
 0x2fb   :  { %v3256_v48 = vpop.eup %3255 }
 0x2fc   :  { %v3258_v50 = vpop.eup %3257  ;;  %v570_v51 = vmul.f32 %v3256_v48, %v567_v34  ;;  %vm575_vm9 = vweird.f32 %v3256_v48  ;;  %v3220_v34 = vld [vmem:[%s4913_s3 + $0x10] sm:$0xff] }
 0x2fd   :  { %v3260_v55 = vpop.eup %3259  ;;  %v498_v56 = vmul.f32 %v3258_v50, %v495_v39  ;;  %vm503_vm11 = vweird.f32 %v3258_v50  ;;  %vm576_vm13 = vmor %vm574_vm12, %vm575_vm9  ;;  %1613 = vmatpush.bf16.msra.mxu2 %v3220_v34 }
 0x2fe   :  { %v568_v57 = vadd.f32 1.0, %v3260_v55  ;;  %v571_v58 = vsub.f32 1.0, %v570_v51  ;;  %vm504_vm0 = vmor %vm502_vm14, %vm503_vm11  ;;  %v3775_v55 = vpop.f32.mrf.mxu1 }
 0x2ff   :  { %v499_v63 = vsub.f32 1.0, %v498_v56 }
 0x300   :  { %3261 = vrcp.f32 %v568_v57  ;;  %v572_v1 = vmul.f32 %v3256_v48, %v571_v58  ;;  %v84_v2 = vpop.permute.xlu1 %83  ;;  %v595_v25 = vand.u32 2147483648, %v568_v57  ;;  %v593_v26 = vand.u32 2147483647, %v568_v57 }
 0x301   :  { %vm112_vm10 = vcmp.eq.s32.totalorder %v3604_v13, %v84_v2  ;;  %v500_v4 = vmul.f32 %v3258_v50, %v499_v63  ;;  %vm589_vm4 = vweird.f32 %v568_v57 }
 0x302   :  { %v573_v6 = vadd.f32 %v3256_v48, %v572_v1  ;;  %v3065_v8 = vsel %vm112_vm10, 1.0, %v4918_v16  ;;  %v596_v28 = vor.u32 1.1754944e-38, %v595_v25  ;;  %vm594_vm6 = vcmp.eq.f32.partialorder %v593_v26, 8.507059e+37 }
 0x303   :  { %v155_v10 = vpack.c.bf16 %v3065_v8, %v3064_v7  ;;  %v501_v12 = vadd.f32 %v3258_v50, %v500_v4  ;;  %v50_v7 = vld [vmem:[%s4909_s0 + $0x58] sm:$0xff]  ;;  %v365_v8 = vadd.f32 %v3685_v53, %v3775_v55 }
 0x304   :  { %v577_v14 = vsel %vm576_vm13, %v3256_v48, %v573_v6 }
 0x305   :  { %v582_v17 = vsel %vm579_vm15, %v581_v9, %v577_v14  ;;  %3092 = vmatmul.msk.bf16.gmra.mxu0 %vm183_vm2, %v155_v10  ;;  %v505_v49 = vsel %vm504_vm0, %v3258_v50, %v501_v12  ;;  %v386_v14 = vadd.f32 %v3738_v0, %v3715_v54 }
 0x306   :  { %v3262_v18 = vpop.eup %3261  ;;  %v609_v20 = vmul.f32 %v604_v46, %v582_v17  ;;  %v510_v21 = vsel %vm507_vm1, %v509_v15, %v505_v49  ;;  %v3786_v61 = vpop.f32.mrf.mxu1 }
 0x307   :  { %v537_v22 = vmul.f32 %v532_v19, %v510_v21  ;;  %v585_v23 = vmul.f32 %v3262_v18, %v568_v57  ;;  %vm590_vm3 = vweird.f32 %v3262_v18 }
 0x308   :  { %613 = vrot.lane.b32.xlu1 %v609_v20, %s3527_s23  ;;  %vm591_vm5 = vmor %vm589_vm4, %vm590_vm3 }
 0x309   :  { %541 = vrot.lane.b32.xlu2 %v537_v22, %s3526_s22  ;;  %v586_v24 = vsub.f32 1.0, %v585_v23 }
 0x30b   :  { %v587_v47 = vmul.f32 %v3262_v18, %v586_v24  ;;  %v385_v24 = vadd.f32 %v3738_v0, %v3706_v45 }
 0x30d   :  { %v588_v27 = vadd.f32 %v3262_v18, %v587_v47 }
 0x30f   :  { %v592_v29 = vsel %vm591_vm5, %v3262_v18, %v588_v27 }
 0x310   :  { %v597_v31 = vsel %vm594_vm6, %v596_v28, %v592_v29  ;;  %v366_v29 = vadd.f32 %v3685_v53, %v3786_v61 }
 0x311   :  { %v610_v33 = vmul.f32 %v606_v30, %v597_v31 }
 0x313   :  { %615 = vrot.lane.b32.xlu2 %v610_v33, %s3527_s23 }
 0x363   :  { %v542_v36 = vpop.permute.xlu2 %541 }
 0x364   :  { %v544_v39 = vpop.permute.xlu0 %543  ;;  %v3764_v42 = vadd.f32 %v542_v36, %v3646_v37 }
 0x365   :  { %v3767_v46 = vadd.f32 %v544_v39, %v3648_v38 }
 0x367   :  { %4924 = vst [vmem:[#allocation2_spill] sm:$0xff] %v3767_v46  ;;  %v1557_v48 = vpack.c.bf16 %v3767_v46, %v3764_v42 }
 0x369   :  { %3156 = vmatmul.msk.bf16.vlgmr.msra.gmra.mxu2 %vm281_vm7, %v1557_v48 }
 0x36d   :  { %v616_v50 = vpop.permute.xlu2 %615 }
 0x36e   :  { %v620_v51 = vadd.f32 %v616_v50, %v3715_v54 }
 0x370   :  { %v622_v52 = vmul.f32 %v3701_v35, %v620_v51  ;;  %v672_v63 = vsub.f32 %v620_v51, %v3655_v41  ;;  %v744_v1 = vsub.f32 %v620_v51, %v3786_v61  ;;  %v694_v2 = vmul.f32 %v3633_v32, %v620_v51 }
 0x372   :  { %627 = vrot.lane.b32.xlu1 %v622_v52, %s3526_s22 }
 0x37a   :  { %v614_v56 = vpop.permute.xlu1 %613 }
 0x37b   :  { %v619_v37 = vadd.f32 %v614_v56, %v3706_v45 }
 0x37d   :  { %v693_v38 = vmul.f32 %v3633_v32, %v619_v37  ;;  %v671_v57 = vsub.f32 %v619_v37, %v3653_v40  ;;  %v621_v58 = vmul.f32 %v3701_v35, %v619_v37  ;;  %v743_v6 = vsub.f32 %v619_v37, %v3775_v55 }
 0x37f   :  { %697 = vrot.lane.b32.xlu2 %v693_v38, %s3525_s15  ;;  %675 = vrot.lane.b32.xlu1 %v671_v57, %s3526_s22 }
 0x380   :  { %625 = vrot.lane.b32.xlu0 %v621_v58, %s3526_s22 }
 0x382   :  { %v3784_v59 = vpop.f32.mrf.mxu0 }
 0x387   :  { %677 = vrot.lane.b32.xlu2 %v672_v63, %s3526_s22  ;;  %749 = vrot.lane.b32.xlu1 %v744_v1, %s3525_s15 }
 0x388   :  { %699 = vrot.lane.b32.xlu0 %v694_v2, %s3525_s15 }
 0x38a   :  { %v3794_v3 = vpop.f32.mrf.mxu0 }
 0x38b   :  { %v261_v4 = vpack.c.bf16 %v3794_v3, %v3784_v59 }
 0x38d   :  { %3108 = vmatmul.msk.bf16.gmra.mxu1 %vm281_vm7, %v261_v4 }
 0x38f   :  { %86 = vperm.xlu2 %3229, %v49_v5  }
 0x390   :  { %747 = vrot.lane.b32.xlu0 %v743_v6, %s3525_s15 }
 0x398   :  { %89 = vperm.xlu0 %3227, %v50_v7  }
 0x3d9   :  { %v698_v9 = vpop.permute.xlu2 %697 }
 0x3da   :  { %v703_v10 = vadd.f32 %v698_v9, %v365_v8 }
 0x3dc   :  { %v3120_v12 = vmul.f32 -1.442695, %v703_v10  ;;  %v3820_v10 = vld [vmem:[%s4912_s4 + $0x2] ss:$0 sm:$0xff] }
 0x3de   :  { %3263 = vpow2.f32 %v3120_v12 }
 0x3e1   :  { %v678_v39 = vpop.permute.xlu2 %677 }
 0x3e4   :  { %v3264_v15 = vpop.eup %3263  ;;  %v628_v17 = vpop.permute.xlu1 %627 }
 0x3e5   :  { %v711_v49 = vadd.f32 1.0, %v3264_v15  ;;  %v632_v18 = vadd.f32 %v628_v17, %v386_v14 }
 0x3e7   :  { %3265 = vrcp.f32 %v711_v49  ;;  %v3119_v19 = vmul.f32 -1.442695, %v632_v18  ;;  %vm718_vm9 = vweird.f32 %v711_v49  ;;  %v722_v45 = vand.u32 2147483647, %v711_v49  ;;  %v3234_v18 = vld [vmem:[%s4911_s5 + $0x2] ss:$0 sm:$0xff] }
 0x3e8   :  { %v724_v48 = vand.u32 2147483648, %v711_v49 }
 0x3e9   :  { %3267 = vpow2.f32 %v3119_v19  ;;  %vm723_vm14 = vcmp.eq.f32.partialorder %v722_v45, 8.507059e+37  ;;  %v87_v14 = vpop.permute.xlu2 %86 }
 0x3ea   :  { %v725_v63 = vor.u32 1.1754944e-38, %v724_v48  ;;  %vm113_vm0 = vcmp.eq.s32.totalorder %v3604_v13, %v87_v14 }
 0x3ed   :  { %v3266_v20 = vpop.eup %3265 }
 0x3ee   :  { %v714_v22 = vmul.f32 %v3266_v20, %v711_v49  ;;  %vm719_vm8 = vweird.f32 %v3266_v20  ;;  %v3825_v49 = vld [vmem:[%s4914_s6 + $0x10] sm:$0xff] }
 0x3ef   :  { %v3268_v21 = vpop.eup %3267  ;;  %vm720_vm11 = vmor %vm718_vm9, %vm719_vm8  ;;  %v1708_v19 = vmul.f32 %v3820_v10, %v3825_v49 }
 0x3f0   :  { %v640_v23 = vadd.f32 1.0, %v3268_v21  ;;  %v715_v26 = vsub.f32 1.0, %v714_v22 }
 0x3f2   :  { %3269 = vrcp.f32 %v640_v23  ;;  %v626_v25 = vpop.permute.xlu0 %625  ;;  %v716_v54 = vmul.f32 %v3266_v20, %v715_v26  ;;  %v667_v50 = vand.u32 2147483648, %v640_v23  ;;  %v665_v37 = vand.u32 2147483647, %v640_v23 }
 0x3f3   :  { %v631_v47 = vadd.f32 %v626_v25, %v385_v24  ;;  %vm661_vm12 = vweird.f32 %v640_v23  ;;  %v3066_v25 = vsel %vm113_vm0, 1.0, %v4918_v16 }
 0x3f4   :  { %v717_v34 = vadd.f32 %v3266_v20, %v716_v54  ;;  %v668_v1 = vor.u32 1.1754944e-38, %v667_v50  ;;  %vm666_vm15 = vcmp.eq.f32.partialorder %v665_v37, 8.507059e+37 }
 0x3f5   :  { %v3118_v27 = vmul.f32 -1.442695, %v631_v47 }
 0x3f6   :  { %v721_v57 = vsel %vm720_vm11, %v3266_v20, %v717_v34 }
 0x3f7   :  { %3271 = vpow2.f32 %v3118_v27  ;;  %v726_v4 = vsel %vm723_vm14, %v725_v63, %v721_v57  ;;  %v3169_v57 = vld [vmem:[%s4914_s6 + $0x18] sm:$0xff]  ;;  %v3846_v63 = vpop.f32.mrf.mxu2 }
 0x3f8   :  { %v3270_v28 = vpop.eup %3269  ;;  %4925 = vst [vmem:[#allocation3_spill] sm:$0xff] %v3846_v63 }
 0x3f9   :  { %v657_v30 = vmul.f32 %v3270_v28, %v640_v23  ;;  %vm662_vm10 = vweird.f32 %v3270_v28 }
 0x3fa   :  { %v700_v31 = vpop.permute.xlu0 %699  ;;  %vm663_vm13 = vmor %vm661_vm12, %vm662_vm10 }
 0x3fb   :  { %v704_v33 = vadd.f32 %v700_v31, %v366_v29  ;;  %v658_v36 = vsub.f32 1.0, %v657_v30 }
 0x3fd   :  { %v3272_v51 = vpop.eup %3271  ;;  %v3121_v52 = vmul.f32 -1.442695, %v704_v33  ;;  %v659_v56 = vmul.f32 %v3270_v28, %v658_v36 }
 0x3fe   :  { %v639_v38 = vadd.f32 1.0, %v3272_v51 }
 0x3ff   :  { %3273 = vpow2.f32 %v3121_v52  ;;  %v660_v58 = vadd.f32 %v3270_v28, %v659_v56 }
 0x400   :  { %3275 = vrcp.f32 %v639_v38  ;;  %v652_v22 = vand.u32 2147483648, %v639_v38  ;;  %v650_v24 = vand.u32 2147483647, %v639_v38  ;;  %vm646_vm4 = vweird.f32 %v639_v38 }
 0x401   :  { %v664_v2 = vsel %vm663_vm13, %v3270_v28, %v660_v58  ;;  %v676_v28 = vpop.permute.xlu1 %675  ;;  %v1709_v58 = vmul.f32 %v3820_v10, %v3169_v57 }
 0x402   :  { %v748_v5 = vpop.permute.xlu0 %747  ;;  %v669_v6 = vsel %vm666_vm15, %v668_v1, %v664_v2  ;;  %v653_v29 = vor.u32 1.1754944e-38, %v652_v22  ;;  %vm651_vm6 = vcmp.eq.f32.partialorder %v650_v24, 8.507059e+37  ;;  %v52_v22 = vld [vmem:[%s4909_s0 + $0x68] sm:$0xff] }
 0x403   :  { %v753_v7 = vmul.f32 %v748_v5, %v726_v4  ;;  %v682_v8 = vmul.f32 %v678_v39, %v669_v6  ;;  %v3853_v6 = vpop.f32.mrf.mxu2 }
 0x405   :  { %v3274_v9 = vpop.eup %3273  ;;  %687 = vrot.lane.b32.xlu2 %v682_v8, %s3526_s22  ;;  %757 = vrot.lane.b32.xlu0 %v753_v7, %s3527_s23  ;;  %v1759_v7 = vsub.f32 %v3169_v57, %v3853_v6 }
 0x406   :  { %v3276_v12 = vpop.eup %3275  ;;  %v712_v15 = vadd.f32 1.0, %v3274_v9 }
 0x407   :  { %v642_v17 = vmul.f32 %v3276_v12, %v639_v38  ;;  %vm647_vm3 = vweird.f32 %v3276_v12 }
 0x408   :  { %3277 = vrcp.f32 %v712_v15  ;;  %vm648_vm5 = vmor %vm646_vm4, %vm647_vm3  ;;  %v739_v39 = vand.u32 2147483648, %v712_v15  ;;  %v737_v48 = vand.u32 2147483647, %v712_v15  ;;  %vm733_vm9 = vweird.f32 %v712_v15 }
 0x409   :  { %v643_v20 = vsub.f32 1.0, %v642_v17  ;;  %v750_v56 = vpop.permute.xlu1 %749  ;;  %v3865_v17 = vpop.f32.mrf.mxu1 }
 0x40a   :  { %v90_v21 = vpop.permute.xlu0 %89  ;;  %v740_v51 = vor.u32 1.1754944e-38, %v739_v39  ;;  %vm738_vm11 = vcmp.eq.f32.partialorder %v737_v48, 8.507059e+37 }
 0x40b   :  { %vm114_vm1 = vcmp.eq.s32.totalorder %v3604_v13, %v90_v21  ;;  %v644_v23 = vmul.f32 %v3276_v12, %v643_v20 }
 0x40c   :  { %v3067_v47 = vsel %vm114_vm1, 1.0, %v4918_v16 }
 0x40d   :  { %v156_v26 = vpack.c.bf16 %v3067_v47, %v3066_v25  ;;  %1659 = vrot.lane.b32.xlu2 %v3234_v18, %s3525_s15  ;;  %1712 = vrot.lane.b32.xlu0 %v1708_v19, %s3525_s15  ;;  %v645_v27 = vadd.f32 %v3276_v12, %v644_v23 }
 0x40e   :  { %v3278_v54 = vpop.eup %3277 }
 0x40f   :  { %3093 = vmatmul.msk.bf16.gmra.mxu0 %vm183_vm2, %v156_v26  ;;  %v649_v30 = vsel %vm648_vm5, %v3276_v12, %v645_v27  ;;  %v729_v31 = vmul.f32 %v3278_v54, %v712_v15  ;;  %vm734_vm8 = vweird.f32 %v3278_v54 }
 0x410   :  { %v654_v33 = vsel %vm651_vm6, %v653_v29, %v649_v30  ;;  %vm735_vm10 = vmor %vm733_vm9, %vm734_vm8 }
 0x411   :  { %v681_v34 = vmul.f32 %v676_v28, %v654_v33  ;;  %v730_v36 = vsub.f32 1.0, %v729_v31  ;;  %v3890_v25 = vpop.f32.mrf.mxu1 }
 0x413   :  { %685 = vrot.lane.b32.xlu1 %v681_v34, %s3526_s22  ;;  %v731_v45 = vmul.f32 %v3278_v54, %v730_v36  ;;  %v387_v36 = vadd.f32 %v3738_v0, %v3775_v55 }
 0x415   :  { %v732_v50 = vadd.f32 %v3278_v54, %v731_v45 }
 0x417   :  { %v736_v52 = vsel %vm735_vm10, %v3278_v54, %v732_v50 }
 0x418   :  { %v741_v37 = vsel %vm738_vm11, %v740_v51, %v736_v52 }
 0x419   :  { %v754_v38 = vmul.f32 %v750_v56, %v741_v37 }
 0x41b   :  { %759 = vrot.lane.b32.xlu1 %v754_v38, %s3527_s23 }
 0x423   :  { %1714 = vrot.lane.b32.xlu1 %v1709_v58, %s3525_s15 }
 0x45f   :  { %v688_v8 = vpop.permute.xlu2 %687 }
 0x460   :  { %v3858_v12 = vadd.f32 %v688_v8, %v3655_v41 }
 0x467   :  { %v3899_v27 = vpop.permute.xlu2 %1659 }
 0x468   :  { %v1663_v28 = vadd.f32 %v3899_v27, %v3853_v6  ;;  %v1662_v39 = vadd.f32 %v3899_v27, %v3846_v63 }
 0x477   :  { %v758_v1 = vpop.permute.xlu0 %757 }
 0x478   :  { %v763_v2 = vadd.f32 %v758_v1, %v3775_v55 }
 0x47a   :  { %v837_v4 = vmul.f32 %v3633_v32, %v763_v2  ;;  %v765_v5 = vmul.f32 %v3701_v35, %v763_v2  ;;  %v887_v18 = vsub.f32 %v763_v2, %v3865_v17 }
 0x47c   :  { %841 = vrot.lane.b32.xlu1 %v837_v4, %s3525_s15  ;;  %769 = vrot.lane.b32.xlu2 %v765_v5, %s3526_s22  ;;  %v368_v5 = vadd.f32 %v3685_v53, %v3890_v25 }
 0x47f   :  { %v1713_v33 = vpop.permute.xlu0 %1712 }
 0x480   :  { %v1718_v50 = vadd.f32 %v1713_v33, %v1662_v39 }
 0x482   :  { %v3170_v52 = vmul.f32 -1.442695, %v1718_v50 }
 0x484   :  { %1764 = vrot.lane.b32.xlu1 %v1759_v7, %s3525_s15 }
 0x485   :  { %v686_v9 = vpop.permute.xlu1 %685 }
 0x486   :  { %v3861_v14 = vadd.f32 %v686_v9, %v3653_v40 }
 0x488   :  { %v1558_v15 = vpack.c.bf16 %v3858_v12, %v3861_v14 }
 0x48a   :  { %3157 = vmatmul.msk.bf16.gmra.mxu2 %vm281_vm7, %v1558_v15  ;;  %v367_v15 = vadd.f32 %v3685_v53, %v3865_v17 }
 0x48c   :  { %v3869_v19 = vpop.f32.mrf.mxu0  ;;  %891 = vrot.lane.b32.xlu1 %v887_v18, %s3525_s15 }
 0x48d   :  { %v760_v20 = vpop.permute.xlu1 %759 }
 0x48e   :  { %v764_v41 = vadd.f32 %v760_v20, %v3786_v61 }
 0x490   :  { %v766_v21 = vmul.f32 %v3701_v35, %v764_v41  ;;  %v838_v40 = vmul.f32 %v3633_v32, %v764_v41  ;;  %v1758_v35 = vsub.f32 %v3825_v49, %v3846_v63  ;;  %v815_v32 = vsub.f32 %v763_v2, %v3660_v43  ;;  %v51_v49 = vld [vmem:[%s4909_s0 + $0x60] sm:$0xff] }
 0x491   :  { %v816_v47 = vsub.f32 %v764_v41, %v3662_v44  ;;  %v888_v26 = vsub.f32 %v764_v41, %v3890_v25 }
 0x492   :  { %771 = vrot.lane.b32.xlu0 %v766_v21, %s3526_s22  ;;  %843 = vrot.lane.b32.xlu2 %v838_v40, %s3525_s15 }
 0x494   :  { %v3880_v23 = vpop.f32.mrf.mxu0  ;;  %95 = vperm.xlu1 %3228, %v52_v22  }
 0x495   :  { %v262_v24 = vpack.c.bf16 %v3880_v23, %v3869_v19  ;;  %v1715_v54 = vpop.permute.xlu1 %1714 }
 0x496   :  { %v1719_v29 = vadd.f32 %v1715_v54, %v1663_v28 }
 0x497   :  { %3109 = vmatmul.msk.bf16.gmra.mxu1 %vm281_vm7, %v262_v24 }
 0x498   :  { %v3171_v30 = vmul.f32 -1.442695, %v1719_v29 }
 0x49a   :  { %1762 = vrot.lane.b32.xlu0 %v1758_v35, %s3525_s15  ;;  %819 = vrot.lane.b32.xlu2 %v815_v32, %s3526_s22  ;;  %3279 = vpow2.f32 %v3171_v30 }
 0x4a0   :  { %v3280_v31 = vpop.eup %3279 }
 0x4a1   :  { %v1727_v34 = vadd.f32 1.0, %v3280_v31 }
 0x4a2   :  { %821 = vrot.lane.b32.xlu0 %v816_v47, %s3526_s22  ;;  %893 = vrot.lane.b32.xlu2 %v888_v26, %s3525_s15 }
 0x4a3   :  { %3281 = vrcp.f32 %v1727_v34  ;;  %vm1748_vm14 = vweird.f32 %v1727_v34  ;;  %v1752_v32 = vand.u32 2147483647, %v1727_v34  ;;  %v1754_v47 = vand.u32 2147483648, %v1727_v34 }
 0x4a5   :  { %vm1753_vm4 = vcmp.eq.f32.partialorder %v1752_v32, 8.507059e+37 }
 0x4a9   :  { %v3282_v56 = vpop.eup %3281 }
 0x4aa   :  { %92 = vperm.xlu0 %3227, %v51_v49   ;;  %v1744_v57 = vmul.f32 %v3282_v56, %v1727_v34  ;;  %vm1749_vm12 = vweird.f32 %v3282_v56 }
 0x4ab   :  { %vm1750_vm0 = vmor %vm1748_vm14, %vm1749_vm12 }
 0x4ac   :  { %v1745_v1 = vsub.f32 1.0, %v1744_v57 }
 0x4ae   :  { %v1746_v4 = vmul.f32 %v3282_v56, %v1745_v1 }
 0x4b0   :  { %v1747_v40 = vadd.f32 %v3282_v56, %v1746_v4  ;;  %v388_v4 = vadd.f32 %v3738_v0, %v3786_v61 }
 0x4b2   :  { %v1751_v30 = vsel %vm1750_vm0, %v3282_v56, %v1747_v40 }
 0x4d6   :  { %v770_v45 = vpop.permute.xlu2 %769 }
 0x4d7   :  { %v775_v48 = vadd.f32 %v770_v45, %v387_v36  ;;  %v1755_v36 = vor.u32 1.1754944e-38, %v1754_v47 }
 0x4d9   :  { %v3122_v51 = vmul.f32 -1.442695, %v775_v48  ;;  %v1756_v45 = vsel %vm1753_vm4, %v1755_v36, %v1751_v30 }
 0x4db   :  { %3283 = vpow2.f32 %v3122_v51 }
 0x4dc   :  { %3285 = vpow2.f32 %v3170_v52 }
 0x4e1   :  { %v3284_v37 = vpop.eup %3283 }
 0x4e2   :  { %v783_v38 = vadd.f32 1.0, %v3284_v37  ;;  %v3286_v58 = vpop.eup %3285 }
 0x4e3   :  { %v3907_v2 = vadd.f32 1.0, %v3286_v58 }
 0x4e4   :  { %3287 = vrcp.f32 %v783_v38  ;;  %v794_v41 = vand.u32 2147483647, %v783_v38  ;;  %v796_v21 = vand.u32 2147483648, %v783_v38  ;;  %vm790_vm15 = vweird.f32 %v783_v38 }
 0x4e5   :  { %3289 = vrcp.f32 %v3907_v2  ;;  %vm1733_vm5 = vweird.f32 %v3907_v2 }
 0x4e6   :  { %v797_v54 = vor.u32 1.1754944e-38, %v796_v21  ;;  %vm795_vm3 = vcmp.eq.f32.partialorder %v794_v41, 8.507059e+37 }
 0x4ea   :  { %v3288_v55 = vpop.eup %3287 }
 0x4eb   :  { %v786_v7 = vmul.f32 %v3288_v55, %v783_v38  ;;  %vm791_vm13 = vweird.f32 %v3288_v55  ;;  %v3914_v28 = vpop.eup %3289 }
 0x4ec   :  { %v844_v8 = vpop.permute.xlu2 %843  ;;  %vm792_vm1 = vmor %vm790_vm15, %vm791_vm13  ;;  %v1729_v52 = vmul.f32 %v3914_v28, %v3907_v2  ;;  %vm1734_vm6 = vweird.f32 %v3914_v28 }
 0x4ed   :  { %v848_v9 = vadd.f32 %v844_v8, %v368_v5  ;;  %v787_v18 = vsub.f32 1.0, %v786_v7  ;;  %v1737_v8 = vand.u32 2147483647, %v3907_v2  ;;  %vm3930_vm11 = vmor %vm1733_vm5, %vm1734_vm6 }
 0x4ee   :  { %v842_v20 = vpop.permute.xlu1 %841  ;;  %v1730_v38 = vsub.f32 1.0, %v1729_v52 }
 0x4ef   :  { %v3125_v22 = vmul.f32 -1.442695, %v848_v9  ;;  %v847_v24 = vadd.f32 %v842_v20, %v367_v15  ;;  %v788_v35 = vmul.f32 %v3288_v55, %v787_v18 }
 0x4f0   :  { %v1731_v58 = vmul.f32 %v3914_v28, %v1730_v38 }
 0x4f1   :  { %3291 = vpow2.f32 %v3125_v22  ;;  %v3124_v26 = vmul.f32 -1.442695, %v847_v24  ;;  %v789_v49 = vadd.f32 %v3288_v55, %v788_v35  ;;  %v1739_v24 = vand.u32 2147483648, %v3907_v2 }
 0x4f2   :  { %v1732_v20 = vadd.f32 %v3914_v28, %v1731_v58 }
 0x4f3   :  { %3293 = vpow2.f32 %v3124_v26  ;;  %v793_v29 = vsel %vm792_vm1, %v3288_v55, %v789_v49  ;;  %v1740_v2 = vor.u32 1.1754944e-38, %v1739_v24  ;;  %vm1738_vm1 = vcmp.eq.f32.partialorder %v1737_v8, 8.507059e+37 }
 0x4f4   :  { %v798_v31 = vsel %vm795_vm3, %v797_v54, %v793_v29  ;;  %v820_v33 = vpop.permute.xlu2 %819  ;;  %v1736_v54 = vsel %vm3930_vm11, %v3914_v28, %v1732_v20 }
 0x4f5   :  { %v825_v39 = vmul.f32 %v820_v33, %v798_v31 }
 0x4f6   :  { %v1765_v34 = vpop.permute.xlu1 %1764 }
 0x4f7   :  { %v3292_v48 = vpop.eup %3291  ;;  %v1769_v50 = vmul.f32 %v1765_v34, %v1756_v45  ;;  %829 = vrot.lane.b32.xlu1 %v825_v39, %s3526_s22 }
 0x4f8   :  { %v856_v51 = vadd.f32 1.0, %v3292_v48 }
 0x4f9   :  { %v3294_v37 = vpop.eup %3293  ;;  %1774 = vrot.lane.b32.xlu0 %v1769_v50, %s3527_s23  ;;  %v1741_v50 = vsel %vm1738_vm1, %v1740_v2, %v1736_v54 }
 0x4fa   :  { %3295 = vrcp.f32 %v856_v51  ;;  %v855_v56 = vadd.f32 1.0, %v3294_v37  ;;  %v881_v9 = vand.u32 2147483647, %v856_v51  ;;  %v883_v15 = vand.u32 2147483648, %v856_v51 }
 0x4fb   :  { %vm877_vm9 = vweird.f32 %v856_v51 }
 0x4fc   :  { %3297 = vrcp.f32 %v855_v56  ;;  %v866_v22 = vand.u32 2147483647, %v855_v56  ;;  %v868_v61 = vand.u32 2147483648, %v855_v56  ;;  %vm882_vm13 = vcmp.eq.f32.partialorder %v881_v9, 8.507059e+37  ;;  %v894_v33 = vpop.permute.xlu2 %893 }
 0x4fd   :  { %v884_v49 = vor.u32 1.1754944e-38, %v883_v15  ;;  %vm862_vm14 = vweird.f32 %v855_v56 }
 0x4fe   :  { %v869_v36 = vor.u32 1.1754944e-38, %v868_v61  ;;  %vm867_vm0 = vcmp.eq.f32.partialorder %v866_v22, 8.507059e+37  ;;  %v892_v48 = vpop.permute.xlu1 %891 }
 0x500   :  { %v3296_v57 = vpop.eup %3295 }
 0x501   :  { %v873_v1 = vmul.f32 %v3296_v57, %v856_v51  ;;  %vm878_vm8 = vweird.f32 %v3296_v57 }
 0x502   :  { %v3298_v55 = vpop.eup %3297  ;;  %vm879_vm12 = vmor %vm877_vm9, %vm878_vm8 }
 0x503   :  { %v874_v5 = vsub.f32 1.0, %v873_v1  ;;  %v858_v7 = vmul.f32 %v3298_v55, %v855_v56  ;;  %vm863_vm10 = vweird.f32 %v3298_v55 }
 0x504   :  { %v772_v18 = vpop.permute.xlu0 %771  ;;  %vm864_vm15 = vmor %vm862_vm14, %vm863_vm10 }
 0x505   :  { %v875_v41 = vmul.f32 %v3296_v57, %v874_v5  ;;  %v859_v21 = vsub.f32 1.0, %v858_v7  ;;  %v776_v40 = vadd.f32 %v772_v18, %v388_v4 }
 0x506   :  { %v96_v58 = vpop.permute.xlu1 %95 }
 0x507   :  { %v876_v35 = vadd.f32 %v3296_v57, %v875_v41  ;;  %v860_v32 = vmul.f32 %v3298_v55, %v859_v21  ;;  %v3123_v47 = vmul.f32 -1.442695, %v776_v40  ;;  %vm116_vm3 = vcmp.eq.s32.totalorder %v3604_v13, %v96_v58 }
 0x508   :  { %v3069_v9 = vsel %vm116_vm3, 1.0, %v4918_v16 }
 0x509   :  { %v880_v29 = vsel %vm879_vm12, %v3296_v57, %v876_v35  ;;  %v861_v30 = vadd.f32 %v3298_v55, %v860_v32  ;;  %3299 = vpow2.f32 %v3123_v47 }
 0x50a   :  { %v885_v31 = vsel %vm882_vm13, %v884_v49, %v880_v29 }
 0x50b   :  { %v898_v39 = vmul.f32 %v894_v33, %v885_v31  ;;  %v865_v45 = vsel %vm864_vm15, %v3298_v55, %v861_v30 }
 0x50c   :  { %v870_v34 = vsel %vm867_vm0, %v869_v36, %v865_v45  ;;  %v1763_v51 = vpop.permute.xlu0 %1762  ;;  %v3971_v45 = vld [vmem:[%s4912_s4 + $0x1] ss:$0 sm:$0xff] }
 0x50d   :  { %v897_v52 = vmul.f32 %v892_v48, %v870_v34  ;;  %v1768_v37 = vmul.f32 %v1763_v51, %v1741_v50  ;;  %903 = vrot.lane.b32.xlu1 %v898_v39, %s3527_s23  ;;  %v3965_v36 = vpop.f32.mrf.mxu2 }
 0x50f   :  { %v3300_v28 = vpop.eup %3299  ;;  %901 = vrot.lane.b32.xlu0 %v897_v52, %s3527_s23  ;;  %1772 = vrot.lane.b32.xlu2 %v1768_v37, %s3527_s23 }
 0x510   :  { %v784_v56 = vadd.f32 1.0, %v3300_v28 }
 0x512   :  { %3301 = vrcp.f32 %v784_v56  ;;  %v811_v4 = vand.u32 2147483648, %v784_v56  ;;  %v809_v8 = vand.u32 2147483647, %v784_v56  ;;  %vm805_vm6 = vweird.f32 %v784_v56 }
 0x514   :  { %v822_v38 = vpop.permute.xlu0 %821  ;;  %v812_v41 = vor.u32 1.1754944e-38, %v811_v4  ;;  %vm810_vm9 = vcmp.eq.f32.partialorder %v809_v8, 8.507059e+37  ;;  %v54_v4 = vld [vmem:[%s4909_s0 + $0x78] sm:$0xff] }
 0x515   :  { %v3989_v52 = vpop.f32.mrf.mxu2 }
 0x518   :  { %v3302_v57 = vpop.eup %3301 }
 0x519   :  { %v801_v1 = vmul.f32 %v3302_v57, %v784_v56  ;;  %vm806_vm4 = vweird.f32 %v3302_v57  ;;  %v3997_v56 = vpop.f32.mrf.mxu1 }
 0x51a   :  { %vm807_vm8 = vmor %vm805_vm6, %vm806_vm4 }
 0x51b   :  { %v802_v55 = vsub.f32 1.0, %v801_v1  ;;  %v53_v1 = vld [vmem:[%s4909_s0 + $0x70] sm:$0xff] }
 0x51c   :  { %v93_v5 = vpop.permute.xlu0 %92 }
 0x51d   :  { %v803_v7 = vmul.f32 %v3302_v57, %v802_v55  ;;  %vm115_vm5 = vcmp.eq.s32.totalorder %v3604_v13, %v93_v5 }
 0x51e   :  { %v3068_v15 = vsel %vm115_vm5, 1.0, %v4918_v16 }
 0x51f   :  { %v804_v18 = vadd.f32 %v3302_v57, %v803_v7  ;;  %v157_v20 = vpack.c.bf16 %v3069_v9, %v3068_v15  ;;  %v1664_v15 = vadd.f32 %v3899_v27, %v3965_v36 }
 0x521   :  { %v808_v21 = vsel %vm807_vm8, %v3302_v57, %v804_v18  ;;  %3094 = vmatmul.msk.bf16.gmra.mxu0 %vm183_vm2, %v157_v20  ;;  %v4008_v55 = vpop.f32.mrf.mxu1 }
 0x522   :  { %v813_v40 = vsel %vm810_vm9, %v812_v41, %v808_v21 }
 0x523   :  { %v826_v22 = vmul.f32 %v822_v38, %v813_v40 }
 0x525   :  { %831 = vrot.lane.b32.xlu2 %v826_v22, %s3526_s22 }
 0x569   :  { %v1773_v61 = vpop.permute.xlu2 %1772  ;;  %v830_v49 = vpop.permute.xlu1 %829 }
 0x56a   :  { %v3947_v24 = vadd.f32 %v1773_v61, %v3846_v63  ;;  %v3959_v30 = vadd.f32 %v830_v49, %v3660_v43  ;;  %v390_v61 = vadd.f32 %v3738_v0, %v3890_v25 }
 0x56b   :  { %v1775_v35 = vpop.permute.xlu0 %1774 }
 0x56c   :  { %v3950_v32 = vadd.f32 %v1775_v35, %v3853_v6  ;;  %v1852_v47 = vmul.f32 %v3820_v10, %v3947_v24  ;;  %v1902_v51 = vsub.f32 %v3947_v24, %v3965_v36 }
 0x56e   :  { %1856 = vrot.lane.b32.xlu2 %v1852_v47, %s3525_s15  ;;  %v1853_v26 = vmul.f32 %v3820_v10, %v3950_v32  ;;  %v1903_v37 = vsub.f32 %v3950_v32, %v3989_v52 }
 0x570   :  { %1858 = vrot.lane.b32.xlu0 %v1853_v26, %s3525_s15 }
 0x57f   :  { %v904_v54 = vpop.permute.xlu1 %903  ;;  %v832_v29 = vpop.permute.xlu2 %831 }
 0x580   :  { %v908_v31 = vadd.f32 %v904_v54, %v3890_v25  ;;  %v3963_v33 = vadd.f32 %v832_v29, %v3662_v44  ;;  %v3981_v44 = vld [vmem:[%s4912_s4] ss:$0 sm:$0xff]  ;;  %v1665_v54 = vadd.f32 %v3899_v27, %v3989_v52 }
 0x581   :  { %v902_v2 = vpop.permute.xlu0 %901 }
 0x582   :  { %v907_v39 = vadd.f32 %v902_v2, %v3865_v17  ;;  %v910_v34 = vmul.f32 %v3971_v45, %v908_v31  ;;  %v1559_v43 = vpack.c.bf16 %v3963_v33, %v3959_v30  ;;  %v982_v28 = vmul.f32 %v3981_v44, %v908_v31 }
 0x583   :  { %v960_v38 = vsub.f32 %v908_v31, %v3733_v62  ;;  %v1032_v5 = vsub.f32 %v908_v31, %v4008_v55 }
 0x584   :  { %915 = vrot.lane.b32.xlu2 %v910_v34, %s3526_s22  ;;  %3158 = vmatmul.msk.bf16.gmra.mxu2 %vm281_vm7, %v1559_v43  ;;  %v981_v48 = vmul.f32 %v3981_v44, %v907_v39  ;;  %v909_v50 = vmul.f32 %v3971_v45, %v907_v39  ;;  %v1031_v57 = vsub.f32 %v907_v39, %v3997_v56 }
 0x585   :  { %v959_v58 = vsub.f32 %v907_v39, %v3727_v60 }
 0x586   :  { %985 = vrot.lane.b32.xlu0 %v981_v48, %s3525_s15  ;;  %913 = vrot.lane.b32.xlu1 %v909_v50, %s3526_s22 }
 0x58c   :  { %1906 = vrot.lane.b32.xlu2 %v1902_v51, %s3525_s15 }
 0x58e   :  { %1908 = vrot.lane.b32.xlu0 %v1903_v37, %s3525_s15  ;;  %987 = vrot.lane.b32.xlu1 %v982_v28, %s3525_s15 }
 0x594   :  { %965 = vrot.lane.b32.xlu2 %v960_v38, %s3526_s22 }
 0x596   :  { %1035 = vrot.lane.b32.xlu0 %v1031_v57, %s3525_s15  ;;  %963 = vrot.lane.b32.xlu1 %v959_v58, %s3526_s22 }
 0x59c   :  { %98 = vperm.xlu2 %3229, %v53_v1  }
 0x59e   :  { %v4014_v7 = vpop.f32.mrf.mxu0  ;;  %101 = vperm.xlu0 %3227, %v54_v4   ;;  %1037 = vrot.lane.b32.xlu1 %v1032_v5, %s3525_s15 }
 0x5a6   :  { %v4017_v8 = vpop.f32.mrf.mxu0 }
 0x5a7   :  { %v263_v9 = vpack.c.bf16 %v4017_v8, %v4014_v7 }
 0x5a9   :  { %3110 = vmatmul.msk.bf16.gmra.mxu1 %vm281_vm7, %v263_v9 }
 0x5c8   :  { %v1857_v18 = vpop.permute.xlu2 %1856 }
 0x5c9   :  { %v1862_v20 = vadd.f32 %v1857_v18, %v1664_v15 }
 0x5cb   :  { %v3174_v41 = vmul.f32 -1.442695, %v1862_v20 }
 0x5cd   :  { %3303 = vpow2.f32 %v3174_v41 }
 0x5d3   :  { %v3304_v21 = vpop.eup %3303 }
 0x5d4   :  { %v1870_v40 = vadd.f32 1.0, %v3304_v21  ;;  %v389_v21 = vadd.f32 %v3738_v0, %v3865_v17 }
 0x5d6   :  { %3305 = vrcp.f32 %v1870_v40  ;;  %v1883_v29 = vand.u32 2147483648, %v1870_v40  ;;  %v1881_v39 = vand.u32 2147483647, %v1870_v40  ;;  %vm1877_vm11 = vweird.f32 %v1870_v40 }
 0x5d8   :  { %v1884_v50 = vor.u32 1.1754944e-38, %v1883_v29  ;;  %vm1882_vm13 = vcmp.eq.f32.partialorder %v1881_v39, 8.507059e+37 }
 0x5dc   :  { %v3306_v22 = vpop.eup %3305 }
 0x5dd   :  { %v1873_v35 = vmul.f32 %v3306_v22, %v1870_v40  ;;  %vm1878_vm10 = vweird.f32 %v3306_v22 }
 0x5de   :  { %v916_v47 = vpop.permute.xlu2 %915  ;;  %vm1879_vm12 = vmor %vm1877_vm11, %vm1878_vm10 }
 0x5df   :  { %v920_v26 = vadd.f32 %v916_v47, %v390_v61  ;;  %v1874_v49 = vsub.f32 1.0, %v1873_v35 }
 0x5e1   :  { %v3127_v31 = vmul.f32 -1.442695, %v920_v26  ;;  %v1875_v2 = vmul.f32 %v3306_v22, %v1874_v49 }
 0x5e2   :  { %v1859_v34 = vpop.permute.xlu0 %1858 }
 0x5e3   :  { %3307 = vpow2.f32 %v3127_v31  ;;  %v1863_v43 = vadd.f32 %v1859_v34, %v1665_v54  ;;  %v1876_v48 = vadd.f32 %v3306_v22, %v1875_v2 }
 0x5e5   :  { %v3175_v25 = vmul.f32 -1.442695, %v1863_v43  ;;  %v1880_v51 = vsel %vm1879_vm12, %v3306_v22, %v1876_v48  ;;  %v369_v22 = vadd.f32 %v3685_v53, %v3997_v56 }
 0x5e6   :  { %v1885_v37 = vsel %vm1882_vm13, %v1884_v50, %v1880_v51  ;;  %v1907_v28 = vpop.permute.xlu2 %1906 }
 0x5e7   :  { %3309 = vpow2.f32 %v3175_v25  ;;  %v1912_v38 = vmul.f32 %v1907_v28, %v1885_v37 }
 0x5e9   :  { %v3308_v57 = vpop.eup %3307  ;;  %1916 = vrot.lane.b32.xlu1 %v1912_v38, %s3527_s23 }
 0x5ea   :  { %v928_v58 = vadd.f32 1.0, %v3308_v57  ;;  %v370_v57 = vadd.f32 %v3685_v53, %v4008_v55 }
 0x5ec   :  { %3311 = vrcp.f32 %v928_v58  ;;  %v953_v15 = vand.u32 2147483647, %v928_v58  ;;  %v955_v41 = vand.u32 2147483648, %v928_v58  ;;  %vm949_vm15 = vweird.f32 %v928_v58 }
 0x5ed   :  { %v3310_v1 = vpop.eup %3309 }
 0x5ee   :  { %v1871_v4 = vadd.f32 1.0, %v3310_v1  ;;  %vm4033_vm0 = vcmp.eq.f32.partialorder %v953_v15, 8.507059e+37  ;;  %v956_v2 = vor.u32 1.1754944e-38, %v955_v41  ;;  %v966_v51 = vpop.permute.xlu2 %965 }
 0x5f0   :  { %3313 = vrcp.f32 %v1871_v4  ;;  %v1896_v17 = vand.u32 2147483647, %v1871_v4  ;;  %v1898_v39 = vand.u32 2147483648, %v1871_v4  ;;  %vm1892_vm4 = vweird.f32 %v1871_v4 }
 0x5f2   :  { %v3312_v5 = vpop.eup %3311  ;;  %v1899_v38 = vor.u32 1.1754944e-38, %v1898_v39  ;;  %vm1897_vm6 = vcmp.eq.f32.partialorder %v1896_v17, 8.507059e+37 }
 0x5f3   :  { %v945_v9 = vmul.f32 %v3312_v5, %v928_v58  ;;  %vm950_vm14 = vweird.f32 %v3312_v5 }
 0x5f4   :  { %vm951_vm1 = vmor %vm949_vm15, %vm950_vm14 }
 0x5f5   :  { %v946_v18 = vsub.f32 1.0, %v945_v9 }
 0x5f6   :  { %v3314_v20 = vpop.eup %3313  ;;  %v99_v35 = vpop.permute.xlu2 %98 }
 0x5f7   :  { %v947_v40 = vmul.f32 %v3312_v5, %v946_v18  ;;  %v1888_v61 = vmul.f32 %v3314_v20, %v1871_v4  ;;  %vm1893_vm3 = vweird.f32 %v3314_v20  ;;  %vm117_vm8 = vcmp.eq.s32.totalorder %v3604_v13, %v99_v35 }
 0x5f8   :  { %v914_v47 = vpop.permute.xlu1 %913  ;;  %v986_v26 = vpop.permute.xlu0 %985  ;;  %vm1894_vm5 = vmor %vm1892_vm4, %vm1893_vm3 }
 0x5f9   :  { %v948_v49 = vadd.f32 %v3312_v5, %v947_v40  ;;  %v919_v54 = vadd.f32 %v914_v47, %v389_v21  ;;  %v991_v29 = vadd.f32 %v986_v26, %v369_v22  ;;  %v1889_v31 = vsub.f32 1.0, %v1888_v61 }
 0x5fb   :  { %v952_v34 = vsel %vm951_vm1, %v3312_v5, %v948_v49  ;;  %v3126_v43 = vmul.f32 -1.442695, %v919_v54  ;;  %v3128_v48 = vmul.f32 -1.442695, %v991_v29  ;;  %v1890_v50 = vmul.f32 %v3314_v20, %v1889_v31 }
 0x5fc   :  { %v957_v25 = vsel %vm4033_vm0, %v956_v2, %v952_v34  ;;  %v3070_v2 = vsel %vm117_vm8, 1.0, %v4918_v16 }
 0x5fd   :  { %v970_v37 = vmul.f32 %v966_v51, %v957_v25  ;;  %3315 = vpow2.f32 %v3126_v43  ;;  %v1891_v28 = vadd.f32 %v3314_v20, %v1890_v50 }
 0x5fe   :  { %3317 = vpow2.f32 %v3128_v48 }
 0x5ff   :  { %975 = vrot.lane.b32.xlu1 %v970_v37, %s3526_s22  ;;  %v1895_v58 = vsel %vm1894_vm5, %v3314_v20, %v1891_v28 }
 0x600   :  { %v988_v1 = vpop.permute.xlu1 %987  ;;  %v1900_v5 = vsel %vm1897_vm6, %v1899_v38, %v1895_v58  ;;  %v1909_v9 = vpop.permute.xlu0 %1908 }
 0x601   :  { %v992_v15 = vadd.f32 %v988_v1, %v370_v57  ;;  %v1913_v18 = vmul.f32 %v1909_v9, %v1900_v5 }
 0x603   :  { %v3316_v41 = vpop.eup %3315  ;;  %v3129_v21 = vmul.f32 -1.442695, %v992_v15  ;;  %1918 = vrot.lane.b32.xlu2 %v1913_v18, %s3527_s23 }
 0x604   :  { %v3318_v4 = vpop.eup %3317  ;;  %v927_v40 = vadd.f32 1.0, %v3316_v41 }
 0x605   :  { %v999_v22 = vadd.f32 1.0, %v3318_v4  ;;  %3319 = vpow2.f32 %v3129_v21 }
 0x606   :  { %3321 = vrcp.f32 %v927_v40  ;;  %v938_v17 = vand.u32 2147483647, %v927_v40  ;;  %v940_v39 = vand.u32 2147483648, %v927_v40  ;;  %vm934_vm12 = vweird.f32 %v927_v40 }
 0x607   :  { %3323 = vrcp.f32 %v999_v22  ;;  %v1012_v50 = vand.u32 2147483648, %v999_v22  ;;  %v1010_v51 = vand.u32 2147483647, %v999_v22  ;;  %vm1006_vm14 = vweird.f32 %v999_v22 }
 0x608   :  { %v1036_v61 = vpop.permute.xlu0 %1035  ;;  %v941_v58 = vor.u32 1.1754944e-38, %v940_v39  ;;  %v964_v1 = vpop.permute.xlu1 %963  ;;  %vm939_vm15 = vcmp.eq.f32.partialorder %v938_v17, 8.507059e+37 }
 0x609   :  { %v1013_v15 = vor.u32 1.1754944e-38, %v1012_v50  ;;  %vm1011_vm1 = vcmp.eq.f32.partialorder %v1010_v51, 8.507059e+37  ;;  %v4063_v50 = vpop.f32.mrf.mxu2 }
 0x60b   :  { %v3320_v47 = vpop.eup %3319 }
 0x60c   :  { %v3322_v20 = vpop.eup %3321  ;;  %v1000_v26 = vadd.f32 1.0, %v3320_v47 }
 0x60d   :  { %v3324_v49 = vpop.eup %3323  ;;  %v930_v54 = vmul.f32 %v3322_v20, %v927_v40  ;;  %vm935_vm9 = vweird.f32 %v3322_v20 }
 0x60e   :  { %3325 = vrcp.f32 %v1000_v26  ;;  %v1002_v29 = vmul.f32 %v3324_v49, %v999_v22  ;;  %vm1007_vm11 = vweird.f32 %v3324_v49  ;;  %vm936_vm13 = vmor %vm934_vm12, %vm935_vm9  ;;  %v1027_v47 = vand.u32 2147483648, %v1000_v26 }
 0x60f   :  { %v931_v31 = vsub.f32 1.0, %v930_v54  ;;  %vm1008_vm0 = vmor %vm1006_vm14, %vm1007_vm11  ;;  %vm1021_vm4 = vweird.f32 %v1000_v26 }
 0x610   :  { %v1003_v34 = vsub.f32 1.0, %v1002_v29  ;;  %v102_v43 = vpop.permute.xlu0 %101  ;;  %v1025_v29 = vand.u32 2147483647, %v1000_v26 }
 0x611   :  { %v932_v48 = vmul.f32 %v3322_v20, %v931_v31  ;;  %vm118_vm10 = vcmp.eq.s32.totalorder %v3604_v13, %v102_v43 }
 0x612   :  { %v1004_v25 = vmul.f32 %v3324_v49, %v1003_v34  ;;  %v3071_v37 = vsel %vm118_vm10, 1.0, %v4918_v16 }
 0x613   :  { %v933_v28 = vadd.f32 %v3322_v20, %v932_v48  ;;  %v158_v38 = vpack.c.bf16 %v3071_v37, %v3070_v2  ;;  %v1038_v2 = vpop.permute.xlu1 %1037 }
 0x614   :  { %v3326_v57 = vpop.eup %3325  ;;  %v1005_v5 = vadd.f32 %v3324_v49, %v1004_v25 }
 0x615   :  { %v937_v9 = vsel %vm936_vm13, %v3322_v20, %v933_v28  ;;  %v1017_v18 = vmul.f32 %v3326_v57, %v1000_v26  ;;  %3095 = vmatmul.msk.bf16.gmra.mxu0 %vm183_vm2, %v158_v38  ;;  %vm1022_vm3 = vweird.f32 %v3326_v57  ;;  %v1028_v20 = vor.u32 1.1754944e-38, %v1027_v47  ;;  %v4070_v38 = vpop.f32.mrf.mxu2 }
 0x616   :  { %v942_v13 = vsel %vm939_vm15, %v941_v58, %v937_v9  ;;  %v1009_v41 = vsel %vm1008_vm0, %v3324_v49, %v1005_v5  ;;  %vm1023_vm5 = vmor %vm1021_vm4, %vm1022_vm3  ;;  %vm1026_vm2 = vcmp.eq.f32.partialorder %v1025_v29, 8.507059e+37 }
 0x617   :  { %v969_v21 = vmul.f32 %v964_v1, %v942_v13  ;;  %v1014_v4 = vsel %vm1011_vm1, %v1013_v15, %v1009_v41  ;;  %v1018_v40 = vsub.f32 1.0, %v1017_v18 }
 0x618   :  { %v1041_v35 = vmul.f32 %v1036_v61, %v1014_v4 }
 0x619   :  { %v1019_v54 = vmul.f32 %v3326_v57, %v1018_v40  ;;  %973 = vrot.lane.b32.xlu0 %v969_v21, %s3526_s22 }
 0x61a   :  { %1045 = vrot.lane.b32.xlu2 %v1041_v35, %s3527_s23 }
 0x61b   :  { %v1020_v22 = vadd.f32 %v3326_v57, %v1019_v54 }
 0x61d   :  { %v1024_v31 = vsel %vm1023_vm5, %v3326_v57, %v1020_v22  ;;  %v4075_v57 = vpop.f32.mrf.mxu1 }
 0x61e   :  { %v1029_v49 = vsel %vm1026_vm2, %v1028_v20, %v1024_v31  ;;  %v1667_v20 = vadd.f32 %v3899_v27, %v4070_v38 }
 0x61f   :  { %v1042_v17 = vmul.f32 %v1038_v2, %v1029_v49 }
 0x621   :  { %1047 = vrot.lane.b32.xlu0 %v1042_v17, %s3527_s23 }
 0x625   :  { %v4105_v54 = vpop.f32.mrf.mxu1 }
 0x65b   :  { %v1917_v61 = vpop.permute.xlu1 %1916 }
 0x65c   :  { %v4052_v39 = vadd.f32 %v1917_v61, %v3965_v36 }
 0x65d   :  { %v1919_v34 = vpop.permute.xlu2 %1918 }
 0x65e   :  { %v4055_v43 = vadd.f32 %v1919_v34, %v3989_v52  ;;  %v1996_v26 = vmul.f32 %v3820_v10, %v4052_v39  ;;  %v2046_v47 = vsub.f32 %v4052_v39, %v4063_v50 }
 0x660   :  { %2000 = vrot.lane.b32.xlu1 %v1996_v26, %s3525_s15  ;;  %v1997_v48 = vmul.f32 %v3820_v10, %v4055_v43  ;;  %v2047_v10 = vsub.f32 %v4055_v43, %v4070_v38 }
 0x662   :  { %2002 = vrot.lane.b32.xlu2 %v1997_v48, %s3525_s15  ;;  %v371_v48 = vadd.f32 %v3685_v53, %v4075_v57 }
 0x671   :  { %v976_v1 = vpop.permute.xlu1 %975 }
 0x672   :  { %v4080_v9 = vadd.f32 %v976_v1, %v3733_v62 }
 0x674   :  { %v1046_v25 = vpop.permute.xlu2 %1045 }
 0x675   :  { %v1051_v51 = vadd.f32 %v1046_v25, %v3997_v56 }
 0x677   :  { %v1125_v37 = vmul.f32 %v3981_v44, %v1051_v51  ;;  %v1053_v28 = vmul.f32 %v3971_v45, %v1051_v51  ;;  %v1175_v58 = vsub.f32 %v1051_v51, %v4075_v57  ;;  %v1103_v35 = vsub.f32 %v1051_v51, %v3784_v59 }
 0x679   :  { %1129 = vrot.lane.b32.xlu2 %v1125_v37, %s3525_s15  ;;  %1057 = vrot.lane.b32.xlu0 %v1053_v28, %s3526_s22 }
 0x681   :  { %2052 = vrot.lane.b32.xlu2 %v2047_v10, %s3525_s15 }
 0x689   :  { %1179 = vrot.lane.b32.xlu2 %v1175_v58, %s3525_s15 }
 0x68b   :  { %v974_v5 = vpop.permute.xlu0 %973 }
 0x68c   :  { %v4083_v15 = vadd.f32 %v974_v5, %v3727_v60 }
 0x68e   :  { %v1560_v18 = vpack.c.bf16 %v4080_v9, %v4083_v15 }
 0x690   :  { %3159 = vmatmul.msk.bf16.gmra.mxu2 %vm281_vm7, %v1560_v18 }
 0x692   :  { %v4088_v13 = vpop.f32.mrf.mxu0 }
 0x693   :  { %v1048_v41 = vpop.permute.xlu0 %1047 }
 0x694   :  { %v1052_v21 = vadd.f32 %v1048_v41, %v4008_v55 }
 0x696   :  { %v1126_v4 = vmul.f32 %v3981_v44, %v1052_v21  ;;  %v1054_v40 = vmul.f32 %v3971_v45, %v1052_v21  ;;  %v1176_v29 = vsub.f32 %v1052_v21, %v4105_v54  ;;  %v1104_v22 = vsub.f32 %v1052_v21, %v3794_v3 }
 0x698   :  { %1131 = vrot.lane.b32.xlu0 %v1126_v4, %s3525_s15  ;;  %1059 = vrot.lane.b32.xlu1 %v1054_v40, %s3526_s22 }
 0x69a   :  { %v4095_v60 = vpop.f32.mrf.mxu0 }
 0x69b   :  { %v264_v62 = vpack.c.bf16 %v4095_v60, %v4088_v13 }
 0x69d   :  { %3111 = vmatmul.msk.bf16.gmra.mxu1 %vm281_vm7, %v264_v62 }
 0x6a0   :  { %1107 = vrot.lane.b32.xlu0 %v1103_v35, %s3526_s22  ;;  %2050 = vrot.lane.b32.xlu1 %v2046_v47, %s3525_s15  ;;  %v1666_v47 = vadd.f32 %v3899_v27, %v4063_v50 }
 0x6a8   :  { %1181 = vrot.lane.b32.xlu0 %v1176_v29, %s3525_s15  ;;  %1109 = vrot.lane.b32.xlu1 %v1104_v22, %s3526_s22 }
 0x6bc   :  { %v2003_v31 = vpop.permute.xlu2 %2002 }
 0x6bd   :  { %v2007_v49 = vadd.f32 %v2003_v31, %v1667_v20 }
 0x6bf   :  { %v3179_v2 = vmul.f32 -1.442695, %v2007_v49 }
 0x6c1   :  { %3327 = vpow2.f32 %v3179_v2 }
 0x6c7   :  { %v3328_v17 = vpop.eup %3327 }
 0x6c8   :  { %v2015_v61 = vadd.f32 1.0, %v3328_v17  ;;  %v391_v17 = vadd.f32 %v3738_v0, %v3997_v56 }
 0x6ca   :  { %3329 = vrcp.f32 %v2015_v61  ;;  %v2042_v28 = vand.u32 2147483648, %v2015_v61  ;;  %v2040_v58 = vand.u32 2147483647, %v2015_v61  ;;  %vm2036_vm8 = vweird.f32 %v2015_v61 }
 0x6cc   :  { %v2043_v18 = vor.u32 1.1754944e-38, %v2042_v28  ;;  %vm2041_vm10 = vcmp.eq.f32.partialorder %v2040_v58, 8.507059e+37 }
 0x6d0   :  { %v3330_v34 = vpop.eup %3329 }
 0x6d1   :  { %v2032_v26 = vmul.f32 %v3330_v34, %v2015_v61  ;;  %vm2037_vm6 = vweird.f32 %v3330_v34 }
 0x6d2   :  { %vm2038_vm9 = vmor %vm2036_vm8, %vm2037_vm6  ;;  %v2001_v62 = vpop.permute.xlu1 %2000 }
 0x6d3   :  { %v1130_v25 = vpop.permute.xlu2 %1129  ;;  %v2033_v51 = vsub.f32 1.0, %v2032_v26  ;;  %v2006_v22 = vadd.f32 %v2001_v62, %v1666_v47 }
 0x6d4   :  { %v1135_v37 = vadd.f32 %v1130_v25, %v371_v48 }
 0x6d5   :  { %v2034_v10 = vmul.f32 %v3330_v34, %v2033_v51  ;;  %v3178_v20 = vmul.f32 -1.442695, %v2006_v22 }
 0x6d6   :  { %v3132_v1 = vmul.f32 -1.442695, %v1135_v37 }
 0x6d7   :  { %v2035_v5 = vadd.f32 %v3330_v34, %v2034_v10 }
 0x6d8   :  { %3331 = vpow2.f32 %v3132_v1 }
 0x6d9   :  { %v2039_v41 = vsel %vm2038_vm9, %v3330_v34, %v2035_v5 }
 0x6da   :  { %v2044_v21 = vsel %vm2041_vm10, %v2043_v18, %v2039_v41 }
 0x6db   :  { %v2053_v4 = vpop.permute.xlu2 %2052 }
 0x6dc   :  { %v2057_v40 = vmul.f32 %v2053_v4, %v2044_v21 }
 0x6de   :  { %v3332_v35 = vpop.eup %3331  ;;  %2062 = vrot.lane.b32.xlu2 %v2057_v40, %s3527_s23 }
 0x6df   :  { %v1143_v29 = vadd.f32 1.0, %v3332_v35 }
 0x6e1   :  { %3333 = vrcp.f32 %v1143_v29  ;;  %v1156_v61 = vand.u32 2147483648, %v1143_v29  ;;  %v1154_v48 = vand.u32 2147483647, %v1143_v29  ;;  %vm1150_vm12 = vweird.f32 %v1143_v29 }
 0x6e2   :  { %3335 = vpow2.f32 %v3178_v20 }
 0x6e3   :  { %v1157_v10 = vor.u32 1.1754944e-38, %v1156_v61  ;;  %vm1155_vm14 = vcmp.eq.f32.partialorder %v1154_v48, 8.507059e+37  ;;  %v1180_v18 = vpop.permute.xlu2 %1179 }
 0x6e7   :  { %v3334_v31 = vpop.eup %3333 }
 0x6e8   :  { %v1146_v49 = vmul.f32 %v3334_v31, %v1143_v29  ;;  %vm1151_vm11 = vweird.f32 %v3334_v31  ;;  %v3336_v51 = vpop.eup %3335 }
 0x6e9   :  { %vm1152_vm13 = vmor %vm1150_vm12, %vm1151_vm11  ;;  %v2014_v1 = vadd.f32 1.0, %v3336_v51 }
 0x6ea   :  { %v1147_v2 = vsub.f32 1.0, %v1146_v49  ;;  %v372_v49 = vadd.f32 %v3685_v53, %v4105_v54 }
 0x6eb   :  { %v1058_v34 = vpop.permute.xlu0 %1057  ;;  %vm2021_vm1 = vweird.f32 %v2014_v1  ;;  %v2027_v51 = vand.u32 2147483648, %v2014_v1 }
 0x6ec   :  { %v1148_v26 = vmul.f32 %v3334_v31, %v1147_v2  ;;  %v1063_v25 = vadd.f32 %v1058_v34, %v391_v17 }
 0x6ee   :  { %v1149_v37 = vadd.f32 %v3334_v31, %v1148_v26  ;;  %v3130_v28 = vmul.f32 -1.442695, %v1063_v25  ;;  %v2025_v25 = vand.u32 2147483647, %v2014_v1 }
 0x6f0   :  { %v1153_v58 = vsel %vm1152_vm13, %v3334_v31, %v1149_v37  ;;  %3337 = vpow2.f32 %v3130_v28  ;;  %v392_v31 = vadd.f32 %v3738_v0, %v4008_v55  ;;  %vm2026_vm2 = vcmp.eq.f32.partialorder %v2025_v25, 8.507059e+37 }
 0x6f1   :  { %v1158_v5 = vsel %vm1155_vm14, %v1157_v10, %v1153_v58  ;;  %3339 = vrcp.f32 %v2014_v1 }
 0x6f2   :  { %v1185_v41 = vmul.f32 %v1180_v18, %v1158_v5  ;;  %v2028_v18 = vor.u32 1.1754944e-38, %v2027_v51 }
 0x6f4   :  { %1189 = vrot.lane.b32.xlu2 %v1185_v41, %s3527_s23 }
 0x6f6   :  { %v3338_v56 = vpop.eup %3337 }
 0x6f7   :  { %v1071_v21 = vadd.f32 1.0, %v3338_v56  ;;  %v3340_v4 = vpop.eup %3339 }
 0x6f8   :  { %v2017_v40 = vmul.f32 %v3340_v4, %v2014_v1  ;;  %vm2022_vm15 = vweird.f32 %v3340_v4 }
 0x6f9   :  { %3341 = vrcp.f32 %v1071_v21  ;;  %v1084_v37 = vand.u32 2147483648, %v1071_v21  ;;  %vm2023_vm3 = vmor %vm2021_vm1, %vm2022_vm15  ;;  %vm1078_vm4 = vweird.f32 %v1071_v21  ;;  %v1082_v55 = vand.u32 2147483647, %v1071_v21 }
 0x6fa   :  { %v2018_v47 = vsub.f32 1.0, %v2017_v40 }
 0x6fb   :  { %v1085_v41 = vor.u32 1.1754944e-38, %v1084_v37  ;;  %vm1083_vm6 = vcmp.eq.f32.partialorder %v1082_v55, 8.507059e+37 }
 0x6fc   :  { %v2019_v22 = vmul.f32 %v3340_v4, %v2018_v47 }
 0x6fe   :  { %v2020_v61 = vadd.f32 %v3340_v4, %v2019_v22 }
 0x6ff   :  { %v3342_v62 = vpop.eup %3341 }
 0x700   :  { %v1074_v35 = vmul.f32 %v3342_v62, %v1071_v21  ;;  %vm1079_vm0 = vweird.f32 %v3342_v62  ;;  %v2024_v58 = vsel %vm2023_vm3, %v3340_v4, %v2020_v61 }
 0x701   :  { %vm1080_vm5 = vmor %vm1078_vm4, %vm1079_vm0  ;;  %v2029_v56 = vsel %vm2026_vm2, %v2028_v18, %v2024_v58 }
 0x702   :  { %v1075_v29 = vsub.f32 1.0, %v1074_v35 }
 0x704   :  { %v1076_v20 = vmul.f32 %v3342_v62, %v1075_v29 }
 0x706   :  { %v1077_v48 = vadd.f32 %v3342_v62, %v1076_v20 }
 0x708   :  { %v1081_v5 = vsel %vm1080_vm5, %v3342_v62, %v1077_v48 }
 0x709   :  { %v1086_v35 = vsel %vm1083_vm6, %v1085_v41, %v1081_v5 }
 0x70a   :  { %v1060_v2 = vpop.permute.xlu1 %1059  ;;  %v1132_v17 = vpop.permute.xlu0 %1131 }
 0x70b   :  { %v1064_v34 = vadd.f32 %v1060_v2, %v392_v31  ;;  %v1136_v26 = vadd.f32 %v1132_v17, %v372_v49 }
 0x70d   :  { %v3131_v28 = vmul.f32 -1.442695, %v1064_v34  ;;  %v3133_v10 = vmul.f32 -1.442695, %v1136_v26 }
 0x70f   :  { %3343 = vpow2.f32 %v3131_v28 }
 0x710   :  { %3345 = vpow2.f32 %v3133_v10 }
 0x712   :  { %v2051_v40 = vpop.permute.xlu1 %2050  ;;  %v1108_v47 = vpop.permute.xlu0 %1107 }
 0x713   :  { %v2056_v1 = vmul.f32 %v2051_v40, %v2029_v56  ;;  %v1113_v29 = vmul.f32 %v1108_v47, %v1086_v35 }
 0x715   :  { %v3344_v22 = vpop.eup %3343  ;;  %2060 = vrot.lane.b32.xlu1 %v2056_v1, %s3527_s23  ;;  %1117 = vrot.lane.b32.xlu0 %v1113_v29, %s3526_s22 }
 0x716   :  { %v3346_v21 = vpop.eup %3345  ;;  %v1072_v20 = vadd.f32 1.0, %v3344_v22 }
 0x717   :  { %v1144_v4 = vadd.f32 1.0, %v3346_v21  ;;  %v4135_v21 = vld [vmem:[%s4912_s4 + $0x2] ss:$0 sm:$0xff] }
 0x718   :  { %3347 = vrcp.f32 %v1072_v20  ;;  %v1099_v61 = vand.u32 2147483648, %v1072_v20  ;;  %v1097_v48 = vand.u32 2147483647, %v1072_v20  ;;  %vm1093_vm10 = vweird.f32 %v1072_v20 }
 0x719   :  { %3349 = vrcp.f32 %v1144_v4  ;;  %v1171_v25 = vand.u32 2147483648, %v1144_v4  ;;  %v1169_v37 = vand.u32 2147483647, %v1144_v4  ;;  %vm1165_vm12 = vweird.f32 %v1144_v4 }
 0x71a   :  { %v1100_v10 = vor.u32 1.1754944e-38, %v1099_v61  ;;  %vm1098_vm13 = vcmp.eq.f32.partialorder %v1097_v48, 8.507059e+37  ;;  %v1110_v41 = vpop.permute.xlu1 %1109  ;;  %v1182_v47 = vpop.permute.xlu0 %1181 }
 0x71b   :  { %v1172_v5 = vor.u32 1.1754944e-38, %v1171_v25  ;;  %vm1170_vm15 = vcmp.eq.f32.partialorder %v1169_v37, 8.507059e+37 }
 0x71e   :  { %v3348_v62 = vpop.eup %3347 }
 0x71f   :  { %v3350_v31 = vpop.eup %3349  ;;  %v1089_v49 = vmul.f32 %v3348_v62, %v1072_v20  ;;  %vm1094_vm8 = vweird.f32 %v3348_v62 }
 0x720   :  { %v1161_v2 = vmul.f32 %v3350_v31, %v1144_v4  ;;  %vm1166_vm9 = vweird.f32 %v3350_v31  ;;  %vm1095_vm11 = vmor %vm1093_vm10, %vm1094_vm8  ;;  %v4140_v4 = vpop.f32.mrf.mxu2 }
 0x721   :  { %v1090_v17 = vsub.f32 1.0, %v1089_v49  ;;  %vm1167_vm14 = vmor %vm1165_vm12, %vm1166_vm9 }
 0x722   :  { %v1162_v34 = vsub.f32 1.0, %v1161_v2 }
 0x723   :  { %v1091_v26 = vmul.f32 %v3348_v62, %v1090_v17 }
 0x724   :  { %v1163_v51 = vmul.f32 %v3350_v31, %v1162_v34  ;;  %v4152_v34 = vpop.f32.mrf.mxu1 }
 0x725   :  { %v1092_v28 = vadd.f32 %v3348_v62, %v1091_v26 }
 0x726   :  { %v1164_v55 = vadd.f32 %v3350_v31, %v1163_v51 }
 0x727   :  { %v1096_v58 = vsel %vm1095_vm11, %v3348_v62, %v1092_v28 }
 0x728   :  { %v1101_v18 = vsel %vm1098_vm13, %v1100_v10, %v1096_v58  ;;  %v1168_v56 = vsel %vm1167_vm14, %v3350_v31, %v1164_v55  ;;  %v4147_v17 = vpop.f32.mrf.mxu2 }
 0x729   :  { %v1114_v40 = vmul.f32 %v1110_v41, %v1101_v18  ;;  %v1173_v35 = vsel %vm1170_vm15, %v1172_v5, %v1168_v56  ;;  %v1669_v28 = vadd.f32 %v3899_v27, %v4147_v17 }
 0x72a   :  { %v1186_v1 = vmul.f32 %v1182_v47, %v1173_v35 }
 0x72b   :  { %1119 = vrot.lane.b32.xlu1 %v1114_v40, %s3526_s22 }
 0x72c   :  { %1191 = vrot.lane.b32.xlu0 %v1186_v1, %s3527_s23 }
 0x738   :  { %v2063_v29 = vpop.permute.xlu2 %2062 }
 0x739   :  { %v4130_v22 = vadd.f32 %v2063_v29, %v4070_v38 }
 0x73b   :  { %v2141_v20 = vmul.f32 %v4135_v21, %v4130_v22  ;;  %v2191_v61 = vsub.f32 %v4130_v22, %v4147_v17 }
 0x73d   :  { %2146 = vrot.lane.b32.xlu2 %v2141_v20, %s3525_s15 }
 0x74e   :  { %v1190_v62 = vpop.permute.xlu2 %1189 }
 0x74f   :  { %v1195_v31 = vadd.f32 %v1190_v62, %v4075_v57 }
 0x751   :  { %v1269_v49 = vmul.f32 %v3981_v44, %v1195_v31  ;;  %v1197_v2 = vmul.f32 %v3971_v45, %v1195_v31  ;;  %v1319_v26 = vsub.f32 %v1195_v31, %v4152_v34 }
 0x753   :  { %1273 = vrot.lane.b32.xlu2 %v1269_v49, %s3525_s15  ;;  %1201 = vrot.lane.b32.xlu0 %v1197_v2, %s3526_s22 }
 0x75b   :  { %2196 = vrot.lane.b32.xlu2 %v2191_v61, %s3525_s15 }
 0x763   :  { %1323 = vrot.lane.b32.xlu2 %v1319_v26, %s3525_s15 }
 0x787   :  { %v2061_v48 = vpop.permute.xlu1 %2060  ;;  %v1118_v37 = vpop.permute.xlu0 %1117 }
 0x788   :  { %v4157_v25 = vadd.f32 %v2061_v48, %v4063_v50  ;;  %v4165_v18 = vadd.f32 %v1118_v37, %v3784_v59  ;;  %v1247_v59 = vsub.f32 %v1195_v31, %v3869_v19  ;;  %v4185_v48 = vpop.f32.mrf.mxu1 }
 0x78a   :  { %v2140_v51 = vmul.f32 %v4135_v21, %v4157_v25 }
 0x78c   :  { %2144 = vrot.lane.b32.xlu1 %v2140_v51, %s3525_s15 }
 0x797   :  { %v2147_v10 = vpop.permute.xlu2 %2146 }
 0x798   :  { %v2151_v55 = vadd.f32 %v2147_v10, %v1669_v28 }
 0x79a   :  { %v3183_v58 = vmul.f32 -1.442695, %v2151_v55 }
 0x79c   :  { %3351 = vpow2.f32 %v3183_v58 }
 0x79d   :  { %v1120_v5 = vpop.permute.xlu1 %1119 }
 0x79e   :  { %v4168_v41 = vadd.f32 %v1120_v5, %v3794_v3  ;;  %v1192_v56 = vpop.permute.xlu0 %1191  ;;  %v2190_v3 = vsub.f32 %v4157_v25, %v4140_v4 }
 0x79f   :  { %v1196_v40 = vadd.f32 %v1192_v56, %v4105_v54 }
 0x7a0   :  { %v1561_v35 = vpack.c.bf16 %v4168_v41, %v4165_v18 }
 0x7a1   :  { %v1270_v47 = vmul.f32 %v3981_v44, %v1196_v40  ;;  %v1198_v1 = vmul.f32 %v3971_v45, %v1196_v40  ;;  %v373_v45 = vadd.f32 %v3685_v53, %v4152_v34  ;;  %v1320_v28 = vsub.f32 %v1196_v40, %v4185_v48 }
 0x7a2   :  { %v3352_v29 = vpop.eup %3351  ;;  %3160 = vmatmul.msk.bf16.gmra.mxu2 %vm281_vm7, %v1561_v35  ;;  %v1248_v10 = vsub.f32 %v1196_v40, %v3880_v23 }
 0x7a3   :  { %v2159_v20 = vadd.f32 1.0, %v3352_v29  ;;  %1275 = vrot.lane.b32.xlu0 %v1270_v47, %s3525_s15  ;;  %1203 = vrot.lane.b32.xlu1 %v1198_v1, %s3526_s22 }
 0x7a5   :  { %3353 = vrcp.f32 %v2159_v20  ;;  %v2186_v26 = vand.u32 2147483648, %v2159_v20  ;;  %v2184_v37 = vand.u32 2147483647, %v2159_v20  ;;  %vm2180_vm1 = vweird.f32 %v2159_v20 }
 0x7a7   :  { %v2187_v58 = vor.u32 1.1754944e-38, %v2186_v26  ;;  %vm2185_vm4 = vcmp.eq.f32.partialorder %v2184_v37, 8.507059e+37  ;;  %v393_v37 = vadd.f32 %v3738_v0, %v4075_v57 }
 0x7ab   :  { %v3354_v62 = vpop.eup %3353  ;;  %1251 = vrot.lane.b32.xlu0 %v1247_v59, %s3526_s22  ;;  %2194 = vrot.lane.b32.xlu1 %v2190_v3, %s3525_s15 }
 0x7ac   :  { %v2176_v44 = vmul.f32 %v3354_v62, %v2159_v20  ;;  %vm2181_vm0 = vweird.f32 %v3354_v62 }
 0x7ad   :  { %v1274_v49 = vpop.permute.xlu2 %1273  ;;  %vm2182_vm3 = vmor %vm2180_vm1, %vm2181_vm0 }
 0x7ae   :  { %v1279_v2 = vadd.f32 %v1274_v49, %v373_v45  ;;  %v2177_v61 = vsub.f32 1.0, %v2176_v44 }
 0x7b0   :  { %v3136_v51 = vmul.f32 -1.442695, %v1279_v2  ;;  %v2178_v31 = vmul.f32 %v3354_v62, %v2177_v61 }
 0x7b2   :  { %3355 = vpow2.f32 %v3136_v51  ;;  %v2179_v55 = vadd.f32 %v3354_v62, %v2178_v31 }
 0x7b3   :  { %1325 = vrot.lane.b32.xlu0 %v1320_v28, %s3525_s15  ;;  %1253 = vrot.lane.b32.xlu1 %v1248_v10, %s3526_s22 }
 0x7b4   :  { %v2183_v5 = vsel %vm2182_vm3, %v3354_v62, %v2179_v55 }
 0x7b5   :  { %v2197_v56 = vpop.permute.xlu2 %2196  ;;  %v2188_v35 = vsel %vm2185_vm4, %v2187_v58, %v2183_v5  ;;  %v1668_v5 = vadd.f32 %v3899_v27, %v4140_v4 }
 0x7b6   :  { %v2201_v47 = vmul.f32 %v2197_v56, %v2188_v35 }
 0x7b8   :  { %v3356_v1 = vpop.eup %3355  ;;  %2206 = vrot.lane.b32.xlu2 %v2201_v47, %s3527_s23 }
 0x7b9   :  { %v1287_v29 = vadd.f32 1.0, %v3356_v1 }
 0x7bb   :  { %3357 = vrcp.f32 %v1287_v29  ;;  %v1300_v20 = vand.u32 2147483648, %v1287_v29  ;;  %v1298_v44 = vand.u32 2147483647, %v1287_v29  ;;  %vm1294_vm2 = vweird.f32 %v1287_v29 }
 0x7bd   :  { %v1301_v62 = vor.u32 1.1754944e-38, %v1300_v20  ;;  %vm1299_vm8 = vcmp.eq.f32.partialorder %v1298_v44, 8.507059e+37  ;;  %v1324_v26 = vpop.permute.xlu2 %1323 }
 0x7c1   :  { %v3358_v40 = vpop.eup %3357 }
 0x7c2   :  { %v1290_v59 = vmul.f32 %v3358_v40, %v1287_v29  ;;  %vm1295_vm5 = vweird.f32 %v3358_v40 }
 0x7c3   :  { %vm1296_vm6 = vmor %vm1294_vm2, %vm1295_vm5 }
 0x7c4   :  { %v1291_v3 = vsub.f32 1.0, %v1290_v59 }
 0x7c5   :  { %v1202_v31 = vpop.permute.xlu0 %1201 }
 0x7c6   :  { %v1292_v45 = vmul.f32 %v3358_v40, %v1291_v3  ;;  %v1207_v28 = vadd.f32 %v1202_v31, %v393_v37 }
 0x7c8   :  { %v1293_v49 = vadd.f32 %v3358_v40, %v1292_v45  ;;  %v3134_v10 = vmul.f32 -1.442695, %v1207_v28 }
 0x7ca   :  { %v1297_v2 = vsel %vm1296_vm6, %v3358_v40, %v1293_v49  ;;  %3359 = vpow2.f32 %v3134_v10 }
 0x7cb   :  { %v1302_v61 = vsel %vm1299_vm8, %v1301_v62, %v1297_v2  ;;  %v394_v62 = vadd.f32 %v3738_v0, %v4105_v54  ;;  %v374_v2 = vadd.f32 %v3685_v53, %v4185_v48 }
 0x7cc   :  { %v1329_v51 = vmul.f32 %v1324_v26, %v1302_v61 }
 0x7ce   :  { %1333 = vrot.lane.b32.xlu2 %v1329_v51, %s3527_s23 }
 0x7d0   :  { %v3360_v55 = vpop.eup %3359 }
 0x7d1   :  { %v1215_v58 = vadd.f32 1.0, %v3360_v55 }
 0x7d3   :  { %3361 = vrcp.f32 %v1215_v58  ;;  %v1228_v54 = vand.u32 2147483648, %v1215_v58  ;;  %vm1222_vm11 = vweird.f32 %v1215_v58 }
 0x7d9   :  { %v3362_v1 = vpop.eup %3361 }
 0x7da   :  { %v1218_v59 = vmul.f32 %v3362_v1, %v1215_v58  ;;  %vm1223_vm9 = vweird.f32 %v3362_v1 }
 0x7db   :  { %vm1224_vm13 = vmor %vm1222_vm11, %vm1223_vm9 }
 0x7dc   :  { %v1219_v3 = vsub.f32 1.0, %v1218_v59 }
 0x7de   :  { %v1220_v45 = vmul.f32 %v3362_v1, %v1219_v3 }
 0x7e0   :  { %v1221_v55 = vadd.f32 %v3362_v1, %v1220_v45 }
 0x7fe   :  { %v2145_v56 = vpop.permute.xlu1 %2144 }
 0x7ff   :  { %v2150_v35 = vadd.f32 %v2145_v56, %v1668_v5 }
 0x801   :  { %v3182_v47 = vmul.f32 -1.442695, %v2150_v35 }
 0x803   :  { %3363 = vpow2.f32 %v3182_v47 }
 0x809   :  { %v3364_v29 = vpop.eup %3363 }
 0x80a   :  { %v2158_v40 = vadd.f32 1.0, %v3364_v29  ;;  %v1226_v29 = vand.u32 2147483647, %v1215_v58 }
 0x80c   :  { %3365 = vrcp.f32 %v2158_v40  ;;  %v2171_v10 = vand.u32 2147483648, %v2158_v40  ;;  %v2169_v56 = vand.u32 2147483647, %v2158_v40  ;;  %vm2165_vm12 = vweird.f32 %v2158_v40 }
 0x80d   :  { %vm1227_vm0 = vcmp.eq.f32.partialorder %v1226_v29, 8.507059e+37 }
 0x80e   :  { %v2172_v3 = vor.u32 1.1754944e-38, %v2171_v10  ;;  %vm2170_vm15 = vcmp.eq.f32.partialorder %v2169_v56, 8.507059e+37 }
 0x812   :  { %v3366_v57 = vpop.eup %3365  ;;  %v2207_v20 = vpop.permute.xlu2 %2206 }
 0x813   :  { %v4198_v44 = vadd.f32 %v2207_v20, %v4147_v17  ;;  %v2161_v49 = vmul.f32 %v3366_v57, %v2158_v40  ;;  %vm2166_vm10 = vweird.f32 %v3366_v57  ;;  %v1225_v20 = vsel %vm1224_vm13, %v3362_v1, %v1221_v55 }
 0x814   :  { %vm2167_vm14 = vmor %vm2165_vm12, %vm2166_vm10 }
 0x815   :  { %v1204_v61 = vpop.permute.xlu1 %1203  ;;  %v1276_v26 = vpop.permute.xlu0 %1275  ;;  %v2285_v51 = vmul.f32 %v4135_v21, %v4198_v44  ;;  %v2162_v31 = vsub.f32 1.0, %v2161_v49  ;;  %v1229_v49 = vor.u32 1.1754944e-38, %v1228_v54 }
 0x816   :  { %v1208_v37 = vadd.f32 %v1204_v61, %v394_v62  ;;  %v1280_v28 = vadd.f32 %v1276_v26, %v374_v2 }
 0x817   :  { %2290 = vrot.lane.b32.xlu2 %v2285_v51, %s3525_s15  ;;  %v2163_v5 = vmul.f32 %v3366_v57, %v2162_v31  ;;  %v1230_v61 = vsel %vm1227_vm0, %v1229_v49, %v1225_v20 }
 0x818   :  { %v3135_v35 = vmul.f32 -1.442695, %v1208_v37  ;;  %v3137_v47 = vmul.f32 -1.442695, %v1280_v28 }
 0x819   :  { %v2164_v59 = vadd.f32 %v3366_v57, %v2163_v5 }
 0x81a   :  { %3367 = vpow2.f32 %v3135_v35  ;;  %v4218_v35 = vld [vmem:[%s4912_s4] ss:$0 sm:$0xff] }
 0x81b   :  { %3369 = vpow2.f32 %v3137_v47  ;;  %v2168_v45 = vsel %vm2167_vm14, %v3366_v57, %v2164_v59 }
 0x81c   :  { %v2173_v62 = vsel %vm2170_vm15, %v2172_v3, %v2168_v45 }
 0x81d   :  { %v2195_v2 = vpop.permute.xlu1 %2194  ;;  %v1252_v26 = vpop.permute.xlu0 %1251 }
 0x81e   :  { %v2200_v51 = vmul.f32 %v2195_v2, %v2173_v62  ;;  %v1257_v31 = vmul.f32 %v1252_v26, %v1230_v61 }
 0x820   :  { %v3368_v58 = vpop.eup %3367  ;;  %2204 = vrot.lane.b32.xlu1 %v2200_v51, %s3527_s23  ;;  %1261 = vrot.lane.b32.xlu0 %v1257_v31, %s3526_s22 }
 0x821   :  { %v3370_v40 = vpop.eup %3369  ;;  %v1216_v37 = vadd.f32 1.0, %v3368_v58 }
 0x822   :  { %v1288_v28 = vadd.f32 1.0, %v3370_v40 }
 0x823   :  { %3371 = vrcp.f32 %v1216_v37  ;;  %v1243_v59 = vand.u32 2147483648, %v1216_v37  ;;  %v1241_v45 = vand.u32 2147483647, %v1216_v37  ;;  %vm1237_vm4 = vweird.f32 %v1216_v37 }
 0x824   :  { %3373 = vrcp.f32 %v1288_v28  ;;  %v1315_v49 = vand.u32 2147483648, %v1288_v28  ;;  %v1313_v2 = vand.u32 2147483647, %v1288_v28  ;;  %vm1309_vm2 = vweird.f32 %v1288_v28 }
 0x825   :  { %v4210_v1 = vpop.f32.mrf.mxu2  ;;  %v1244_v51 = vor.u32 1.1754944e-38, %v1243_v59  ;;  %vm1242_vm6 = vcmp.eq.f32.partialorder %v1241_v45, 8.507059e+37 }
 0x826   :  { %v1316_v40 = vor.u32 1.1754944e-38, %v1315_v49  ;;  %vm1314_vm9 = vcmp.eq.f32.partialorder %v1313_v2, 8.507059e+37 }
 0x828   :  { %v1334_v57 = vpop.permute.xlu2 %1333 }
 0x829   :  { %v3372_v10 = vpop.eup %3371  ;;  %v4213_v55 = vadd.f32 %v1334_v57, %v4152_v34 }
 0x82a   :  { %v3374_v5 = vpop.eup %3373  ;;  %v1233_v56 = vmul.f32 %v3372_v10, %v1216_v37  ;;  %vm1238_vm1 = vweird.f32 %v3372_v10  ;;  %v1326_v37 = vpop.permute.xlu0 %1325 }
 0x82b   :  { %v1305_v54 = vmul.f32 %v3374_v5, %v1288_v28  ;;  %v1413_v47 = vmul.f32 %v4218_v35, %v4213_v55  ;;  %vm1310_vm3 = vweird.f32 %v3374_v5  ;;  %vm1239_vm5 = vmor %vm1237_vm4, %vm1238_vm1  ;;  %v4230_v28 = vpop.f32.mrf.mxu1 }
 0x82c   :  { %v1234_v29 = vsub.f32 1.0, %v1233_v56  ;;  %vm1311_vm8 = vmor %vm1309_vm2, %vm1310_vm3  ;;  %v1254_v56 = vpop.permute.xlu1 %1253 }
 0x82d   :  { %v1306_v3 = vsub.f32 1.0, %v1305_v54  ;;  %1417 = vrot.lane.b32.xlu2 %v1413_v47, %s3525_s15  ;;  %v4223_v26 = vpop.f32.mrf.mxu2 }
 0x82e   :  { %v1235_v20 = vmul.f32 %v3372_v10, %v1234_v29  ;;  %v2335_v47 = vsub.f32 %v4198_v44, %v4223_v26  ;;  %v1671_v45 = vadd.f32 %v3899_v27, %v4223_v26 }
 0x82f   :  { %v1307_v62 = vmul.f32 %v3374_v5, %v1306_v3 }
 0x830   :  { %v1236_v61 = vadd.f32 %v3372_v10, %v1235_v20 }
 0x831   :  { %v1308_v31 = vadd.f32 %v3374_v5, %v1307_v62 }
 0x832   :  { %v1240_v58 = vsel %vm1239_vm5, %v3372_v10, %v1236_v61  ;;  %v1463_v10 = vsub.f32 %v4213_v55, %v4230_v28 }
 0x833   :  { %v1245_v57 = vsel %vm1242_vm6, %v1244_v51, %v1240_v58  ;;  %v1312_v54 = vsel %vm1311_vm8, %v3374_v5, %v1308_v31  ;;  %v4238_v5 = vld [vmem:[%s4912_s4 + $0x1] ss:$0 sm:$0xff]  ;;  %v375_v58 = vadd.f32 %v3685_v53, %v4230_v28 }
 0x834   :  { %v1258_v29 = vmul.f32 %v1254_v56, %v1245_v57  ;;  %v1317_v3 = vsel %vm1314_vm9, %v1316_v40, %v1312_v54  ;;  %v1341_v59 = vmul.f32 %v4238_v5, %v4213_v55 }
 0x835   :  { %v1330_v20 = vmul.f32 %v1326_v37, %v1317_v3  ;;  %2340 = vrot.lane.b32.xlu2 %v2335_v47, %s3525_s15 }
 0x836   :  { %1263 = vrot.lane.b32.xlu1 %v1258_v29, %s3526_s22 }
 0x837   :  { %1335 = vrot.lane.b32.xlu0 %v1330_v20, %s3527_s23 }
 0x83d   :  { %1467 = vrot.lane.b32.xlu2 %v1463_v10, %s3525_s15 }
 0x83f   :  { %1345 = vrot.lane.b32.xlu0 %v1341_v59, %s3526_s22 }
 0x871   :  { %v2291_v49 = vpop.permute.xlu2 %2290 }
 0x872   :  { %v2295_v62 = vadd.f32 %v2291_v49, %v1671_v45 }
 0x874   :  { %v3187_v2 = vmul.f32 -1.442695, %v2295_v62 }
 0x876   :  { %3375 = vpow2.f32 %v3187_v2 }
 0x87c   :  { %v3376_v61 = vpop.eup %3375 }
 0x87d   :  { %v2303_v51 = vadd.f32 1.0, %v3376_v61 }
 0x87f   :  { %3377 = vrcp.f32 %v2303_v51  ;;  %v2330_v47 = vand.u32 2147483648, %v2303_v51  ;;  %v2328_v37 = vand.u32 2147483647, %v2303_v51  ;;  %vm2324_vm11 = vweird.f32 %v2303_v51 }
 0x881   :  { %v2331_v10 = vor.u32 1.1754944e-38, %v2330_v47  ;;  %vm2329_vm13 = vcmp.eq.f32.partialorder %v2328_v37, 8.507059e+37 }
 0x885   :  { %v3378_v31 = vpop.eup %3377 }
 0x886   :  { %v2320_v40 = vmul.f32 %v3378_v31, %v2303_v51  ;;  %vm2325_vm10 = vweird.f32 %v3378_v31 }
 0x887   :  { %v1418_v57 = vpop.permute.xlu2 %1417  ;;  %vm2326_vm12 = vmor %vm2324_vm11, %vm2325_vm10 }
 0x888   :  { %v1423_v56 = vadd.f32 %v1418_v57, %v375_v58  ;;  %v2321_v54 = vsub.f32 1.0, %v2320_v40 }
 0x88a   :  { %v3140_v29 = vmul.f32 -1.442695, %v1423_v56  ;;  %v2322_v3 = vmul.f32 %v3378_v31, %v2321_v54 }
 0x88c   :  { %3379 = vpow2.f32 %v3140_v29  ;;  %v2323_v20 = vadd.f32 %v3378_v31, %v2322_v3 }
 0x88e   :  { %v2327_v59 = vsel %vm2326_vm12, %v3378_v31, %v2323_v20 }
 0x88f   :  { %v2341_v45 = vpop.permute.xlu2 %2340  ;;  %v2332_v49 = vsel %vm2329_vm13, %v2331_v10, %v2327_v59 }
 0x890   :  { %v2345_v62 = vmul.f32 %v2341_v45, %v2332_v49 }
 0x892   :  { %v3380_v2 = vpop.eup %3379  ;;  %2350 = vrot.lane.b32.xlu2 %v2345_v62, %s3527_s23  ;;  %v2205_v61 = vpop.permute.xlu1 %2204 }
 0x893   :  { %v1431_v58 = vadd.f32 1.0, %v3380_v2  ;;  %v4249_v40 = vadd.f32 %v2205_v61, %v4140_v4  ;;  %v1262_v3 = vpop.permute.xlu0 %1261 }
 0x894   :  { %v4256_v2 = vadd.f32 %v1262_v3, %v3869_v19  ;;  %v1391_v19 = vsub.f32 %v4213_v55, %v4014_v7 }
 0x895   :  { %3381 = vrcp.f32 %v1431_v58  ;;  %v2284_v57 = vmul.f32 %v4135_v21, %v4249_v40  ;;  %v1444_v54 = vand.u32 2147483648, %v1431_v58  ;;  %v1442_v29 = vand.u32 2147483647, %v1431_v58 }
 0x896   :  { %vm1438_vm15 = vweird.f32 %v1431_v58 }
 0x897   :  { %2288 = vrot.lane.b32.xlu1 %v2284_v57, %s3525_s15  ;;  %v1445_v20 = vor.u32 1.1754944e-38, %v1444_v54  ;;  %vm1443_vm1 = vcmp.eq.f32.partialorder %v1442_v29, 8.507059e+37  ;;  %v1468_v45 = vpop.permute.xlu2 %1467  ;;  %v4275_v54 = vpop.f32.mrf.mxu1 }
 0x89b   :  { %v3382_v51 = vpop.eup %3381 }
 0x89c   :  { %v1434_v31 = vmul.f32 %v3382_v51, %v1431_v58  ;;  %vm1439_vm14 = vweird.f32 %v3382_v51 }
 0x89d   :  { %vm1440_vm0 = vmor %vm1438_vm15, %vm1439_vm14 }
 0x89e   :  { %v1435_v56 = vsub.f32 1.0, %v1434_v31 }
 0x8a0   :  { %v1436_v47 = vmul.f32 %v3382_v51, %v1435_v56 }
 0x8a2   :  { %v1437_v37 = vadd.f32 %v3382_v51, %v1436_v47 }
 0x8a4   :  { %v1441_v10 = vsel %vm1440_vm0, %v3382_v51, %v1437_v37 }
 0x8a5   :  { %v1446_v59 = vsel %vm1443_vm1, %v1445_v20, %v1441_v10  ;;  %v395_v20 = vadd.f32 %v3738_v0, %v4152_v34 }
 0x8a6   :  { %v1473_v49 = vmul.f32 %v1468_v45, %v1446_v59 }
 0x8a8   :  { %1477 = vrot.lane.b32.xlu2 %v1473_v49, %s3527_s23  ;;  %v1264_v62 = vpop.permute.xlu1 %1263 }
 0x8a9   :  { %v4259_v61 = vadd.f32 %v1264_v62, %v3880_v23  ;;  %v1336_v57 = vpop.permute.xlu0 %1335  ;;  %v2334_v23 = vsub.f32 %v4249_v40, %v4210_v1 }
 0x8aa   :  { %v1340_v31 = vadd.f32 %v1336_v57, %v4185_v48 }
 0x8ab   :  { %v1562_v58 = vpack.c.bf16 %v4259_v61, %v4256_v2 }
 0x8ac   :  { %v1414_v51 = vmul.f32 %v4218_v35, %v1340_v31  ;;  %v1342_v56 = vmul.f32 %v4238_v5, %v1340_v31  ;;  %v1464_v35 = vsub.f32 %v1340_v31, %v4275_v54  ;;  %v1392_v47 = vsub.f32 %v1340_v31, %v4017_v8 }
 0x8ad   :  { %3161 = vmatmul.msk.bf16.gmra.mxu2 %vm281_vm7, %v1562_v58  ;;  %v1670_v31 = vadd.f32 %v3899_v27, %v4210_v1 }
 0x8ae   :  { %1419 = vrot.lane.b32.xlu0 %v1414_v51, %s3525_s15  ;;  %1347 = vrot.lane.b32.xlu1 %v1342_v56, %s3526_s22 }
 0x8b1   :  { %v1346_v37 = vpop.permute.xlu0 %1345 }
 0x8b2   :  { %v1351_v10 = vadd.f32 %v1346_v37, %v395_v20  ;;  %v396_v37 = vadd.f32 %v3738_v0, %v4185_v48  ;;  %v376_v20 = vadd.f32 %v3685_v53, %v4275_v54 }
 0x8b4   :  { %v3138_v59 = vmul.f32 -1.442695, %v1351_v10 }
 0x8b6   :  { %1395 = vrot.lane.b32.xlu0 %v1391_v19, %s3526_s22  ;;  %2338 = vrot.lane.b32.xlu1 %v2334_v23, %s3525_s15  ;;  %3383 = vpow2.f32 %v3138_v59 }
 0x8bc   :  { %v3384_v62 = vpop.eup %3383 }
 0x8bd   :  { %v1359_v57 = vadd.f32 1.0, %v3384_v62 }
 0x8be   :  { %1469 = vrot.lane.b32.xlu0 %v1464_v35, %s3525_s15  ;;  %1397 = vrot.lane.b32.xlu1 %v1392_v47, %s3526_s22 }
 0x8bf   :  { %3385 = vrcp.f32 %v1359_v57  ;;  %vm1366_vm3 = vweird.f32 %v1359_v57 }
 0x8c5   :  { %v3386_v56 = vpop.eup %3385 }
 0x8c6   :  { %v1362_v23 = vmul.f32 %v3386_v56, %v1359_v57  ;;  %vm1367_vm4 = vweird.f32 %v3386_v56 }
 0x8c7   :  { %vm1368_vm2 = vmor %vm1366_vm3, %vm1367_vm4 }
 0x8c8   :  { %v1363_v47 = vsub.f32 1.0, %v1362_v23  ;;  %v1370_v23 = vand.u32 2147483647, %v1359_v57 }
 0x8ca   :  { %vm1371_vm10 = vcmp.eq.f32.partialorder %v1370_v23, 8.507059e+37 }
 0x8ec   :  { %v2351_v29 = vpop.permute.xlu2 %2350 }
 0x8ed   :  { %v4282_v55 = vadd.f32 %v2351_v29, %v4223_v26  ;;  %v1364_v29 = vmul.f32 %v3386_v56, %v1363_v47  ;;  %v1372_v47 = vand.u32 2147483648, %v1359_v57 }
 0x8ef   :  { %v2429_v3 = vmul.f32 %v4135_v21, %v4282_v55 }
 0x8f1   :  { %2434 = vrot.lane.b32.xlu2 %v2429_v3, %s3525_s15 }
 0x902   :  { %v1478_v45 = vpop.permute.xlu2 %1477 }
 0x903   :  { %v4290_v49 = vadd.f32 %v1478_v45, %v4230_v28 }
 0x905   :  { %2860 = vst.msk [vmem:[%s4915_s8] sm:$0xff] %vm281_vm7, %v4290_v49 }
 0x909   :  { %v2289_v58 = vpop.permute.xlu1 %2288 }
 0x90a   :  { %v2294_v34 = vadd.f32 %v2289_v58, %v1670_v31 }
 0x90c   :  { %v3186_v51 = vmul.f32 -1.442695, %v2294_v34  ;;  %v1365_v34 = vadd.f32 %v3386_v56, %v1364_v29 }
 0x90e   :  { %3387 = vpow2.f32 %v3186_v51  ;;  %v1369_v48 = vsel %vm1368_vm2, %v3386_v56, %v1365_v34 }
 0x914   :  { %v3388_v19 = vpop.eup %3387 }
 0x915   :  { %v2302_v35 = vadd.f32 1.0, %v3388_v19 }
 0x917   :  { %3389 = vrcp.f32 %v2302_v35  ;;  %v2313_v51 = vand.u32 2147483647, %v2302_v35  ;;  %v2315_v19 = vand.u32 2147483648, %v2302_v35  ;;  %vm2309_vm6 = vweird.f32 %v2302_v35 }
 0x919   :  { %v2316_v46 = vor.u32 1.1754944e-38, %v2315_v19  ;;  %vm2314_vm9 = vcmp.eq.f32.partialorder %v2313_v51, 8.507059e+37 }
 0x91d   :  { %v3390_v3 = vpop.eup %3389 }
 0x91e   :  { %v2305_v10 = vmul.f32 %v3390_v3, %v2302_v35  ;;  %vm2310_vm5 = vweird.f32 %v3390_v3 }
 0x91f   :  { %vm2311_vm8 = vmor %vm2309_vm6, %vm2310_vm5 }
 0x920   :  { %v1348_v59 = vpop.permute.xlu1 %1347  ;;  %v1420_v45 = vpop.permute.xlu0 %1419  ;;  %v2306_v58 = vsub.f32 1.0, %v2305_v10 }
 0x921   :  { %v1352_v62 = vadd.f32 %v1348_v59, %v396_v37  ;;  %v1424_v31 = vadd.f32 %v1420_v45, %v376_v20  ;;  %v1373_v37 = vor.u32 1.1754944e-38, %v1372_v47 }
 0x922   :  { %v2307_v63 = vmul.f32 %v3390_v3, %v2306_v58 }
 0x923   :  { %v3139_v16 = vmul.f32 -1.442695, %v1352_v62  ;;  %v3141_v11 = vmul.f32 -1.442695, %v1424_v31  ;;  %v1374_v59 = vsel %vm1371_vm10, %v1373_v37, %v1369_v48 }
 0x924   :  { %v2308_v53 = vadd.f32 %v3390_v3, %v2307_v63 }
 0x925   :  { %3391 = vpow2.f32 %v3139_v16 }
 0x926   :  { %3393 = vpow2.f32 %v3141_v11  ;;  %v2312_v20 = vsel %vm2311_vm8, %v3390_v3, %v2308_v53 }
 0x927   :  { %v2317_v29 = vsel %vm2314_vm9, %v2316_v46, %v2312_v20 }
 0x928   :  { %v2339_v10 = vpop.permute.xlu1 %2338  ;;  %v1396_v57 = vpop.permute.xlu0 %1395 }
 0x929   :  { %v2344_v45 = vmul.f32 %v2339_v10, %v2317_v29  ;;  %v1401_v62 = vmul.f32 %v1396_v57, %v1374_v59 }
 0x92b   :  { %v3392_v31 = vpop.eup %3391  ;;  %2348 = vrot.lane.b32.xlu1 %v2344_v45, %s3527_s23  ;;  %1405 = vrot.lane.b32.xlu0 %v1401_v62, %s3526_s22 }
 0x92c   :  { %v3394_v16 = vpop.eup %3393  ;;  %v1360_v63 = vadd.f32 1.0, %v3392_v31 }
 0x92d   :  { %v1432_v11 = vadd.f32 1.0, %v3394_v16 }
 0x92e   :  { %3395 = vrcp.f32 %v1360_v63  ;;  %v1387_v34 = vand.u32 2147483648, %v1360_v63  ;;  %v1385_v23 = vand.u32 2147483647, %v1360_v63  ;;  %vm1381_vm13 = vweird.f32 %v1360_v63 }
 0x92f   :  { %3397 = vrcp.f32 %v1432_v11  ;;  %v1459_v47 = vand.u32 2147483648, %v1432_v11  ;;  %v1457_v48 = vand.u32 2147483647, %v1432_v11  ;;  %vm1453_vm15 = vweird.f32 %v1432_v11 }
 0x930   :  { %v1388_v20 = vor.u32 1.1754944e-38, %v1387_v34  ;;  %vm1386_vm0 = vcmp.eq.f32.partialorder %v1385_v23, 8.507059e+37  ;;  %v1398_v45 = vpop.permute.xlu1 %1397 }
 0x931   :  { %v1460_v59 = vor.u32 1.1754944e-38, %v1459_v47  ;;  %vm1458_vm3 = vcmp.eq.f32.partialorder %v1457_v48, 8.507059e+37 }
 0x934   :  { %v3396_v56 = vpop.eup %3395 }
 0x935   :  { %v3398_v35 = vpop.eup %3397  ;;  %v1377_v3 = vmul.f32 %v3396_v56, %v1360_v63  ;;  %vm1382_vm11 = vweird.f32 %v3396_v56  ;;  %v4307_v63 = vpop.f32.mrf.mxu2 }
 0x936   :  { %v1449_v58 = vmul.f32 %v3398_v35, %v1432_v11  ;;  %vm1454_vm12 = vweird.f32 %v3398_v35  ;;  %vm1383_vm14 = vmor %vm1381_vm13, %vm1382_vm11  ;;  %v1485_v11 = vmul.f32 %v4238_v5, %v4290_v49 }
 0x937   :  { %v1378_v46 = vsub.f32 1.0, %v1377_v3  ;;  %vm1455_vm1 = vmor %vm1453_vm15, %vm1454_vm12  ;;  %v1470_v3 = vpop.permute.xlu0 %1469 }
 0x938   :  { %v1450_v51 = vsub.f32 1.0, %v1449_v58 }
 0x939   :  { %v1379_v19 = vmul.f32 %v3396_v56, %v1378_v46 }
 0x93a   :  { %v1451_v53 = vmul.f32 %v3398_v35, %v1450_v51 }
 0x93b   :  { %v1380_v37 = vadd.f32 %v3396_v56, %v1379_v19 }
 0x93c   :  { %v1452_v29 = vadd.f32 %v3398_v35, %v1451_v53 }
 0x93d   :  { %v1384_v10 = vsel %vm1383_vm14, %v3396_v56, %v1380_v37  ;;  %v4312_v56 = vpop.f32.mrf.mxu2 }
 0x93e   :  { %v1389_v57 = vsel %vm1386_vm0, %v1388_v20, %v1384_v10  ;;  %v1456_v62 = vsel %vm1455_vm1, %v3398_v35, %v1452_v29  ;;  %v2479_v35 = vsub.f32 %v4282_v55, %v4312_v56  ;;  %v1673_v34 = vadd.f32 %v3899_v27, %v4312_v56 }
 0x93f   :  { %v1402_v31 = vmul.f32 %v1398_v45, %v1389_v57  ;;  %v1461_v16 = vsel %vm1458_vm3, %v1460_v59, %v1456_v62 }
 0x940   :  { %v1474_v58 = vmul.f32 %v1470_v3, %v1461_v16 }
 0x941   :  { %1407 = vrot.lane.b32.xlu1 %v1402_v31, %s3526_s22 }
 0x942   :  { %1479 = vrot.lane.b32.xlu0 %v1474_v58, %s3527_s23 }
 0x94a   :  { %1489 = vrot.lane.b32.xlu0 %v1485_v11, %s3526_s22 }
 0x94b   :  { %v2435_v46 = vpop.permute.xlu2 %2434 }
 0x94c   :  { %v2439_v51 = vadd.f32 %v2435_v46, %v1673_v34  ;;  %v1535_v46 = vsub.f32 %v4290_v49, %v4088_v13 }
 0x94e   :  { %v3191_v19 = vmul.f32 -1.442695, %v2439_v51 }
 0x950   :  { %3399 = vpow2.f32 %v3191_v19 }
 0x952   :  { %2484 = vrot.lane.b32.xlu0 %v2479_v35, %s3525_s15 }
 0x956   :  { %v3400_v37 = vpop.eup %3399 }
 0x957   :  { %v2447_v20 = vadd.f32 1.0, %v3400_v37 }
 0x959   :  { %3401 = vrcp.f32 %v2447_v20  ;;  %v2474_v51 = vand.u32 2147483648, %v2447_v20  ;;  %vm2468_vm5 = vweird.f32 %v2447_v20  ;;  %v2472_v19 = vand.u32 2147483647, %v2447_v20 }
 0x95b   :  { %vm2473_vm6 = vcmp.eq.f32.partialorder %v2472_v19, 8.507059e+37 }
 0x95f   :  { %v3402_v10 = vpop.eup %3401 }
 0x960   :  { %v2464_v57 = vmul.f32 %v3402_v10, %v2447_v20  ;;  %vm2469_vm4 = vweird.f32 %v3402_v10  ;;  %v1672_v20 = vadd.f32 %v3899_v27, %v4307_v63 }
 0x961   :  { %vm2470_vm2 = vmor %vm2468_vm5, %vm2469_vm4 }
 0x99d   :  { %v2349_v23 = vpop.permute.xlu1 %2348  ;;  %v1406_v29 = vpop.permute.xlu0 %1405 }
 0x99e   :  { %v4320_v47 = vadd.f32 %v2349_v23, %v4210_v1  ;;  %v4329_v45 = vadd.f32 %v1406_v29, %v4014_v7  ;;  %v2465_v7 = vsub.f32 1.0, %v2464_v57  ;;  %v2475_v23 = vor.u32 1.1754944e-38, %v2474_v51 }
 0x99f   :  { %v397_v29 = vadd.f32 %v3738_v0, %v4230_v28  ;;  %v398_v51 = vadd.f32 %v3738_v0, %v4275_v54 }
 0x9a0   :  { %v2478_v53 = vsub.f32 %v4320_v47, %v4307_v63  ;;  %v2428_v48 = vmul.f32 %v4135_v21, %v4320_v47 }
 0x9a2   :  { %2482 = vrot.lane.b32.xlu2 %v2478_v53, %s3525_s15  ;;  %2432 = vrot.lane.b32.xlu1 %v2428_v48, %s3525_s15 }
 0x9b3   :  { %v1408_v59 = vpop.permute.xlu1 %1407 }
 0x9b4   :  { %v4332_v62 = vadd.f32 %v1408_v59, %v4017_v8  ;;  %v1480_v31 = vpop.permute.xlu0 %1479  ;;  %v2466_v8 = vmul.f32 %v3402_v10, %v2465_v7 }
 0x9b5   :  { %v1484_v16 = vadd.f32 %v1480_v31, %v4275_v54 }
 0x9b6   :  { %v1563_v3 = vpack.c.bf16 %v4332_v62, %v4329_v45  ;;  %v2467_v34 = vadd.f32 %v3402_v10, %v2466_v8 }
 0x9b7   :  { %2861 = vst.msk [vmem:[%s4915_s8 + $0x8] sm:$0xff] %vm281_vm7, %v1484_v16  ;;  %v1536_v58 = vsub.f32 %v1484_v16, %v4095_v60  ;;  %v1486_v11 = vmul.f32 %v4238_v5, %v1484_v16 }
 0x9b8   :  { %3162 = vmatmul.msk.bf16.gmra.mxu2 %vm281_vm7, %v1563_v3  ;;  %v2471_v5 = vsel %vm2470_vm2, %v3402_v10, %v2467_v34 }
 0x9b9   :  { %1541 = vrot.lane.b32.xlu2 %v1536_v58, %s3526_s22  ;;  %1491 = vrot.lane.b32.xlu1 %v1486_v11, %s3526_s22  ;;  %v2476_v48 = vsel %vm2473_vm6, %v2475_v23, %v2471_v5 }
 0x9bc   :  { %v1490_v35 = vpop.permute.xlu0 %1489 }
 0x9bd   :  { %v1495_v49 = vadd.f32 %v1490_v35, %v397_v29 }
 0x9bf   :  { %v3142_v59 = vmul.f32 -1.442695, %v1495_v49 }
 0x9c1   :  { %1539 = vrot.lane.b32.xlu1 %v1535_v46, %s3526_s22  ;;  %3403 = vpow2.f32 %v3142_v59 }
 0x9c4   :  { %v2485_v53 = vpop.permute.xlu0 %2484 }
 0x9c5   :  { %v2489_v37 = vmul.f32 %v2485_v53, %v2476_v48 }
 0x9c7   :  { %v3404_v57 = vpop.eup %3403 }
 0x9c8   :  { %v1503_v31 = vadd.f32 1.0, %v3404_v57 }
 0x9c9   :  { %2494 = vrot.lane.b32.xlu1 %v2489_v37, %s3527_s23 }
 0x9ca   :  { %3405 = vrcp.f32 %v1503_v31  ;;  %v1516_v37 = vand.u32 2147483648, %v1503_v31  ;;  %vm1510_vm10 = vweird.f32 %v1503_v31  ;;  %v1514_v57 = vand.u32 2147483647, %v1503_v31 }
 0x9cc   :  { %v1517_v54 = vor.u32 1.1754944e-38, %v1516_v37  ;;  %vm1515_vm15 = vcmp.eq.f32.partialorder %v1514_v57, 8.507059e+37 }
 0x9d0   :  { %v3406_v58 = vpop.eup %3405 }
 0x9d1   :  { %v1506_v8 = vmul.f32 %v3406_v58, %v1503_v31  ;;  %vm1511_vm8 = vweird.f32 %v3406_v58 }
 0x9d2   :  { %vm1512_vm11 = vmor %vm1510_vm10, %vm1511_vm8 }
 0x9d3   :  { %v1507_v46 = vsub.f32 1.0, %v1506_v8 }
 0x9d5   :  { %v1508_v35 = vmul.f32 %v3406_v58, %v1507_v46 }
 0x9d7   :  { %v1509_v53 = vadd.f32 %v3406_v58, %v1508_v35 }
 0xa14   :  { %v2433_v16 = vpop.permute.xlu1 %2432 }
 0xa15   :  { %v2438_v10 = vadd.f32 %v2433_v16, %v1672_v20  ;;  %v1513_v16 = vsel %vm1512_vm11, %v3406_v58, %v1509_v53 }
 0xa16   :  { %v1518_v46 = vsel %vm1515_vm15, %v1517_v54, %v1513_v16 }
 0xa17   :  { %v3190_v3 = vmul.f32 -1.442695, %v2438_v10 }
 0xa19   :  { %3407 = vpow2.f32 %v3190_v3  ;;  %v2483_v3 = vpop.permute.xlu2 %2482 }
 0xa1f   :  { %v3408_v11 = vpop.eup %3407 }
 0xa20   :  { %v2446_v7 = vadd.f32 1.0, %v3408_v11 }
 0xa21   :  { %v1542_v57 = vpop.permute.xlu2 %1541 }
 0xa22   :  { %3409 = vrcp.f32 %v2446_v7  ;;  %v2459_v48 = vand.u32 2147483648, %v2446_v7  ;;  %v2457_v49 = vand.u32 2147483647, %v2446_v7  ;;  %vm2453_vm12 = vweird.f32 %v2446_v7 }
 0xa24   :  { %v2460_v0 = vor.u32 1.1754944e-38, %v2459_v48  ;;  %vm2458_vm14 = vcmp.eq.f32.partialorder %v2457_v49, 8.507059e+37 }
 0xa28   :  { %v3410_v28 = vpop.eup %3409 }
 0xa29   :  { %v2449_v34 = vmul.f32 %v3410_v28, %v2446_v7  ;;  %vm2454_vm9 = vweird.f32 %v3410_v28 }
 0xa2a   :  { %vm2455_vm13 = vmor %vm2453_vm12, %vm2454_vm9 }
 0xa2b   :  { %v2450_v19 = vsub.f32 1.0, %v2449_v34  ;;  %v1492_v5 = vpop.permute.xlu1 %1491 }
 0xa2c   :  { %v1496_v23 = vadd.f32 %v1492_v5, %v398_v51 }
 0xa2d   :  { %v2451_v29 = vmul.f32 %v3410_v28, %v2450_v19 }
 0xa2e   :  { %v3143_v59 = vmul.f32 -1.442695, %v1496_v23 }
 0xa2f   :  { %v2452_v20 = vadd.f32 %v3410_v28, %v2451_v29 }
 0xa30   :  { %3411 = vpow2.f32 %v3143_v59 }
 0xa31   :  { %v2456_v10 = vsel %vm2455_vm13, %v3410_v28, %v2452_v20 }
 0xa32   :  { %v2461_v11 = vsel %vm2458_vm14, %v2460_v0, %v2456_v10 }
 0xa33   :  { %v1540_v8 = vpop.permute.xlu1 %1539  ;;  %v2488_v35 = vmul.f32 %v2483_v3, %v2461_v11  ;;  %v4375_v3 = vld [vmem:[%s4912_s4 + $0x2] ss:$0 sm:$0xff] }
 0xa34   :  { %v1545_v34 = vmul.f32 %v1540_v8, %v1518_v46 }
 0xa35   :  { %2492 = vrot.lane.b32.xlu0 %v2488_v35, %s3527_s23 }
 0xa36   :  { %v3412_v31 = vpop.eup %3411  ;;  %1549 = vrot.lane.b32.xlu2 %v1545_v34, %s3526_s22 }
 0xa37   :  { %v1504_v7 = vadd.f32 1.0, %v3412_v31 }
 0xa39   :  { %3413 = vrcp.f32 %v1504_v7  ;;  %v1531_v53 = vand.u32 2147483648, %v1504_v7  ;;  %v1529_v37 = vand.u32 2147483647, %v1504_v7  ;;  %vm1525_vm1 = vweird.f32 %v1504_v7 }
 0xa3b   :  { %v2495_v58 = vpop.permute.xlu1 %2494  ;;  %v1532_v49 = vor.u32 1.1754944e-38, %v1531_v53  ;;  %vm1530_vm4 = vcmp.eq.f32.partialorder %v1529_v37, 8.507059e+37 }
 0xa3c   :  { %v4359_v51 = vadd.f32 %v2495_v58, %v4312_v56 }
 0xa3e   :  { %v2573_v28 = vmul.f32 %v4135_v21, %v4359_v51  ;;  %v4365_v21 = vpop.f32.mrf.mxu2 }
 0xa3f   :  { %v3414_v19 = vpop.eup %3413 }
 0xa40   :  { %v1521_v5 = vmul.f32 %v3414_v19, %v1504_v7  ;;  %2578 = vrot.lane.b32.xlu2 %v2573_v28, %s3525_s15  ;;  %vm1526_vm0 = vweird.f32 %v3414_v19 }
 0xa41   :  { %vm1527_vm3 = vmor %vm1525_vm1, %vm1526_vm0 }
 0xa42   :  { %v1522_v23 = vsub.f32 1.0, %v1521_v5 }
 0xa44   :  { %v1523_v48 = vmul.f32 %v3414_v19, %v1522_v23 }
 0xa46   :  { %v1524_v29 = vadd.f32 %v3414_v19, %v1523_v48  ;;  %v4381_v8 = vpop.f32.mrf.mxu2 }
 0xa47   :  { %v2623_v46 = vsub.f32 %v4359_v51, %v4381_v8 }
 0xa48   :  { %v1528_v59 = vsel %vm1527_vm3, %v3414_v19, %v1524_v29  ;;  %v1675_v19 = vadd.f32 %v3899_v27, %v4381_v8 }
 0xa49   :  { %v1533_v20 = vsel %vm1530_vm4, %v1532_v49, %v1528_v59  ;;  %v1674_v49 = vadd.f32 %v3899_v27, %v4365_v21 }
 0xa4a   :  { %v1546_v16 = vmul.f32 %v1542_v57, %v1533_v20 }
 0xa4c   :  { %1551 = vrot.lane.b32.xlu0 %v1546_v16, %s3526_s22 }
 0xa90   :  { %v1550_v35 = vpop.permute.xlu2 %1549 }
 0xa91   :  { %v4387_v31 = vadd.f32 %v1550_v35, %v4088_v13 }
 0xa9a   :  { %v2579_v28 = vpop.permute.xlu2 %2578 }
 0xa9b   :  { %v2583_v5 = vadd.f32 %v2579_v28, %v1675_v19 }
 0xa9d   :  { %v3195_v23 = vmul.f32 -1.442695, %v2583_v5 }
 0xa9f   :  { %3415 = vpow2.f32 %v3195_v23 }
 0xaa5   :  { %v3416_v53 = vpop.eup %3415 }
 0xaa6   :  { %v2591_v48 = vadd.f32 1.0, %v3416_v53 }
 0xaa7   :  { %v2493_v0 = vpop.permute.xlu0 %2492 }
 0xaa8   :  { %v4368_v54 = vadd.f32 %v2493_v0, %v4307_v63  ;;  %3417 = vrcp.f32 %v2591_v48  ;;  %v2618_v16 = vand.u32 2147483648, %v2591_v48  ;;  %vm2612_vm2 = vweird.f32 %v2591_v48 }
 0xaaa   :  { %v2622_v10 = vsub.f32 %v4368_v54, %v4365_v21  ;;  %v2572_v11 = vmul.f32 %v4375_v3, %v4368_v54 }
 0xaac   :  { %2626 = vrot.lane.b32.xlu0 %v2622_v10, %s3525_s15  ;;  %2576 = vrot.lane.b32.xlu1 %v2572_v11, %s3525_s15  ;;  %v2616_v10 = vand.u32 2147483647, %v2591_v48 }
 0xaae   :  { %v3418_v13 = vpop.eup %3417  ;;  %vm2617_vm8 = vcmp.eq.f32.partialorder %v2616_v10, 8.507059e+37 }
 0xaaf   :  { %v2608_v37 = vmul.f32 %v3418_v13, %v2591_v48  ;;  %vm2613_vm5 = vweird.f32 %v3418_v13 }
 0xab0   :  { %vm2614_vm6 = vmor %vm2612_vm2, %vm2613_vm5 }
 0xab1   :  { %v2609_v29 = vsub.f32 1.0, %v2608_v37 }
 0xab4   :  { %2628 = vrot.lane.b32.xlu1 %v2623_v46, %s3525_s15  ;;  %v2619_v46 = vor.u32 1.1754944e-38, %v2618_v16 }
 0xabe   :  { %v1552_v34 = vpop.permute.xlu0 %1551 }
 0xabf   :  { %v4390_v7 = vadd.f32 %v1552_v34, %v4095_v60  ;;  %v2610_v60 = vmul.f32 %v3418_v13, %v2609_v29 }
 0xac1   :  { %v1564_v58 = vpack.c.bf16 %v4390_v7, %v4387_v31  ;;  %v2611_v20 = vadd.f32 %v3418_v13, %v2610_v60 }
 0xac3   :  { %3163 = vmatmul.msk.bf16.gmra.mxu2 %vm281_vm7, %v1564_v58  ;;  %v2615_v11 = vsel %vm2614_vm6, %v3418_v13, %v2611_v20 }
 0xac4   :  { %v2620_v35 = vsel %vm2617_vm8, %v2619_v46, %v2615_v11 }
 0xb1e   :  { %v2577_v59 = vpop.permute.xlu1 %2576 }
 0xb1f   :  { %v2582_v57 = vadd.f32 %v2577_v59, %v1674_v49 }
 0xb21   :  { %v3194_v0 = vmul.f32 -1.442695, %v2582_v57  ;;  %v2627_v57 = vpop.permute.xlu0 %2626 }
 0xb23   :  { %3419 = vpow2.f32 %v3194_v0 }
 0xb26   :  { %v2629_v34 = vpop.permute.xlu1 %2628 }
 0xb27   :  { %v2633_v58 = vmul.f32 %v2629_v34, %v2620_v35 }
 0xb29   :  { %v3420_v28 = vpop.eup %3419  ;;  %2638 = vrot.lane.b32.xlu0 %v2633_v58, %s3527_s23 }
 0xb2a   :  { %v2590_v19 = vadd.f32 1.0, %v3420_v28 }
 0xb2c   :  { %3421 = vrcp.f32 %v2590_v19  ;;  %v2603_v37 = vand.u32 2147483648, %v2590_v19  ;;  %v2601_v48 = vand.u32 2147483647, %v2590_v19  ;;  %vm2597_vm10 = vweird.f32 %v2590_v19 }
 0xb2e   :  { %v2604_v13 = vor.u32 1.1754944e-38, %v2603_v37  ;;  %vm2602_vm12 = vcmp.eq.f32.partialorder %v2601_v48, 8.507059e+37 }
 0xb32   :  { %v3422_v5 = vpop.eup %3421 }
 0xb33   :  { %v2593_v23 = vmul.f32 %v3422_v5, %v2590_v19  ;;  %vm2598_vm9 = vweird.f32 %v3422_v5 }
 0xb34   :  { %vm2599_vm11 = vmor %vm2597_vm10, %vm2598_vm9 }
 0xb35   :  { %v2594_v53 = vsub.f32 1.0, %v2593_v23  ;;  %v4430_v23 = vld [vmem:[%s4912_s4 + $0x3] ss:$0 sm:$0xff] }
 0xb37   :  { %v2595_v29 = vmul.f32 %v3422_v5, %v2594_v53  ;;  %v2501_v53 = vmul.f32 %v4430_v23, %v4359_v51 }
 0xb39   :  { %v2596_v60 = vadd.f32 %v3422_v5, %v2595_v29 }
 0xb3b   :  { %v2600_v49 = vsel %vm2599_vm11, %v3422_v5, %v2596_v60  ;;  %v3236_v5 = vld [vmem:[%s4911_s5 + $0x3] ss:$0 sm:$0xff] }
 0xb3c   :  { %v2605_v59 = vsel %vm2602_vm12, %v2604_v13, %v2600_v49 }
 0xb3d   :  { %v2632_v20 = vmul.f32 %v2627_v57, %v2605_v59 }
 0xb3f   :  { %2636 = vrot.lane.b32.xlu2 %v2632_v20, %s3527_s23 }
 0xb46   :  { %v4401_v16 = vpop.f32.mrf.mxu2 }
 0xb47   :  { %v1676_v57 = vadd.f32 %v3899_v27, %v4401_v16 }
 0xb4e   :  { %v4418_v28 = vpop.f32.mrf.mxu2 }
 0xb4f   :  { %v1677_v37 = vadd.f32 %v3899_v27, %v4418_v28 }
 0xb99   :  { %v2637_v0 = vpop.permute.xlu2 %2636 }
 0xb9a   :  { %v4404_v10 = vadd.f32 %v2637_v0, %v4365_v21 }
 0xb9b   :  { %v2639_v11 = vpop.permute.xlu0 %2638 }
 0xb9c   :  { %v4407_v46 = vadd.f32 %v2639_v11, %v4381_v8  ;;  %v2766_v35 = vsub.f32 %v4404_v10, %v4401_v16  ;;  %v2716_v34 = vmul.f32 %v4375_v3, %v4404_v10 }
 0xb9e   :  { %2770 = vrot.lane.b32.xlu0 %v2766_v35, %s3525_s15  ;;  %2720 = vrot.lane.b32.xlu1 %v2716_v34, %s3525_s15  ;;  %v2717_v58 = vmul.f32 %v4375_v3, %v4407_v46  ;;  %v2767_v19 = vsub.f32 %v4407_v46, %v4418_v28  ;;  %v2644_v3 = vmul.f32 %v4430_v23, %v4404_v10 }
 0xba0   :  { %2722 = vrot.lane.b32.xlu2 %v2717_v58, %s3525_s15 }
 0xba6   :  { %2772 = vrot.lane.b32.xlu1 %v2767_v19, %s3525_s15 }
 0xbae   :  { %1681 = vrot.lane.b32.xlu1 %v3236_v5, %s3526_s22 }
 0xbb6   :  { %2648 = vrot.lane.b32.xlu1 %v2644_v3, %s3526_s22 }
 0xbbe   :  { %2506 = vrot.lane.b32.xlu1 %v2501_v53, %s3526_s22 }
 0xbfa   :  { %v2723_v29 = vpop.permute.xlu2 %2722 }
 0xbfb   :  { %v2727_v48 = vadd.f32 %v2723_v29, %v1677_v37 }
 0xbfd   :  { %v3199_v60 = vmul.f32 -1.442695, %v2727_v48 }
 0xbff   :  { %3423 = vpow2.f32 %v3199_v60 }
 0xc05   :  { %v3424_v13 = vpop.eup %3423 }
 0xc06   :  { %v2735_v49 = vadd.f32 1.0, %v3424_v13 }
 0xc08   :  { %3425 = vrcp.f32 %v2735_v49  ;;  %v2762_v34 = vand.u32 2147483648, %v2735_v49  ;;  %v2760_v5 = vand.u32 2147483647, %v2735_v49  ;;  %vm2756_vm14 = vweird.f32 %v2735_v49 }
 0xc0a   :  { %v2763_v53 = vor.u32 1.1754944e-38, %v2762_v34  ;;  %vm2761_vm0 = vcmp.eq.f32.partialorder %v2760_v5, 8.507059e+37 }
 0xc0e   :  { %v3426_v59 = vpop.eup %3425 }
 0xc0f   :  { %v2752_v20 = vmul.f32 %v3426_v59, %v2735_v49  ;;  %vm2757_vm13 = vweird.f32 %v3426_v59 }
 0xc10   :  { %v2721_v0 = vpop.permute.xlu1 %2720  ;;  %vm2758_vm15 = vmor %vm2756_vm14, %vm2757_vm13 }
 0xc11   :  { %v2726_v11 = vadd.f32 %v2721_v0, %v1676_v57  ;;  %v2753_v35 = vsub.f32 1.0, %v2752_v20  ;;  %v2500_v57 = vmul.f32 %v4430_v23, %v4368_v54 }
 0xc13   :  { %v3198_v58 = vmul.f32 -1.442695, %v2726_v11  ;;  %v2754_v19 = vmul.f32 %v3426_v59, %v2753_v35 }
 0xc15   :  { %3427 = vpow2.f32 %v3198_v58  ;;  %v2755_v3 = vadd.f32 %v3426_v59, %v2754_v19 }
 0xc17   :  { %v2759_v37 = vsel %vm2758_vm15, %v3426_v59, %v2755_v3  ;;  %v2771_v3 = vpop.permute.xlu0 %2770 }
 0xc18   :  { %v2773_v29 = vpop.permute.xlu1 %2772  ;;  %v2764_v48 = vsel %vm2761_vm0, %v2763_v53, %v2759_v37  ;;  %v2645_v37 = vmul.f32 %v4430_v23, %v4407_v46 }
 0xc19   :  { %v2777_v60 = vmul.f32 %v2773_v29, %v2764_v48 }
 0xc1b   :  { %v3428_v27 = vpop.eup %3427  ;;  %2782 = vrot.lane.b32.xlu0 %v2777_v60, %s3527_s23 }
 0xc1c   :  { %v2734_v13 = vadd.f32 1.0, %v3428_v27 }
 0xc1e   :  { %3429 = vrcp.f32 %v2734_v13  ;;  %v2747_v11 = vand.u32 2147483648, %v2734_v13  ;;  %v2745_v59 = vand.u32 2147483647, %v2734_v13  ;;  %vm2741_vm3 = vweird.f32 %v2734_v13 }
 0xc20   :  { %v2748_v58 = vor.u32 1.1754944e-38, %v2747_v11  ;;  %vm2746_vm5 = vcmp.eq.f32.partialorder %v2745_v59, 8.507059e+37  ;;  %v2357_v11 = vmul.f32 %v4430_v23, %v4282_v55  ;;  %v2694_v59 = vsub.f32 %v4404_v10, %v4329_v45 }
 0xc21   :  { %v2695_v10 = vsub.f32 %v4407_v46, %v4332_v62  ;;  %v1781_v46 = vmul.f32 %v4430_v23, %v3950_v32 }
 0xc23   :  { %2504 = vrot.lane.b32.xlu0 %v2500_v57, %s3526_s22 }
 0xc24   :  { %v3430_v20 = vpop.eup %3429 }
 0xc25   :  { %v2737_v0 = vmul.f32 %v3430_v20, %v2734_v13  ;;  %vm2742_vm1 = vweird.f32 %v3430_v20 }
 0xc26   :  { %vm2743_vm4 = vmor %vm2741_vm3, %vm2742_vm1 }
 0xc27   :  { %v2738_v49 = vsub.f32 1.0, %v2737_v0  ;;  %v2213_v0 = vmul.f32 %v4430_v23, %v4198_v44 }
 0xc29   :  { %v2739_v35 = vmul.f32 %v3430_v20, %v2738_v49  ;;  %v2356_v49 = vmul.f32 %v4430_v23, %v4320_v47 }
 0xc2b   :  { %v2740_v34 = vadd.f32 %v3430_v20, %v2739_v35  ;;  %v2068_v35 = vmul.f32 %v4430_v23, %v4157_v25 }
 0xc2d   :  { %v2744_v19 = vsel %vm2743_vm4, %v3430_v20, %v2740_v34  ;;  %v2212_v34 = vmul.f32 %v4430_v23, %v4249_v40 }
 0xc2e   :  { %v2749_v5 = vsel %vm2746_vm5, %v2748_v58, %v2744_v19  ;;  %v2551_v19 = vsub.f32 %v4359_v51, %v4259_v61  ;;  %v2550_v51 = vsub.f32 %v4368_v54, %v4256_v2  ;;  %v2118_v54 = vsub.f32 %v4157_v25, %v3959_v30 }
 0xc2f   :  { %v2776_v53 = vmul.f32 %v2771_v3, %v2749_v5  ;;  %v2406_v5 = vsub.f32 %v4320_v47, %v4165_v18  ;;  %v2069_v3 = vmul.f32 %v4430_v23, %v4130_v22  ;;  %v1925_v47 = vmul.f32 %v4430_v23, %v4055_v43 }
 0xc30   :  { %v2263_v25 = vsub.f32 %v4198_v44, %v4080_v9 }
 0xc31   :  { %2780 = vrot.lane.b32.xlu2 %v2776_v53, %s3527_s23  ;;  %v1924_v53 = vmul.f32 %v4430_v23, %v4052_v39 }
 0xc39   :  { %2650 = vrot.lane.b32.xlu2 %v2645_v37, %s3526_s22  ;;  %v2407_v37 = vsub.f32 %v4282_v55, %v4168_v41  ;;  %v2119_v55 = vsub.f32 %v4130_v22, %v3963_v33 }
 0xc8b   :  { %v2781_v29 = vpop.permute.xlu2 %2780 }
 0xc8c   :  { %v2786_v48 = vadd.f32 %v2781_v29, %v4401_v16  ;;  %v1780_v29 = vmul.f32 %v4430_v23, %v3947_v24 }
 0xc8d   :  { %v2783_v60 = vpop.permute.xlu0 %2782 }
 0xc8e   :  { %v2788_v27 = vmul.f32 %v4430_v23, %v2786_v48  ;;  %v2838_v13 = vsub.f32 %v2786_v48, %v4387_v31  ;;  %2862 = vst.msk [vmem:[%s4915_s8 + $0x10] sm:$0xff] %vm281_vm7, %v2786_v48  ;;  %v2787_v57 = vadd.f32 %v2783_v60, %v4418_v28  ;;  %v2262_v48 = vsub.f32 %v4249_v40, %v4083_v15  ;;  %v4530_v60 = vpop.permute.xlu1 %1681 }
 0xc8f   :  { %v1974_v40 = vsub.f32 %v4052_v39, %v3861_v14  ;;  %v1695_v22 = vadd.f32 %v4530_v60, %v4312_v56  ;;  %v1694_v56 = vadd.f32 %v4530_v60, %v4307_v63 }
 0xc90   :  { %v2789_v20 = vmul.f32 %v4430_v23, %v2787_v57  ;;  %2863 = vst.msk [vmem:[%s4915_s8 + $0x18] sm:$0xff] %vm281_vm7, %v2787_v57  ;;  %2842 = vrot.lane.b32.xlu1 %v2838_v13, %s3526_s22  ;;  %2792 = vrot.lane.b32.xlu2 %v2788_v27, %s3526_s22  ;;  %v2839_v58 = vsub.f32 %v2787_v57, %v4390_v7 }
 0xc91   :  { %v1975_v23 = vsub.f32 %v4055_v43, %v3858_v12  ;;  %v1698_v43 = vadd.f32 %v4530_v60, %v4401_v16 }
 0xc92   :  { %2794 = vrot.lane.b32.xlu0 %v2789_v20, %s3526_s22  ;;  %v1697_v20 = vadd.f32 %v4530_v60, %v4381_v8 }
 0xc93   :  { %v2651_v27 = vpop.permute.xlu2 %2650 }
 0xc96   :  { %v2649_v44 = vpop.permute.xlu1 %2648 }
 0xc98   :  { %2218 = vrot.lane.b32.xlu1 %v2213_v0, %s3526_s22  ;;  %2360 = vrot.lane.b32.xlu2 %v2356_v49, %s3526_s22  ;;  %v2655_v49 = vadd.f32 %v2651_v27, %v1697_v20 }
 0xc9a   :  { %2362 = vrot.lane.b32.xlu0 %v2357_v11, %s3526_s22 }
 0xc9e   :  { %v2507_v13 = vpop.permute.xlu1 %2506 }
 0xc9f   :  { %v2511_v57 = vadd.f32 %v2507_v13, %v1695_v22 }
 0xca0   :  { %2072 = vrot.lane.b32.xlu1 %v2068_v35, %s3526_s22  ;;  %2698 = vrot.lane.b32.xlu2 %v2694_v59, %s3526_s22  ;;  %v3197_v59 = vmul.f32 -1.442695, %v2655_v49 }
 0xca1   :  { %v3193_v35 = vmul.f32 -1.442695, %v2511_v57 }
 0xca2   :  { %2216 = vrot.lane.b32.xlu0 %v2212_v34, %s3526_s22  ;;  %v1696_v34 = vadd.f32 %v4530_v60, %v4365_v21 }
 0xca8   :  { %2556 = vrot.lane.b32.xlu1 %v2551_v19, %s3526_s22  ;;  %2844 = vrot.lane.b32.xlu2 %v2839_v58, %s3526_s22  ;;  %v2505_v58 = vpop.permute.xlu0 %2504  ;;  %v2654_v19 = vadd.f32 %v2649_v44, %v1696_v34  ;;  %v1699_v44 = vadd.f32 %v4530_v60, %v4418_v28 }
 0xcaa   :  { %2700 = vrot.lane.b32.xlu0 %v2695_v10, %s3526_s22  ;;  %v2510_v10 = vadd.f32 %v2505_v58, %v1694_v56 }
 0xcb0   :  { %2410 = vrot.lane.b32.xlu1 %v2406_v5, %s3526_s22  ;;  %2074 = vrot.lane.b32.xlu2 %v2069_v3, %s3526_s22  ;;  %v3196_v3 = vmul.f32 -1.442695, %v2654_v19  ;;  %v1689_v19 = vadd.f32 %v4530_v60, %v4070_v38 }
 0xcb2   :  { %2554 = vrot.lane.b32.xlu0 %v2550_v51, %s3526_s22 }
 0xcb8   :  { %1786 = vrot.lane.b32.xlu1 %v1781_v46, %s3526_s22  ;;  %1928 = vrot.lane.b32.xlu2 %v1924_v53, %s3526_s22  ;;  %v3192_v46 = vmul.f32 -1.442695, %v2510_v10 }
 0xcba   :  { %1930 = vrot.lane.b32.xlu0 %v1925_v47, %s3526_s22 }
 0xcc0   :  { %2122 = vrot.lane.b32.xlu1 %v2118_v54, %s3526_s22  ;;  %2412 = vrot.lane.b32.xlu2 %v2407_v37, %s3526_s22 }
 0xcc2   :  { %1784 = vrot.lane.b32.xlu0 %v1780_v29, %s3526_s22 }
 0xcc8   :  { %2266 = vrot.lane.b32.xlu2 %v2262_v48, %s3526_s22 }
 0xcca   :  { %2268 = vrot.lane.b32.xlu0 %v2263_v25, %s3526_s22 }
 0xcd0   :  { %2124 = vrot.lane.b32.xlu2 %v2119_v55, %s3526_s22 }
 0xcd2   :  { %1980 = vrot.lane.b32.xlu0 %v1975_v23, %s3526_s22 }
 0xcd8   :  { %1978 = vrot.lane.b32.xlu2 %v1974_v40, %s3526_s22 }
 0xcea   :  { %v2793_v0 = vpop.permute.xlu2 %2792 }
 0xceb   :  { %v2798_v11 = vadd.f32 %v2793_v0, %v1698_v43  ;;  %v1692_v43 = vadd.f32 %v4530_v60, %v4210_v1 }
 0xced   :  { %v3200_v39 = vmul.f32 -1.442695, %v2798_v11 }
 0xcef   :  { %3431 = vpow2.f32 %v3200_v39 }
 0xcf0   :  { %3433 = vpow2.f32 %v3193_v35 }
 0xcf1   :  { %3435 = vpow2.f32 %v3197_v59 }
 0xcf2   :  { %v2361_v8 = vpop.permute.xlu2 %2360 }
 0xcf3   :  { %v2366_v39 = vadd.f32 %v2361_v8, %v1692_v43 }
 0xcf5   :  { %v3432_v16 = vpop.eup %3431  ;;  %v3188_v10 = vmul.f32 -1.442695, %v2366_v39 }
 0xcf6   :  { %v3434_v5 = vpop.eup %3433  ;;  %v2806_v51 = vadd.f32 1.0, %v3432_v16 }
 0xcf7   :  { %v3436_v53 = vpop.eup %3435  ;;  %v4546_v47 = vadd.f32 1.0, %v3434_v5 }
 0xcf8   :  { %3437 = vrcp.f32 %v2806_v51  ;;  %v4550_v54 = vadd.f32 1.0, %v3436_v53  ;;  %v2819_v23 = vand.u32 2147483648, %v2806_v51  ;;  %v2817_v57 = vand.u32 2147483647, %v2806_v51 }
 0xcf9   :  { %3439 = vpow2.f32 %v3196_v3  ;;  %vm2813_vm6 = vweird.f32 %v2806_v51  ;;  %v1691_v53 = vadd.f32 %v4530_v60, %v4147_v17  ;;  %v1830_v17 = vsub.f32 %v3947_v24, %v3764_v42 }
 0xcfa   :  { %v4548_v21 = vpop.permute.xlu2 %2698  ;;  %3441 = vpow2.f32 %v3192_v46  ;;  %v2820_v28 = vor.u32 1.1754944e-38, %v2819_v23  ;;  %vm2818_vm9 = vcmp.eq.f32.partialorder %v2817_v57, 8.507059e+37  ;;  %v1693_v46 = vadd.f32 %v4530_v60, %v4223_v26 }
 0xcfb   :  { %3443 = vrcp.f32 %v4546_v47  ;;  %v1688_v26 = vadd.f32 %v4530_v60, %v4063_v50  ;;  %vm2540_vm11 = vweird.f32 %v4546_v47  ;;  %vm2684_vm14 = vweird.f32 %v4550_v54 }
 0xcfc   :  { %3445 = vrcp.f32 %v4550_v54 }
 0xcfe   :  { %v3438_v63 = vpop.eup %3437 }
 0xcff   :  { %v2809_v37 = vmul.f32 %v3438_v63, %v2806_v51  ;;  %v3440_v29 = vpop.eup %3439  ;;  %vm2814_vm2 = vweird.f32 %v3438_v63 }
 0xd00   :  { %v3442_v48 = vpop.eup %3441  ;;  %v4560_v13 = vadd.f32 1.0, %v3440_v29  ;;  %vm2815_vm8 = vmor %vm2813_vm6, %vm2814_vm2 }
 0xd01   :  { %v2810_v25 = vsub.f32 1.0, %v2809_v37  ;;  %v4558_v27 = vpop.eup %3443  ;;  %v4562_v20 = vadd.f32 1.0, %v3442_v48 }
 0xd02   :  { %v2843_v55 = vpop.permute.xlu1 %2842  ;;  %v4554_v40 = vpop.permute.xlu2 %2844  ;;  %v2536_v59 = vmul.f32 %v4558_v27, %v4546_v47  ;;  %3447 = vrcp.f32 %v4560_v13  ;;  %vm2541_vm10 = vweird.f32 %v4558_v27  ;;  %vm2669_vm4 = vweird.f32 %v4560_v13 }
 0xd03   :  { %v2811_v22 = vmul.f32 %v3438_v63, %v2810_v25  ;;  %v4566_v35 = vpop.eup %3445  ;;  %3449 = vrcp.f32 %v4562_v20  ;;  %vm4612_vm12 = vmor %vm2540_vm11, %vm2541_vm10  ;;  %vm2525_vm3 = vweird.f32 %v4562_v20 }
 0xd04   :  { %v2795_v0 = vpop.permute.xlu0 %2794  ;;  %v2680_v8 = vmul.f32 %v4566_v35, %v4550_v54  ;;  %v2537_v3 = vsub.f32 1.0, %v2536_v59  ;;  %v2673_v59 = vand.u32 2147483647, %v4560_v13  ;;  %vm2685_vm13 = vweird.f32 %v4566_v35 }
 0xd05   :  { %v2812_v49 = vadd.f32 %v3438_v63, %v2811_v22  ;;  %v2799_v11 = vadd.f32 %v2795_v0, %v1699_v44  ;;  %v2546_v0 = vand.u32 2147483648, %v4546_v47  ;;  %vm4630_vm0 = vmor %vm2684_vm14, %vm2685_vm13 }
 0xd06   :  { %v2681_v48 = vsub.f32 1.0, %v2680_v8  ;;  %v2538_v23 = vmul.f32 %v4558_v27, %v2537_v3  ;;  %v2544_v8 = vand.u32 2147483647, %v4546_v47 }
 0xd07   :  { %v2816_v34 = vsel %vm2815_vm8, %v3438_v63, %v2812_v49  ;;  %v3201_v58 = vmul.f32 -1.442695, %v2799_v11  ;;  %v1686_v49 = vadd.f32 %v4530_v60, %v3965_v36  ;;  %v1690_v36 = vadd.f32 %v4530_v60, %v4140_v4 }
 0xd08   :  { %v2821_v1 = vsel %vm2818_vm9, %v2820_v28, %v2816_v34  ;;  %v4581_v37 = vpop.eup %3447  ;;  %v2682_v11 = vmul.f32 %v4566_v35, %v2681_v48  ;;  %v2539_v39 = vadd.f32 %v4558_v27, %v2538_v23  ;;  %vm2545_vm15 = vcmp.eq.f32.partialorder %v2544_v8, 8.507059e+37 }
 0xd09   :  { %v2848_v56 = vmul.f32 %v2843_v55, %v2821_v1  ;;  %3451 = vpow2.f32 %v3201_v58  ;;  %v4583_v25 = vpop.eup %3449  ;;  %v2665_v57 = vmul.f32 %v4581_v37, %v4560_v13  ;;  %vm2670_vm11 = vweird.f32 %v4581_v37 }
 0xd0a   :  { %v2219_v16 = vpop.permute.xlu1 %2218  ;;  %v2075_v5 = vpop.permute.xlu2 %2074  ;;  %3453 = vpow2.f32 %v3188_v10  ;;  %v2521_v28 = vmul.f32 %v4583_v25, %v4562_v20  ;;  %v2547_v10 = vor.u32 1.1754944e-38, %v2546_v0  ;;  %v2683_v4 = vadd.f32 %v4566_v35, %v2682_v11  ;;  %vm4702_vm14 = vmor %vm2669_vm4, %vm2670_vm11 }
 0xd0b   :  { %v2079_v51 = vadd.f32 %v2075_v5, %v1689_v19  ;;  %2852 = vrot.lane.b32.xlu0 %v2848_v56, %s3526_s22  ;;  %v2223_v55 = vadd.f32 %v2219_v16, %v1691_v53  ;;  %v2666_v1 = vsub.f32 1.0, %v2665_v57  ;;  %v2688_v16 = vand.u32 2147483647, %v4550_v54 }
 0xd0c   :  { %v2363_v63 = vpop.permute.xlu0 %2362  ;;  %v2543_v47 = vsel %vm4612_vm12, %v4558_v27, %v2539_v39  ;;  %v2690_v53 = vand.u32 2147483648, %v4550_v54  ;;  %v2687_v54 = vsel %vm4630_vm0, %v4566_v35, %v2683_v4  ;;  %vm2526_vm2 = vweird.f32 %v4583_v25 }
 0xd0d   :  { %v3181_v38 = vmul.f32 -1.442695, %v2079_v51  ;;  %v2367_v29 = vadd.f32 %v2363_v63, %v1693_v46  ;;  %v3185_v50 = vmul.f32 -1.442695, %v2223_v55  ;;  %v2522_v63 = vsub.f32 1.0, %v2521_v28  ;;  %vm4672_vm9 = vmor %vm2525_vm3, %vm2526_vm2 }
 0xd0e   :  { %v2667_v23 = vmul.f32 %v4581_v37, %v2666_v1  ;;  %vm2689_vm1 = vcmp.eq.f32.partialorder %v2688_v16, 8.507059e+37  ;;  %v2531_v16 = vand.u32 2147483648, %v4562_v20  ;;  %v2529_v4 = vand.u32 2147483647, %v4562_v20 }
 0xd0f   :  { %v3452_v44 = vpop.eup %3451  ;;  %v3189_v22 = vmul.f32 -1.442695, %v2367_v29  ;;  %3455 = vpow2.f32 %v3181_v38  ;;  %v2523_v11 = vmul.f32 %v4583_v25, %v2522_v63  ;;  %vm2674_vm0 = vcmp.eq.f32.partialorder %v2673_v59, 8.507059e+37 }
 0xd10   :  { %v4592_v43 = vadd.f32 1.0, %v3452_v44  ;;  %v3454_v58 = vpop.eup %3453  ;;  %vm2530_vm12 = vcmp.eq.f32.partialorder %v2529_v4, 8.507059e+37 }
 0xd11   :  { %3457 = vpow2.f32 %v3189_v22  ;;  %v4622_v29 = vadd.f32 1.0, %v3454_v58 }
 0xd12   :  { %3459 = vrcp.f32 %v4592_v43  ;;  %v2073_v24 = vpop.permute.xlu1 %2072  ;;  %v1929_v56 = vpop.permute.xlu2 %1928  ;;  %v2834_v35 = vand.u32 2147483648, %v4592_v43  ;;  %vm2828_vm6 = vweird.f32 %v4592_v43 }
 0xd13   :  { %v2078_v34 = vadd.f32 %v2073_v24, %v1688_v26  ;;  %1834 = vrot.lane.b32.xlu0 %v1830_v17, %s3526_s22  ;;  %3461 = vpow2.f32 %v3185_v50  ;;  %v1934_v48 = vadd.f32 %v1929_v56, %v1686_v49  ;;  %v2548_v17 = vsel %vm2545_vm15, %v2547_v10, %v2543_v47 }
 0xd14   :  { %v2217_v19 = vpop.permute.xlu0 %2216  ;;  %v2691_v49 = vor.u32 1.1754944e-38, %v2690_v53  ;;  %v2524_v10 = vadd.f32 %v4583_v25, %v2523_v11  ;;  %v2675_v53 = vand.u32 2147483648, %v4560_v13 }
 0xd15   :  { %v3180_v5 = vmul.f32 -1.442695, %v2078_v34  ;;  %v2222_v3 = vadd.f32 %v2217_v19, %v1690_v36  ;;  %v3456_v46 = vpop.eup %3455  ;;  %v3176_v24 = vmul.f32 -1.442695, %v1934_v48  ;;  %v2832_v19 = vand.u32 2147483647, %v4592_v43 }
 0xd16   :  { %v4638_v57 = vadd.f32 1.0, %v3456_v46  ;;  %v2692_v34 = vsel %vm2689_vm1, %v2691_v49, %v2687_v54  ;;  %v2835_v46 = vor.u32 1.1754944e-38, %v2834_v35  ;;  %v1685_v35 = vadd.f32 %v4530_v60, %v3853_v6 }
 0xd17   :  { %v3458_v38 = vpop.eup %3457  ;;  %3463 = vpow2.f32 %v3180_v5  ;;  %v3184_v22 = vmul.f32 -1.442695, %v2222_v3  ;;  %vm2833_vm10 = vcmp.eq.f32.partialorder %v2832_v19, 8.507059e+37 }
 0xd18   :  { %v3460_v55 = vpop.eup %3459  ;;  %v4626_v44 = vadd.f32 1.0, %v3458_v38 }
 0xd19   :  { %v2824_v26 = vmul.f32 %v3460_v55, %v4592_v43  ;;  %v3462_v28 = vpop.eup %3461  ;;  %vm2829_vm5 = vweird.f32 %v3460_v55 }
 0xd1a   :  { %3465 = vrcp.f32 %v4626_v44  ;;  %v2557_v0 = vpop.permute.xlu1 %2556  ;;  %v4658_v51 = vadd.f32 1.0, %v3462_v28  ;;  %vm2830_vm8 = vmor %vm2828_vm6, %vm2829_vm5  ;;  %vm2396_vm15 = vweird.f32 %v4626_v44  ;;  %vm2381_vm6 = vweird.f32 %v4622_v29 }
 0xd1b   :  { %3467 = vrcp.f32 %v4622_v29  ;;  %v2825_v50 = vsub.f32 1.0, %v2824_v26  ;;  %v2561_v39 = vmul.f32 %v2557_v0, %v2548_v17  ;;  %v2528_v26 = vsel %vm4672_vm9, %v4583_v25, %v2524_v10 }
 0xd1c   :  { %3469 = vpow2.f32 %v3184_v22  ;;  %v2701_v36 = vpop.permute.xlu0 %2700  ;;  %v2668_v22 = vadd.f32 %v4581_v37, %v2667_v23  ;;  %v2532_v0 = vor.u32 1.1754944e-38, %v2531_v16  ;;  %v2402_v23 = vand.u32 2147483648, %v4626_v44 }
 0xd1d   :  { %v3464_v58 = vpop.eup %3463  ;;  %v2705_v1 = vmul.f32 %v2701_v36, %v2692_v34  ;;  %2566 = vrot.lane.b32.xlu0 %v2561_v39, %s3526_s22  ;;  %v2826_v56 = vmul.f32 %v3460_v55, %v2825_v50  ;;  %3471 = vrcp.f32 %v4638_v57  ;;  %v2400_v34 = vand.u32 2147483647, %v4626_v44 }
 0xd1e   :  { %v4649_v8 = vadd.f32 1.0, %v3464_v58  ;;  %3473 = vpow2.f32 %v3176_v24  ;;  %v2533_v39 = vsel %vm2530_vm12, %v2532_v0, %v2528_v26  ;;  %v2672_v58 = vsel %vm4702_vm14, %v4581_v37, %v2668_v22 }
 0xd1f   :  { %2710 = vrot.lane.b32.xlu2 %v2705_v1, %s3526_s22  ;;  %v2827_v5 = vadd.f32 %v3460_v55, %v2826_v56  ;;  %v2413_v1 = vpop.permute.xlu2 %2412  ;;  %v2676_v10 = vor.u32 1.1754944e-38, %v2675_v53  ;;  %v2403_v16 = vor.u32 1.1754944e-38, %v2402_v23  ;;  %vm2401_vm3 = vcmp.eq.f32.partialorder %v2400_v34, 8.507059e+37 }
 0xd20   :  { %v4656_v3 = vpop.eup %3465  ;;  %3475 = vrcp.f32 %v4649_v8  ;;  %vm2093_vm5 = vweird.f32 %v4649_v8  ;;  %v2097_v34 = vand.u32 2147483647, %v4649_v8 }
 0xd21   :  { %v4663_v47 = vpop.eup %3467  ;;  %v2392_v63 = vmul.f32 %v4656_v3, %v4626_v44  ;;  %v2831_v38 = vsel %vm2830_vm8, %v3460_v55, %v2827_v5  ;;  %3477 = vrcp.f32 %v4658_v51  ;;  %vm2397_vm13 = vweird.f32 %v4656_v3 }
 0xd22   :  { %v3470_v48 = vpop.eup %3469  ;;  %v4678_v27 = vpop.permute.xlu1 %2410  ;;  %v2836_v17 = vsel %vm2833_vm10, %v2835_v46, %v2831_v38  ;;  %v2377_v11 = vmul.f32 %v4663_v47, %v4622_v29  ;;  %vm4720_vm1 = vmor %vm2396_vm15, %vm2397_vm13  ;;  %v2677_v46 = vsel %vm2674_vm0, %v2676_v10, %v2672_v58  ;;  %vm2382_vm8 = vweird.f32 %v4663_v47  ;;  %v4942_v58 = vld [vmem:[#allocation2_spill] sm:$0xff] }
 0xd23   :  { %v4683_v54 = vadd.f32 1.0, %v3470_v48  ;;  %v2393_v20 = vsub.f32 1.0, %v2392_v63  ;;  %v2849_v49 = vmul.f32 %v4554_v40, %v2836_v17  ;;  %v4686_v55 = vpop.eup %3471  ;;  %v1687_v63 = vadd.f32 %v4530_v60, %v3989_v52  ;;  %vm4779_vm14 = vmor %vm2381_vm6, %vm2382_vm8 }
 0xd24   :  { %v2555_v50 = vpop.permute.xlu0 %2554  ;;  %v3474_v24 = vpop.eup %3473  ;;  %v2378_v37 = vsub.f32 1.0, %v2377_v11  ;;  %v2104_v13 = vmul.f32 %v4686_v55, %v4638_v57  ;;  %v2704_v38 = vmul.f32 %v4548_v21, %v2677_v46  ;;  %vm2098_vm13 = vcmp.eq.f32.partialorder %v2097_v34, 8.507059e+37 }
 0xd25   :  { %3479 = vrcp.f32 %v4683_v54  ;;  %v2394_v25 = vmul.f32 %v4656_v3, %v2393_v20  ;;  %2854 = vrot.lane.b32.xlu1 %v2849_v49, %s3526_s22  ;;  %v2560_v36 = vmul.f32 %v2555_v50, %v2533_v39  ;;  %v4725_v5 = vadd.f32 1.0, %v3474_v24 }
 0xd26   :  { %v4696_v40 = vpop.eup %3475  ;;  %v2379_v26 = vmul.f32 %v4663_v47, %v2378_v37  ;;  %v2105_v0 = vsub.f32 1.0, %v2104_v13  ;;  %v2243_v50 = vand.u32 2147483648, %v4683_v54  ;;  %v2241_v28 = vand.u32 2147483647, %v4683_v54 }
 0xd27   :  { %v2395_v56 = vadd.f32 %v4656_v3, %v2394_v25  ;;  %v2089_v19 = vmul.f32 %v4696_v40, %v4649_v8  ;;  %2564 = vrot.lane.b32.xlu2 %v2560_v36, %s3526_s22  ;;  %v4732_v4 = vpop.eup %3477  ;;  %3481 = vrcp.f32 %v4725_v5  ;;  %vm2094_vm4 = vweird.f32 %v4696_v40  ;;  %v2267_v36 = vpop.permute.xlu2 %2266 }
 0xd28   :  { %v2248_v52 = vmul.f32 %v4732_v4, %v4658_v51  ;;  %v2099_v25 = vand.u32 2147483648, %v4649_v8  ;;  %vm4756_vm9 = vmor %vm2093_vm5, %vm2094_vm4  ;;  %vm2237_vm10 = vweird.f32 %v4683_v54  ;;  %v2380_v6 = vadd.f32 %v4663_v47, %v2379_v26 }
 0xd29   :  { %v2399_v44 = vsel %vm4720_vm1, %v4656_v3, %v2395_v56  ;;  %v2090_v59 = vsub.f32 1.0, %v2089_v19  ;;  %v2106_v19 = vmul.f32 %v4686_v55, %v2105_v0  ;;  %vm2242_vm12 = vcmp.eq.f32.partialorder %v2241_v28, 8.507059e+37 }
 0xd2a   :  { %v1787_v53 = vpop.permute.xlu1 %1786  ;;  %v2404_v48 = vsel %vm2401_vm3, %v2403_v16, %v2399_v44  ;;  %v2244_v16 = vor.u32 1.1754944e-38, %v2243_v50  ;;  %v2100_v37 = vor.u32 1.1754944e-38, %v2099_v25  ;;  %v2249_v13 = vsub.f32 1.0, %v2248_v52 }
 0xd2b   :  { %v3480_v43 = vpop.eup %3479  ;;  %v4737_v22 = vadd.f32 %v1787_v53, %v1685_v35  ;;  %v2091_v3 = vmul.f32 %v4696_v40, %v2090_v59  ;;  %v2417_v21 = vmul.f32 %v2413_v1, %v2404_v48  ;;  %v1831_v1 = vsub.f32 %v3950_v32, %v4942_v58 }
 0xd2c   :  { %v2233_v17 = vmul.f32 %v3480_v43, %v4683_v54  ;;  %v1931_v20 = vpop.permute.xlu0 %1930  ;;  %vm2238_vm2 = vweird.f32 %v3480_v43  ;;  %v2387_v32 = vand.u32 2147483648, %v4622_v29  ;;  %v2385_v54 = vand.u32 2147483647, %v4622_v29 }
 0xd2d   :  { %v1935_v49 = vadd.f32 %v1931_v20, %v1687_v63  ;;  %2708 = vrot.lane.b32.xlu1 %v2704_v38, %s3526_s22  ;;  %v2092_v11 = vadd.f32 %v4696_v40, %v2091_v3  ;;  %v4767_v10 = vpop.eup %3481  ;;  %vm2239_vm11 = vmor %vm2237_vm10, %vm2238_vm2  ;;  %vm2109_vm15 = vweird.f32 %v4686_v55  ;;  %v2250_v20 = vmul.f32 %v4732_v4, %v2249_v13 }
 0xd2e   :  { %v2234_v23 = vsub.f32 1.0, %v2233_v17  ;;  %v2384_v17 = vsel %vm4779_vm14, %v4663_v47, %v2380_v6  ;;  %v1945_v29 = vmul.f32 %v4767_v10, %v4725_v5  ;;  %v2388_v0 = vor.u32 1.1754944e-38, %v2387_v32 }
 0xd2f   :  { %v3177_v24 = vmul.f32 -1.442695, %v1935_v49  ;;  %2422 = vrot.lane.b32.xlu2 %v2417_v21, %s3526_s22  ;;  %v2096_v8 = vsel %vm4756_vm9, %v4696_v40, %v2092_v11  ;;  %v2114_v40 = vand.u32 2147483648, %v4638_v57  ;;  %vm2108_vm0 = vweird.f32 %v4638_v57  ;;  %v2125_v50 = vpop.permute.xlu2 %2124 }
 0xd30   :  { %v2235_v39 = vmul.f32 %v3480_v43, %v2234_v23  ;;  %v2101_v53 = vsel %vm2098_vm13, %v2100_v37, %v2096_v8  ;;  %v2112_v49 = vand.u32 2147483647, %v4638_v57  ;;  %vm2386_vm1 = vcmp.eq.f32.partialorder %v2385_v54, 8.507059e+37  ;;  %vm2110_vm3 = vmor %vm2108_vm0, %vm2109_vm15 }
 0xd31   :  { %3483 = vpow2.f32 %v3177_v24  ;;  %v2389_v21 = vsel %vm2386_vm1, %v2388_v0, %v2384_v17  ;;  %v2115_v23 = vor.u32 1.1754944e-38, %v2114_v40  ;;  %v1946_v24 = vsub.f32 1.0, %v1945_v29 }
 0xd32   :  { %v2236_v56 = vadd.f32 %v3480_v43, %v2235_v39  ;;  %v2123_v44 = vpop.permute.xlu1 %2122  ;;  %v2416_v11 = vmul.f32 %v4678_v27, %v2389_v21  ;;  %v2251_v25 = vadd.f32 %v4732_v4, %v2250_v20  ;;  %vm2253_vm4 = vweird.f32 %v4732_v4 }
 0xd33   :  { %v2128_v48 = vmul.f32 %v2123_v44, %v2101_v53  ;;  %vm2113_vm5 = vcmp.eq.f32.partialorder %v2112_v49, 8.507059e+37  ;;  %v2258_v57 = vand.u32 2147483648, %v4658_v51  ;;  %vm2252_vm2 = vweird.f32 %v4658_v51 }
 0xd34   :  { %v2240_v59 = vsel %vm2239_vm11, %v3480_v43, %v2236_v56  ;;  %v2107_v43 = vadd.f32 %v4686_v55, %v2106_v19  ;;  %v4785_v3 = vpop.permute.xlu0 %1784  ;;  %v2256_v28 = vand.u32 2147483647, %v4658_v51  ;;  %vm2254_vm6 = vmor %vm2252_vm2, %vm2253_vm4  ;;  %v1947_v27 = vmul.f32 %v4767_v10, %v1946_v24 }
 0xd35   :  { %v2245_v46 = vsel %vm2242_vm12, %v2244_v16, %v2240_v59  ;;  %1836 = vrot.lane.b32.xlu1 %v1831_v1, %s3526_s22  ;;  %v2255_v34 = vsel %vm2254_vm6, %v4732_v4, %v2251_v25  ;;  %v2259_v35 = vor.u32 1.1754944e-38, %v2258_v57  ;;  %vm1950_vm9 = vweird.f32 %v4767_v10 }
 0xd36   :  { %v2272_v38 = vmul.f32 %v2267_v36, %v2245_v46  ;;  %v2111_v47 = vsel %vm2110_vm3, %v4686_v55, %v2107_v43  ;;  %vm2257_vm8 = vcmp.eq.f32.partialorder %v2256_v28, 8.507059e+37  ;;  %v1948_v8 = vadd.f32 %v4767_v10, %v1947_v27 }
 0xd37   :  { %v3484_v26 = vpop.eup %3483  ;;  %2132 = vrot.lane.b32.xlu2 %v2128_v48, %s3526_s22  ;;  %v2116_v39 = vsel %vm2113_vm5, %v2115_v23, %v2111_v47  ;;  %v2260_v19 = vsel %vm2257_vm8, %v2259_v35, %v2255_v34  ;;  %vm1949_vm10 = vweird.f32 %v4725_v5  ;;  %v1955_v16 = vand.u32 2147483648, %v4725_v5  ;;  %v1979_v46 = vpop.permute.xlu2 %1978 }
 0xd38   :  { %v1943_v52 = vadd.f32 1.0, %v3484_v26  ;;  %2276 = vrot.lane.b32.xlu0 %v2272_v38, %s3526_s22  ;;  %v2129_v55 = vmul.f32 %v2125_v50, %v2116_v39  ;;  %v1953_v4 = vand.u32 2147483647, %v4725_v5  ;;  %vm1951_vm12 = vmor %vm1949_vm10, %vm1950_vm9  ;;  %v4945_v26 = vld [vmem:[#allocation3_spill] sm:$0xff]  ;;  %v3173_v47 = vmul.f32 -1.442695, %v4737_v22 }
 0xd39   :  { %v1952_v32 = vsel %vm1951_vm12, %v4767_v10, %v1948_v8  ;;  %v1956_v54 = vor.u32 1.1754944e-38, %v1955_v16  ;;  %v1684_v10 = vadd.f32 %v4530_v60, %v4945_v26 }
 0xd3a   :  { %3485 = vrcp.f32 %v1943_v52  ;;  %v1970_v37 = vand.u32 2147483648, %v1943_v52  ;;  %v1968_v13 = vand.u32 2147483647, %v1943_v52  ;;  %vm1964_vm13 = vweird.f32 %v1943_v52 }
 0xd3b   :  { %vm1954_vm15 = vcmp.eq.f32.partialorder %v1953_v4, 8.507059e+37  ;;  %v1790_v17 = vadd.f32 %v4785_v3, %v1684_v10 }
 0xd3c   :  { %v2269_v1 = vpop.permute.xlu0 %2268  ;;  %v1971_v40 = vor.u32 1.1754944e-38, %v1970_v37  ;;  %vm1969_vm0 = vcmp.eq.f32.partialorder %v1968_v13, 8.507059e+37  ;;  %v1957_v63 = vsel %vm1954_vm15, %v1956_v54, %v1952_v32 }
 0xd3d   :  { %2420 = vrot.lane.b32.xlu1 %v2416_v11, %s3526_s22  ;;  %v2273_v51 = vmul.f32 %v2269_v1, %v2260_v19  ;;  %v1984_v43 = vmul.f32 %v1979_v46, %v1957_v63  ;;  %v3172_v29 = vmul.f32 -1.442695, %v1790_v17 }
 0xd3f   :  { %3487 = vpow2.f32 %v3172_v29 }
 0xd40   :  { %v3486_v36 = vpop.eup %3485  ;;  %2134 = vrot.lane.b32.xlu0 %v2129_v55, %s3526_s22 }
 0xd41   :  { %v1960_v56 = vmul.f32 %v3486_v36, %v1943_v52  ;;  %vm1965_vm11 = vweird.f32 %v3486_v36 }
 0xd42   :  { %vm1966_vm14 = vmor %vm1964_vm13, %vm1965_vm11 }
 0xd43   :  { %v1961_v6 = vsub.f32 1.0, %v1960_v56 }
 0xd44   :  { %v1981_v5 = vpop.permute.xlu0 %1980 }
 0xd45   :  { %v1962_v44 = vmul.f32 %v3486_v36, %v1961_v6  ;;  %2278 = vrot.lane.b32.xlu1 %v2273_v51, %s3526_s22  ;;  %v3488_v20 = vpop.eup %3487 }
 0xd46   :  { %v1798_v0 = vadd.f32 1.0, %v3488_v20 }
 0xd47   :  { %v1963_v59 = vadd.f32 %v3486_v36, %v1962_v44 }
 0xd48   :  { %3489 = vrcp.f32 %v1798_v0  ;;  %v1811_v24 = vand.u32 2147483648, %v1798_v0  ;;  %vm1805_vm3 = vweird.f32 %v1798_v0  ;;  %v1809_v60 = vand.u32 2147483647, %v1798_v0 }
 0xd49   :  { %v1967_v53 = vsel %vm1966_vm14, %v3486_v36, %v1963_v59  ;;  %3491 = vpow2.f32 %v3173_v47 }
 0xd4a   :  { %v1972_v38 = vsel %vm1969_vm0, %v1971_v40, %v1967_v53  ;;  %v1812_v25 = vor.u32 1.1754944e-38, %v1811_v24  ;;  %vm1810_vm5 = vcmp.eq.f32.partialorder %v1809_v60, 8.507059e+37 }
 0xd4b   :  { %v1985_v48 = vmul.f32 %v1981_v5, %v1972_v38 }
 0xd4d   :  { %1988 = vrot.lane.b32.xlu1 %v1984_v43, %s3526_s22  ;;  %1990 = vrot.lane.b32.xlu2 %v1985_v48, %s3526_s22 }
 0xd4e   :  { %v3490_v49 = vpop.eup %3489 }
 0xd4f   :  { %v1801_v52 = vmul.f32 %v3490_v49, %v1798_v0  ;;  %vm1806_vm1 = vweird.f32 %v3490_v49  ;;  %v3492_v57 = vpop.eup %3491 }
 0xd50   :  { %vm1807_vm4 = vmor %vm1805_vm3, %vm1806_vm1  ;;  %v1799_v27 = vadd.f32 1.0, %v3492_v57 }
 0xd51   :  { %v1802_v21 = vsub.f32 1.0, %v1801_v52 }
 0xd52   :  { %3493 = vrcp.f32 %v1799_v27  ;;  %v1826_v32 = vand.u32 2147483648, %v1799_v27  ;;  %vm1820_vm6 = vweird.f32 %v1799_v27 }
 0xd53   :  { %v1803_v23 = vmul.f32 %v3490_v49, %v1802_v21 }
 0xd54   :  { %v1827_v53 = vor.u32 1.1754944e-38, %v1826_v32 }
 0xd55   :  { %v1804_v50 = vadd.f32 %v3490_v49, %v1803_v23 }
 0xd57   :  { %v1808_v3 = vsel %vm1807_vm4, %v3490_v49, %v1804_v50 }
 0xd58   :  { %v1813_v39 = vsel %vm1810_vm5, %v1812_v25, %v1808_v3  ;;  %v3494_v22 = vpop.eup %3493 }
 0xd59   :  { %v1816_v34 = vmul.f32 %v3494_v22, %v1799_v27  ;;  %vm1821_vm2 = vweird.f32 %v3494_v22 }
 0xd5a   :  { %vm1822_vm8 = vmor %vm1820_vm6, %vm1821_vm2 }
 0xd5b   :  { %v1817_v56 = vsub.f32 1.0, %v1816_v34 }
 0xd5d   :  { %v1818_v6 = vmul.f32 %v3494_v22, %v1817_v56 }
 0xd5f   :  { %v1819_v44 = vadd.f32 %v3494_v22, %v1818_v6 }
 0xd61   :  { %v1823_v40 = vsel %vm1822_vm8, %v3494_v22, %v1819_v44  ;;  %v4946_v22 = vlaneseq }
 0xd63   :  { %v4864_v34 = vshrl.u32 %v4946_v22, 7 }
 0xd65   :  { %v2993_v56 = vadd.s32 16, %v4864_v34 }
 0xd79   :  { %v2711_v19 = vpop.permute.xlu2 %2710 }
 0xd7a   :  { %v2715_v37 = vadd.f32 %v2711_v19, %v4332_v62  ;;  %v2994_v19 = vadd.s32 24, %v4864_v34 }
 0xd7d   :  { %v2853_v11 = vpop.permute.xlu0 %2852 }
 0xd7e   :  { %v2858_v35 = vadd.f32 %v2853_v11, %v4387_v31  ;;  %v1824_v31 = vand.u32 2147483647, %v1799_v27 }
 0xd80   :  { %vm1825_vm9 = vcmp.eq.f32.partialorder %v1824_v31, 8.507059e+37  ;;  %v2995_v31 = vadd.s32 32, %v4864_v34 }
 0xd85   :  { %v1835_v28 = vpop.permute.xlu0 %1834 }
 0xd86   :  { %v1840_v55 = vmul.f32 %v1835_v28, %v1813_v39 }
 0xd88   :  { %1844 = vrot.lane.b32.xlu0 %v1840_v55, %s3526_s22 }
 0xd8f   :  { %v2567_v13 = vpop.permute.xlu0 %2566 }
 0xd90   :  { %v2571_v54 = vadd.f32 %v2567_v13, %v4259_v61 }
 0xd97   :  { %v2855_v36 = vpop.permute.xlu1 %2854 }
 0xd98   :  { %v2859_v1 = vadd.f32 %v2855_v36, %v4390_v7  ;;  %v2565_v7 = vpop.permute.xlu2 %2564 }
 0xd99   :  { %v2570_v62 = vadd.f32 %v2565_v7, %v4256_v2 }
 0xd9a   :  { %v2871_v8 = vpack.c.bf16 %v2859_v1, %v2858_v35  ;;  %v2992_v35 = vadd.s32 8, %v4864_v34  ;;  %v4870_v1 = vld [vmem:[%s4916_s1] ss:$0 sm:$0xff] }
 0xd9b   :  { %v2869_v5 = vpack.c.bf16 %v2571_v54, %v2570_v62  ;;  %vm3001_vm11 = vcmp.eq.s32.totalorder %v4864_v34, %v4870_v1  ;;  %vm3004_vm12 = vcmp.eq.s32.totalorder %v2994_v19, %v4870_v1  ;;  %vm3005_vm13 = vcmp.eq.s32.totalorder %v2995_v31, %v4870_v1 }
 0xd9c   :  { %v2906_v51 = vsel %vm281_vm7, %v2871_v8, 0  ;;  %vm3002_vm10 = vcmp.eq.s32.totalorder %v2992_v35, %v4870_v1  ;;  %v4947_v8 = vmov 0.0  }
 0xd9d   :  { %2908 = vmatpush.bf16.xpose.msra.mxu3 %v2906_v51  ;;  %v2900_v43 = vsel %vm281_vm7, %v2869_v5, 0  ;;  %v3207_v51 = vsel %vm3002_vm10, 1.0, %v4947_v8  ;;  %v3209_v32 = vsel %vm3004_vm12, 1.0, %v4947_v8 }
 0xd9f   :  { %v2709_v16 = vpop.permute.xlu1 %2708 }
 0xda0   :  { %v2714_v4 = vadd.f32 %v2709_v16, %v4329_v45  ;;  %v1828_v45 = vsel %vm1825_vm9, %v1827_v53, %v1823_v40  ;;  %v2423_v48 = vpop.permute.xlu2 %2422  ;;  %v3206_v16 = vsel %vm3001_vm11, 1.0, %v4947_v8  ;;  %v3210_v53 = vsel %vm3005_vm13, 1.0, %v4947_v8 }
 0xda1   :  { %v2427_v10 = vadd.f32 %v2423_v48, %v4168_v41 }
 0xda2   :  { %v2870_v59 = vpack.c.bf16 %v2715_v37, %v2714_v4 }
 0xda4   :  { %v2903_v46 = vsel %vm281_vm7, %v2870_v59, 0 }
 0xda5   :  { %2909 = vmatpush.bf16.xpose.msra.mxu3 %v2903_v46 }
 0xda7   :  { %v1837_v63 = vpop.permute.xlu1 %1836 }
 0xda8   :  { %v1841_v38 = vmul.f32 %v1837_v63, %v1828_v45  ;;  %v2133_v47 = vpop.permute.xlu2 %2132 }
 0xda9   :  { %v2138_v41 = vadd.f32 %v2133_v47, %v3959_v30 }
 0xdaa   :  { %1846 = vrot.lane.b32.xlu1 %v1841_v38, %s3526_s22  ;;  %v2277_v26 = vpop.permute.xlu0 %2276 }
 0xdab   :  { %v2282_v0 = vadd.f32 %v2277_v26, %v4083_v15 }
 0xdad   :  { %2910 = vmatpush.bf16.xpose.msra.mxu3 %v2900_v43 }
 0xdaf   :  { %v2421_v61 = vpop.permute.xlu1 %2420 }
 0xdb0   :  { %v2426_v17 = vadd.f32 %v2421_v61, %v4165_v18  ;;  %v1991_v24 = vpop.permute.xlu2 %1990 }
 0xdb2   :  { %v2868_v29 = vpack.c.bf16 %v2427_v10, %v2426_v17  ;;  %v2135_v52 = vpop.permute.xlu0 %2134 }
 0xdb3   :  { %v2139_v23 = vadd.f32 %v2135_v52, %v3963_v33 }
 0xdb4   :  { %v2897_v2 = vsel %vm281_vm7, %v2868_v29, 0 }
 0xdb5   :  { %2911 = vmatpush.bf16.xpose.msra.mxu3 %v2897_v2  ;;  %v2866_v18 = vpack.c.bf16 %v2139_v23, %v2138_v41 }
 0xdb7   :  { %v2279_v20 = vpop.permute.xlu1 %2278  ;;  %v2891_v3 = vsel %vm281_vm7, %v2866_v18, 0 }
 0xdb8   :  { %v2283_v49 = vadd.f32 %v2279_v20, %v4080_v9  ;;  %v1995_v9 = vadd.f32 %v1991_v24, %v3858_v12  ;;  %v3520_v12 = vld [vmem:[%s4910_s2 + $0x8] sm:$0xff] }
 0xdba   :  { %v2867_v21 = vpack.c.bf16 %v2283_v49, %v2282_v0 }
 0xdbc   :  { %v2894_v11 = vsel %vm281_vm7, %v2867_v21, 0 }
 0xdbd   :  { %2912 = vmatpush.bf16.xpose.msra.mxu3 %v2894_v11 }
 0xdbf   :  { %v1989_v50 = vpop.permute.xlu1 %1988 }
 0xdc0   :  { %v1994_v60 = vadd.f32 %v1989_v50, %v3861_v14  ;;  %v3519_v14 = vld [vmem:[%s4910_s2] sm:$0xff] }
 0xdc2   :  { %v2865_v15 = vpack.c.bf16 %v1995_v9, %v1994_v60  ;;  %v2996_v9 = vadd.s32 40, %v4864_v34 }
 0xdc4   :  { %v2888_v25 = vsel %vm281_vm7, %v2865_v15, 0  ;;  %vm3006_vm14 = vcmp.eq.s32.totalorder %v2996_v9, %v4870_v1 }
 0xdc5   :  { %2913 = vmatpush.bf16.xpose.msra.mxu3 %v2891_v3 }
 0xdcd   :  { %2914 = vmatpush.bf16.xpose.msra.mxu3 %v2888_v25 }
 0xdfa   :  { %v1845_v33 = vpop.permute.xlu0 %1844 }
 0xdfb   :  { %v1850_v39 = vadd.f32 %v1845_v33, %v3764_v42  ;;  %v3521_v42 = vld [vmem:[%s4910_s2 + $0x10] sm:$0xff]  ;;  %v2997_v33 = vadd.s32 48, %v4864_v34 }
 0xdfd   :  { %vm3007_vm15 = vcmp.eq.s32.totalorder %v2997_v33, %v4870_v1 }
 0xdfe   :  { %v3212_v35 = vsel %vm3007_vm15, 1.0, %v4947_v8 }
 0xe1c   :  { %v1847_v57 = vpop.permute.xlu1 %1846 }
 0xe1d   :  { %v1851_v30 = vadd.f32 %v1847_v57, %v4942_v58  ;;  %v3522_v58 = vld [vmem:[%s4910_s2 + $0x18] sm:$0xff] }
 0xe1f   :  { %v2864_v28 = vpack.c.bf16 %v1851_v30, %v1850_v39 }
 0xe21   :  { %v2885_v55 = vsel %vm281_vm7, %v2864_v28, 0 }
 0xe22   :  { %2915 = vmatpush.bf16.xpose.msra.mxu3 %v2885_v55  ;;  %v2998_v55 = vadd.s32 56, %v4864_v34 }
 0xe24   :  { %vm3008_vm0 = vcmp.eq.s32.totalorder %v2998_v55, %v4870_v1 }
 0xe29   :  { %3202 = vmatmul.msk.bf16.vlgmr.msra.gmra.mxu3 %vm281_vm7, %v3519_v14 }
 0xe39   :  { %3203 = vmatmul.msk.bf16.gmra.mxu3 %vm281_vm7, %v3520_v12 }
 0xe49   :  { %3204 = vmatmul.msk.bf16.gmra.mxu3 %vm281_vm7, %v3521_v42 }
 0xe59   :  { %3205 = vmatmul.msk.bf16.gmra.mxu3 %vm281_vm7, %v3522_v58  ;;  %vm3003_vm7 = vcmp.eq.s32.totalorder %v2993_v56, %v4870_v1  ;;  %v3211_v58 = vsel %vm3006_vm14, 1.0, %v4947_v8 }
 0xe5a   :  { %v3208_v37 = vsel %vm3003_vm7, 1.0, %v4947_v8 }
 0xeac   :  { %v2917_v27 = vpop.f32.mrf.mxu3 }
 0xead   :  { %v3025_v44 = vmul.f32 %v3206_v16, %v2917_v27 }
 0xeb4   :  { %v2919_v36 = vpop.f32.mrf.mxu3 }
 0xeb5   :  { %v3026_v4 = vmul.f32 %v3207_v51, %v2919_v36 }
 0xeb7   :  { %v3033_v59 = vadd.f32 %v3026_v4, %v3025_v44 }
 0xebc   :  { %v2922_v6 = vpop.f32.mrf.mxu3 }
 0xebd   :  { %v3027_v13 = vmul.f32 %v3208_v37, %v2922_v6 }
 0xebf   :  { %v3034_v54 = vadd.f32 %v3033_v59, %v3027_v13 }
 0xec4   :  { %v2924_v7 = vpop.f32.mrf.mxu3 }
 0xec5   :  { %v3028_v46 = vmul.f32 %v3209_v32, %v2924_v7 }
 0xec7   :  { %v3035_v40 = vadd.f32 %v3034_v54, %v3028_v46 }
 0xecc   :  { %v2927_v62 = vpop.f32.mrf.mxu3 }
 0xecd   :  { %v3029_v45 = vmul.f32 %v3210_v53, %v2927_v62  ;;  %v2937_v26 = vmax.f32 %v2917_v27, %v2927_v62 }
 0xecf   :  { %v3036_v63 = vadd.f32 %v3035_v40, %v3029_v45 }
 0xed4   :  { %v2929_v38 = vpop.f32.mrf.mxu3 }
 0xed5   :  { %v2938_v43 = vmax.f32 %v2919_v36, %v2929_v38  ;;  %v3030_v51 = vmul.f32 %v3211_v58, %v2929_v38 }
 0xed7   :  { %v2941_v17 = vmax.f32 %v2937_v26, %v2938_v43  ;;  %v3037_v13 = vadd.f32 %v3036_v63, %v3030_v51 }
 0xedc   :  { %v2932_v5 = vpop.f32.mrf.mxu3 }
 0xedd   :  { %v2939_v61 = vmax.f32 %v2922_v6, %v2932_v5  ;;  %v3031_v37 = vmul.f32 %v3212_v35, %v2932_v5 }
 0xee4   :  { %v2934_v48 = vpop.f32.mrf.mxu3 }
 0xee5   :  { %v2940_v10 = vmax.f32 %v2924_v7, %v2934_v48 }
 0xee7   :  { %v2942_v29 = vmax.f32 %v2939_v61, %v2940_v10 }
 0xee9   :  { %v2943_v2 = vmax.f32 %v2941_v17, %v2942_v29 }
 0xeeb   :  { %v2944_v20 = vrot.slane %v2943_v2, 4 }
 0xeed   :  { %v2945_v0 = vmax.f32 %v2943_v2, %v2944_v20 }
 0xeef   :  { %v2946_v49 = vrot.slane %v2945_v0, 2 }
 0xef1   :  { %v2947_v52 = vmax.f32 %v2945_v0, %v2946_v49 }
 0xef3   :  { %v2948_v21 = vrot.slane %v2947_v52, 1 }
 0xef5   :  { %v4886_v47 = vmax.f32 %v2947_v52, %v2948_v21 }
 0xef7   :  { %v2950_v23 = vsub.f32 %v2917_v27, %v4886_v47  ;;  %v2951_v11 = vsub.f32 %v2919_v36, %v4886_v47  ;;  %v2952_v41 = vsub.f32 %v2922_v6, %v4886_v47  ;;  %v2953_v18 = vsub.f32 %v2924_v7, %v4886_v47 }
 0xef8   :  { %v2954_v60 = vsub.f32 %v2927_v62, %v4886_v47  ;;  %v2955_v15 = vsub.f32 %v2929_v38, %v4886_v47  ;;  %v2956_v57 = vsub.f32 %v2932_v5, %v4886_v47  ;;  %v2957_v30 = vsub.f32 %v2934_v48, %v4886_v47 }
 0xef9   :  { %v2958_v50 = vmul.f32 1.442695, %v2950_v23  ;;  %v2960_v24 = vmul.f32 1.442695, %v2951_v11  ;;  %v2962_v3 = vmul.f32 1.442695, %v2952_v41  ;;  %v3038_v7 = vadd.f32 %v3037_v13, %v3031_v37 }
 0xefa   :  { %v2964_v25 = vmul.f32 1.442695, %v2953_v18  ;;  %v2966_v39 = vmul.f32 1.442695, %v2954_v60  ;;  %v2968_v28 = vmul.f32 1.442695, %v2955_v15 }
 0xefb   :  { %3495 = vpow2.f32 %v2958_v50  ;;  %v2970_v42 = vmul.f32 1.442695, %v2956_v57  ;;  %v2972_v36 = vmul.f32 1.442695, %v2957_v30  ;;  %v3213_v6 = vsel %vm3008_vm0, 1.0, %v4947_v8 }
 0xefc   :  { %3497 = vpow2.f32 %v2960_v24  ;;  %v3032_v32 = vmul.f32 %v3213_v6, %v2934_v48 }
 0xefd   :  { %3499 = vpow2.f32 %v2962_v3 }
 0xefe   :  { %3501 = vpow2.f32 %v2964_v25  ;;  %v3039_v46 = vadd.f32 %v3038_v7, %v3032_v32 }
 0xeff   :  { %3503 = vpow2.f32 %v2966_v39 }
 0xf00   :  { %3505 = vpow2.f32 %v2968_v28  ;;  %v3040_v62 = vrot.slane %v3039_v46, 4 }
 0xf01   :  { %v3496_v14 = vpop.eup %3495  ;;  %3507 = vpow2.f32 %v2970_v42 }
 0xf02   :  { %v3498_v12 = vpop.eup %3497  ;;  %3509 = vpow2.f32 %v2972_v36  ;;  %v3041_v43 = vadd.f32 %v3040_v62, %v3039_v46 }
 0xf03   :  { %v2974_v27 = vadd.f32 %v3498_v12, %v3496_v14  ;;  %v3500_v22 = vpop.eup %3499 }
 0xf04   :  { %v3502_v19 = vpop.eup %3501  ;;  %v3042_v5 = vrot.slane %v3041_v43, 2 }
 0xf05   :  { %v2975_v56 = vadd.f32 %v3500_v22, %v2974_v27  ;;  %v3504_v16 = vpop.eup %3503 }
 0xf06   :  { %v3506_v44 = vpop.eup %3505  ;;  %v3043_v10 = vadd.f32 %v3042_v5, %v3041_v43 }
 0xf07   :  { %v2976_v34 = vadd.f32 %v3502_v19, %v2975_v56  ;;  %v3508_v31 = vpop.eup %3507 }
 0xf08   :  { %v3510_v54 = vpop.eup %3509  ;;  %v3044_v63 = vrot.slane %v3043_v10, 1 }
 0xf09   :  { %v2977_v4 = vadd.f32 %v3504_v16, %v2976_v34 }
 0xf0a   :  { %v3045_v2 = vadd.f32 %v3044_v63, %v3043_v10 }
 0xf0b   :  { %v2978_v59 = vadd.f32 %v3506_v44, %v2977_v4 }
 0xf0d   :  { %v2979_v1 = vadd.f32 %v3508_v31, %v2978_v59 }
 0xf0f   :  { %v2980_v40 = vadd.f32 %v3510_v54, %v2979_v1 }
 0xf11   :  { %v2981_v53 = vrot.slane %v2980_v40, 4 }
 0xf13   :  { %v2982_v45 = vadd.f32 %v2981_v53, %v2980_v40 }
 0xf15   :  { %v2983_v38 = vrot.slane %v2982_v45, 2 }
 0xf17   :  { %v2984_v8 = vadd.f32 %v2983_v38, %v2982_v45 }
 0xf19   :  { %v2985_v26 = vrot.slane %v2984_v8, 1 }
 0xf1b   :  { %v2986_v61 = vadd.f32 %v2985_v26, %v2984_v8 }
 0xf1d   :  { %3511 = vlog2.f32 %v2986_v61 }
 0xf23   :  { %v3512_v48 = vpop.eup %3511 }
 0xf24   :  { %v2988_v17 = vmul.f32 0.6931472, %v3512_v48 }
 0xf26   :  { %v2989_v29 = vadd.f32 %v2988_v17, %v4886_v47 }
 0xf28   :  { %v3046_v20 = vsub.f32 %v2989_v29, %v3045_v2 }
 0xf2a   :  { %3047 = vst [vmem:[%s4917_s7] sm:$0x1] %v3046_v20 }

</bundles_post_ra>
